<compile_context>
chip_gen: v7x
topology: tpu7x:2x2x1
jax: 0.10.0
libtpu: 0.0.40
codegen_flags: <defaults>
</compile_context>

<pallas_src>
import functools
import math

import jax
import jax.numpy as jnp
from jax.experimental import pallas as pl
from jax.experimental.pallas import tpu as pltpu


def _round_up(x, m):
    return ((x + m - 1) // m) * m


# -----------------------------------------------------------------------------
# Single fused kernel: 2-layer bi-GRU + attention + Linear(2H, 1)
# -----------------------------------------------------------------------------
def _fused_forward_kernel(xcat_ref,                     # (T, TB, 2F)  [x | x_time_reversed]
                          w0_ref,                       # (2F, G)      layer-0 merged input weights
                          whh0_ref,                     # (Ap, G)      layer-0 block-diag recurrent weights
                          b0_ref,                       # (1, G)       b_ih + b_hh(r,z) folded
                          bhn0_ref,                     # (1, Ap)      b_hh(n) kept separate
                          w1s_ref, w1c_ref,             # (Ap, G)      layer-1 input weights (same / cross buffer)
                          whh1_ref,                     # (Ap, G)
                          b1_ref, bhn1_ref,             # (1, G) / (1, Ap)
                          woutf_ref, woutb_ref,         # (H, 1) each  transfer layer split by feature half
                          bout_ref,                     # (1, 1)
                          weight_ref,                   # (TB, T) out: attention weights (batch-major)
                          out_ref,                      # (TB, 1) out: regression output
                          gi_sc,                        # (T, TB, G)  scratch: precomputed input gates
                          act_a,                        # (T, TB, Ap) scratch: [fwd(t)   | bwd(T-1-t)]
                          act_b,                        # (T, TB, Ap) scratch: [fwd(T-1-t)| bwd(t)]
                          *, H, T, TB, Ap, proj_dtype):
    A = 2 * H
    G = 3 * Ap
    unroll = True if T <= 16 else 8          # full unroll only for small T

    def run_layer(whh_ref_l, bhn_ref_l):
        whh = whh_ref_l[...]                 # hoisted out of the time loop
        bhn = bhn_ref_l[...]

        def step(s, h):                      # h = [h_fwd | h_bwd | pad]  (TB, Ap)
            gi_s = gi_sc[s]                  # single dynamic load per step
            gh = jnp.dot(h, whh, preferred_element_type=jnp.float32)
            r = jax.nn.sigmoid(gi_s[:, 0:Ap] + gh[:, 0:Ap])
            z = jax.nn.sigmoid(gi_s[:, Ap:2 * Ap] + gh[:, Ap:2 * Ap])
            n = jnp.tanh(gi_s[:, 2 * Ap:3 * Ap] + r * (gh[:, 2 * Ap:3 * Ap] + bhn))
            h_new = (1.0 - z) * n + z * h    # PyTorch GRU update
            # two full-width lane-aligned stores; act_b is the time-reversed copy
            act_a[s] = h_new
            act_b[T - 1 - s] = h_new
            return h_new

        return jax.lax.fori_loop(0, T, step,
                                 jnp.zeros((TB, Ap), jnp.float32),
                                 unroll=unroll)

    # ---------------- layer 0: hoisted, direction-merged, bias-folded projection
    xcat = xcat_ref[...].astype(proj_dtype).reshape(T * TB, xcat_ref.shape[-1])
    gi0 = jnp.dot(xcat, w0_ref[...].astype(proj_dtype),
                  preferred_element_type=jnp.float32) + b0_ref[...]
    gi_sc[...] = gi0.reshape(T, TB, G)
    run_layer(whh0_ref, bhn0_ref)

    # ---------------- layer 1: projection from layer-0 outputs resident in VMEM
    a_same = act_a[...].astype(proj_dtype).reshape(T * TB, Ap)
    a_cross = act_b[...].astype(proj_dtype).reshape(T * TB, Ap)
    gi1 = (jnp.dot(a_same, w1s_ref[...].astype(proj_dtype),
                   preferred_element_type=jnp.float32)
           + jnp.dot(a_cross, w1c_ref[...].astype(proj_dtype),
                     preferred_element_type=jnp.float32)
           + b1_ref[...])
    gi_sc[...] = gi1.reshape(T, TB, G)
    h_fin = run_layer(whh1_ref, bhn1_ref)    # (TB, Ap) = [h_fwd_final | h_bwd_final | pad]

    # ---------------- attention + transfer layer
    q_f = h_fin[:, 0:H]                      # hidden[-2]  (layer-1 forward final state)
    q_b = h_fin[:, H:A]                      # hidden[-1]  (layer-1 backward final state)

    act1 = act_a[...]                        # (T, TB, Ap): [:, :, 0:H] = fwd outputs, natural time order
    act2 = act_b[...]                        # (T, TB, Ap): [:, :, H:A] = bwd outputs, natural time order
    af = act1[:, :, 0:H]
    ab = act2[:, :, H:A]

    # score[t,b] = <outputs[t,b,:], query[b,:]>, outputs=[fwd|bwd], query=[h_bwd|h_fwd]
    scores_tb = (jnp.sum(af * q_b[None, :, :], axis=-1)
                 + jnp.sum(ab * q_f[None, :, :], axis=-1))               # (T, TB)

    # batch-major softmax: lane-dense exp / reductions, transpose-free weight store
    scores_bt = scores_tb.T                                              # (TB, T)
    m = jnp.max(scores_bt, axis=-1, keepdims=True)
    e_bt = jnp.exp(scores_bt - m)
    denom = jnp.sum(e_bt, axis=-1, keepdims=True)
    w_bt = e_bt / denom                      # exact normalization
    weight_ref[...] = w_bt

    w_tb = w_bt.T                            # time-major weights for the context sum
    ctx_f = jnp.sum(w_tb[:, :, None] * af, axis=0)                       # (TB, H)
    ctx_b = jnp.sum(w_tb[:, :, None] * ab, axis=0)                       # (TB, H)

    out_ref[...] = (jnp.dot(ctx_f, woutf_ref[...], preferred_element_type=jnp.float32)
                    + jnp.dot(ctx_b, woutb_ref[...], preferred_element_type=jnp.float32)
                    + bout_ref[...])


# -----------------------------------------------------------------------------
# Parameter packing: PyTorch-layout GRU params -> fused kernel layout
# Gate-major column layout, per gate group of width Ap=round_up(2H,128):
#   [ fwd(H) | bwd(H) | zero-pad(Ap-2H) ]   groups ordered r, z, n.
# -----------------------------------------------------------------------------
def pack_params(params, hidden_size):
    H = hidden_size
    A = 2 * H
    Ap = _round_up(A, 128)
    pad = Ap - A

    def pack_cols(mf, mb):
        # mf, mb: (D, 3H), PyTorch gate order [r|z|n]; returns (D, 3*Ap)
        D = mf.shape[0]
        groups = []
        for g in range(3):
            groups.append(mf[:, g * H:(g + 1) * H])
            groups.append(mb[:, g * H:(g + 1) * H])
            if pad:
                groups.append(jnp.zeros((D, pad), jnp.float32))
        return jnp.concatenate(groups, axis=1)

    def pad_rows(m):                         # (A, G) -> (Ap, G)
        return jnp.pad(m, ((0, pad), (0, 0))) if pad else m

    def rz_only(b):                          # (3H,): zero the n-gate third
        return jnp.concatenate([b[:2 * H], jnp.zeros((H,), jnp.float32)])

    def n_bias(bf, bb):                      # (1, Ap): [b_hn_f | b_hn_b | 0]
        v = jnp.concatenate([bf[2 * H:], bb[2 * H:]])
        return jnp.pad(v, (0, pad))[None, :]

    p = {}
    # ---- layer 0
    wih_f, whh_f, bih_f, bhh_f = params["gru"][(0, 0)]
    wih_b, whh_b, bih_b, bhh_b = params["gru"][(0, 1)]
    F = wih_f.shape[1]
    zF = jnp.zeros((F, 3 * H), jnp.float32)
    zH = jnp.zeros((H, 3 * H), jnp.float32)
    # xcat = [x | x_rev]: rows 0:F drive fwd cols, rows F:2F drive bwd cols
    p["w0"] = jnp.concatenate([pack_cols(wih_f.T, zF), pack_cols(zF, wih_b.T)], axis=0)
    p["whh0"] = pad_rows(jnp.concatenate([pack_cols(whh_f.T, zH),
                                          pack_cols(zH, whh_b.T)], axis=0))
    p["b0"] = (pack_cols(bih_f[None], bih_b[None])
               + pack_cols(rz_only(bhh_f)[None], rz_only(bhh_b)[None]))
    p["bhn0"] = n_bias(bhh_f, bhh_b)

    # ---- layer 1
    wih_f, whh_f, bih_f, bhh_f = params["gru"][(1, 0)]
    wih_b, whh_b, bih_b, bhh_b = params["gru"][(1, 1)]
    w1f = wih_f.T                            # (2H, 3H): rows 0:H act on fwd half, rows H:2H on bwd half
    w1b = wih_b.T
    z3 = jnp.zeros((H, 3 * H), jnp.float32)
    # act_a[s] = [af0[s] | ab0[T-1-s]]  -> "same" weights
    p["w1same"] = pad_rows(jnp.concatenate([pack_cols(w1f[:H], z3),
                                            pack_cols(z3, w1b[H:])], axis=0))
    # act_b[s] = [af0[T-1-s] | ab0[s]]  -> "cross" weights
    p["w1cross"] = pad_rows(jnp.concatenate([pack_cols(z3, w1b[:H]),
                                             pack_cols(w1f[H:], z3)], axis=0))
    p["whh1"] = pad_rows(jnp.concatenate([pack_cols(whh_f.T, zH),
                                          pack_cols(zH, whh_b.T)], axis=0))
    p["b1"] = (pack_cols(bih_f[None], bih_b[None])
               + pack_cols(rz_only(bhh_f)[None], rz_only(bhh_b)[None]))
    p["bhn1"] = n_bias(bhh_f, bhh_b)

    # ---- transfer layer
    p["woutf"] = params["w_out"][:H]
    p["woutb"] = params["w_out"][H:]
    p["bout"] = params["b_out"].reshape(1, 1)
    return p, Ap


# -----------------------------------------------------------------------------
# Full forward pass (one fused Pallas kernel, batch-parallel grid)
# -----------------------------------------------------------------------------
def attention_regressor_forward(x_btf, params, hidden_size, num_layers=2,
                                projection_dtype=jnp.float32):
    assert num_layers == 2, "fused kernel is specialized for num_layers=2"
    B, T, F = x_btf.shape
    H = hidden_size

    Bp8 = _round_up(B, 8)
    TILE_B = Bp8 if Bp8 <= 64 else 64        # rows per program (MXU occupancy)
    Bp = _round_up(Bp8, TILE_B)

    packed, Ap = pack_params(params, H)
    G = 3 * Ap

    x_tm = jnp.transpose(x_btf, (1, 0, 2)).astype(jnp.float32)       # (T, B, F)
    if Bp != B:
        x_tm = jnp.pad(x_tm, ((0, 0), (0, Bp - B), (0, 0)))
    # Direction merge hoisted to the wrapper: fwd gate cols consume x[t],
    # bwd gate cols consume x[T-1-t] (the flip is free in plain XLA).
    xcat = jnp.concatenate([x_tm, jnp.flip(x_tm, axis=0)], axis=-1)  # (T, Bp, 2F)

    kernel = functools.partial(_fused_forward_kernel, H=H, T=T, TB=TILE_B,
                               Ap=Ap, proj_dtype=projection_dtype)

    weight_keys = ("w0", "whh0", "b0", "bhn0", "w1same", "w1cross", "whh1",
                   "b1", "bhn1", "woutf", "woutb", "bout")
    weight_args = [packed[k] for k in weight_keys]

    def full_spec(arr):
        return pl.BlockSpec(arr.shape, lambda b, _nd=arr.ndim: (0,) * _nd)

    in_specs = [pl.BlockSpec((T, TILE_B, 2 * F), lambda b: (0, b, 0))]
    in_specs += [full_spec(a) for a in weight_args]
    out_specs = (pl.BlockSpec((TILE_B, T), lambda b: (b, 0)),
                 pl.BlockSpec((TILE_B, 1), lambda b: (b, 0)))

    # VMEM budget derived from the actual shapes (scratch + double-buffered blocks)
    scratch_bytes = 4 * (T * TILE_B * G + 2 * T * TILE_B * Ap)
    io_block_bytes = 4 * (T * TILE_B * 2 * F + TILE_B * T + TILE_B)
    weight_bytes = 4 * sum(int(a.size) for a in weight_args)
    vmem_bytes = scratch_bytes * 2 + 2 * (io_block_bytes + weight_bytes) + (8 << 20)
    vmem_bytes = int(min(max(vmem_bytes, 32 << 20), 112 << 20))

    weight_p, out_p = pl.pallas_call(
        kernel,
        out_shape=(jax.ShapeDtypeStruct((Bp, T), jnp.float32),
                   jax.ShapeDtypeStruct((Bp, 1), jnp.float32)),
        grid=(Bp // TILE_B,),
        in_specs=in_specs,
        out_specs=out_specs,
        scratch_shapes=[pltpu.VMEM((T, TILE_B, G), jnp.float32),
                        pltpu.VMEM((T, TILE_B, Ap), jnp.float32),
                        pltpu.VMEM((T, TILE_B, Ap), jnp.float32)],
        compiler_params=pltpu.CompilerParams(
            dimension_semantics=("parallel",),
            vmem_limit_bytes=vmem_bytes),
    )(xcat, *weight_args)

    return out_p[:B], weight_p[:B]


# -----------------------------------------------------------------------------
# Pure-JAX reference (PyTorch-faithful) for correctness checking
# -----------------------------------------------------------------------------
def reference_forward(x_btf, params, hidden_size, num_layers=2):
    B, T, _ = x_btf.shape
    H = hidden_size
    layer_in = x_btf.astype(jnp.float32)
    finals = []                                     # [l0_f, l0_b, l1_f, l1_b]
    for layer in range(num_layers):
        outs = []
        for d, rev in enumerate((False, True)):
            w_ih, w_hh, b_ih, b_hh = params["gru"][(layer, d)]
            h = jnp.zeros((B, H), jnp.float32)
            hs = [None] * T
            t_order = range(T - 1, -1, -1) if rev else range(T)
            for t in t_order:
                x_t = layer_in[:, t, :]
                gi = x_t @ w_ih.T + b_ih
                gh = h @ w_hh.T + b_hh
                r = jax.nn.sigmoid(gi[:, :H] + gh[:, :H])
                z = jax.nn.sigmoid(gi[:, H:2 * H] + gh[:, H:2 * H])
                n = jnp.tanh(gi[:, 2 * H:] + r * gh[:, 2 * H:])
                h = (1.0 - z) * n + z * h
                hs[t] = h
            outs.append(jnp.stack(hs, axis=1))      # (B, T, H)
            finals.append(h)
        layer_in = jnp.concatenate(outs, axis=-1)   # (B, T, 2H)
    outputs = layer_in
    query = jnp.concatenate([finals[-1], finals[-2]], axis=1)   # [bwd | fwd]
    scores = jnp.einsum('bta,ba->bt', outputs, query)
    w = jax.nn.softmax(scores, axis=-1)
    attn = jnp.einsum('bt,bta->ba', w, outputs)
    out = attn @ params["w_out"] + params["b_out"]
    return out, w


# -----------------------------------------------------------------------------
# Deterministic parameter initialization (PyTorch-style uniform(-k, k))
# -----------------------------------------------------------------------------
def init_params(key, input_size, hidden_size, num_layers):
    H = hidden_size
    k = 1.0 / math.sqrt(H)
    params = {"gru": {}}
    for layer in range(num_layers):
        d_in = input_size if layer == 0 else 2 * H
        for d in range(2):  # 0 = forward, 1 = backward
            key, k1, k2, k3, k4 = jax.random.split(key, 5)
            w_ih = jax.random.uniform(k1, (3 * H, d_in), jnp.float32, -k, k)
            w_hh = jax.random.uniform(k2, (3 * H, H), jnp.float32, -k, k)
            b_ih = jax.random.uniform(k3, (3 * H,), jnp.float32, -k, k)
            b_hh = jax.random.uniform(k4, (3 * H,), jnp.float32, -k, k)
            params["gru"][(layer, d)] = (w_ih, w_hh, b_ih, b_hh)
    key, k1, k2 = jax.random.split(key, 3)
    kt = 1.0 / math.sqrt(2 * H)
    params["w_out"] = jax.random.uniform(k1, (2 * H, 1), jnp.float32, -kt, kt)
    params["b_out"] = jax.random.uniform(k2, (1,), jnp.float32, -kt, kt)
    return params


if __name__ == "__main__":
    B, T, F = 4, 8, 6          # batch, sequence length, input feature size
    H = 32                     # encoder_hidden_size (small demo size)
    NUM_LAYERS = 2             # module default

    root = jax.random.PRNGKey(0)
    k_params, k_input = jax.random.split(root)
    params = init_params(k_params, F, H, NUM_LAYERS)
    x = jax.random.normal(k_input, (B, T, F), jnp.float32)

    output, weight = attention_regressor_forward(x, params, H, NUM_LAYERS)
    output = jax.block_until_ready(output)
    weight = jax.block_until_ready(weight)

    assert output.shape == (B, 1) and weight.shape == (B, T)
    assert bool(jnp.all(jnp.isfinite(output))) and bool(jnp.all(jnp.isfinite(weight)))
    # exact normalization: softmax rows must sum to 1
    assert bool(jnp.allclose(jnp.sum(weight, axis=-1), 1.0, atol=1e-5))

    # compare against a pure-JAX PyTorch-faithful reference
    ref_out, ref_w = reference_forward(x, params, H, NUM_LAYERS)
    assert bool(jnp.allclose(output, ref_out, atol=5e-3, rtol=5e-3))
    assert bool(jnp.allclose(weight, ref_w, atol=5e-3, rtol=5e-3))

    print("KERNEL_OK")
</pallas_src>

<mosaic_0001>
module attributes {stable_mosaic.version = 11 : i64} {
  func.func @_fused_forward_kernel(%arg0: i32, %arg1: memref<8x8x12xf32, #tpu.memory_space<vmem>>, %arg2: memref<12x384xf32, #tpu.memory_space<vmem>>, %arg3: memref<128x384xf32, #tpu.memory_space<vmem>>, %arg4: memref<1x384xf32, #tpu.memory_space<vmem>>, %arg5: memref<1x128xf32, #tpu.memory_space<vmem>>, %arg6: memref<128x384xf32, #tpu.memory_space<vmem>>, %arg7: memref<128x384xf32, #tpu.memory_space<vmem>>, %arg8: memref<128x384xf32, #tpu.memory_space<vmem>>, %arg9: memref<1x384xf32, #tpu.memory_space<vmem>>, %arg10: memref<1x128xf32, #tpu.memory_space<vmem>>, %arg11: memref<32x1xf32, #tpu.memory_space<vmem>>, %arg12: memref<32x1xf32, #tpu.memory_space<vmem>>, %arg13: memref<1x1xf32, #tpu.memory_space<vmem>>, %arg14: memref<8x8xf32, #tpu.memory_space<vmem>>, %arg15: memref<8x1xf32, #tpu.memory_space<vmem>>, %arg16: memref<8x8x384xf32, #tpu.memory_space<vmem>>, %arg17: memref<8x8x128xf32, #tpu.memory_space<vmem>>, %arg18: memref<8x8x128xf32, #tpu.memory_space<vmem>>) attributes {dimension_semantics = [#tpu.dimension_semantics<parallel>], iteration_bounds = array<i64: 1>, scalar_prefetch = 0 : i64, scratch_operands = 3 : i64, tpu.core_type = #tpu.core_type<tc>, window_params = [{transform_indices = @transform_0, window_bounds = array<i64: 8, 8, 12>}, {pipeline_mode = #tpu.pipeline_mode<synchronous>, transform_indices = @transform_1, window_bounds = array<i64: 12, 384>}, {pipeline_mode = #tpu.pipeline_mode<synchronous>, transform_indices = @transform_2, window_bounds = array<i64: 128, 384>}, {pipeline_mode = #tpu.pipeline_mode<synchronous>, transform_indices = @transform_3, window_bounds = array<i64: 1, 384>}, {pipeline_mode = #tpu.pipeline_mode<synchronous>, transform_indices = @transform_4, window_bounds = array<i64: 1, 128>}, {pipeline_mode = #tpu.pipeline_mode<synchronous>, transform_indices = @transform_5, window_bounds = array<i64: 128, 384>}, {pipeline_mode = #tpu.pipeline_mode<synchronous>, transform_indices = @transform_6, window_bounds = array<i64: 128, 384>}, {pipeline_mode = #tpu.pipeline_mode<synchronous>, transform_indices = @transform_7, window_bounds = array<i64: 128, 384>}, {pipeline_mode = #tpu.pipeline_mode<synchronous>, transform_indices = @transform_8, window_bounds = array<i64: 1, 384>}, {pipeline_mode = #tpu.pipeline_mode<synchronous>, transform_indices = @transform_9, window_bounds = array<i64: 1, 128>}, {pipeline_mode = #tpu.pipeline_mode<synchronous>, transform_indices = @transform_10, window_bounds = array<i64: 32, 1>}, {pipeline_mode = #tpu.pipeline_mode<synchronous>, transform_indices = @transform_11, window_bounds = array<i64: 32, 1>}, {pipeline_mode = #tpu.pipeline_mode<synchronous>, transform_indices = @transform_12, window_bounds = array<i64: 1, 1>}, {transform_indices = @transform_13, window_bounds = array<i64: 8, 8>}, {transform_indices = @transform_14, window_bounds = array<i64: 8, 1>}]} {
    %c0 = arith.constant 0 : index
    %c0_0 = arith.constant 0 : index
    %c0_1 = arith.constant 0 : index
    %0 = vector.load %arg1[%c0, %c0_0, %c0_1] : memref<8x8x12xf32, #tpu.memory_space<vmem>>, vector<8x8x12xf32>
    %1 = vector.shape_cast %0 : vector<8x8x12xf32> to vector<64x12xf32>
    %c0_2 = arith.constant 0 : index
    %c0_3 = arith.constant 0 : index
    %2 = vector.load %arg2[%c0_2, %c0_3] : memref<12x384xf32, #tpu.memory_space<vmem>>, vector<12x384xf32>
    %cst = arith.constant dense<0.000000e+00> : vector<64x384xf32>
    %3 = tpu.matmul %1, %2, %cst {dimension_numbers = #tpu.dot_dimension_numbers<[1], [0], [0], [1], [0, 0, 1, 1], [], []>} : vector<64x12xf32>, vector<12x384xf32>, vector<64x384xf32> -> vector<64x384xf32>
    %c0_4 = arith.constant 0 : index
    %c0_5 = arith.constant 0 : index
    %4 = vector.load %arg4[%c0_4, %c0_5] : memref<1x384xf32, #tpu.memory_space<vmem>>, vector<1x384xf32>
    %5 = vector.broadcast %4 : vector<1x384xf32> to vector<64x384xf32>
    %6 = arith.addf %3, %5 : vector<64x384xf32>
    %7 = vector.shape_cast %6 : vector<64x384xf32> to vector<8x8x384xf32>
    %c0_6 = arith.constant 0 : index
    %c0_7 = arith.constant 0 : index
    %c0_8 = arith.constant 0 : index
    %8 = vector.load %arg16[%c0_6, %c0_7, %c0_8] : memref<8x8x384xf32, #tpu.memory_space<vmem>>, vector<8x8x384xf32>
    tpu.vector_store %arg16[%c0_6, %c0_7, %c0_8], %7 {strides = array<i32>} : memref<8x8x384xf32, #tpu.memory_space<vmem>>, vector<8x8x384xf32>,
    %c0_9 = arith.constant 0 : index
    %c0_10 = arith.constant 0 : index
    %9 = vector.load %arg3[%c0_9, %c0_10] : memref<128x384xf32, #tpu.memory_space<vmem>>, vector<128x384xf32>
    %c0_11 = arith.constant 0 : index
    %c0_12 = arith.constant 0 : index
    %10 = vector.load %arg5[%c0_11, %c0_12] : memref<1x128xf32, #tpu.memory_space<vmem>>, vector<1x128xf32>
    %cst_13 = arith.constant 0.000000e+00 : f32
    %11 = vector.broadcast %cst_13 : f32 to vector<8x128xf32>
    %c0_i32 = arith.constant 0 : i32
    %12 = arith.index_cast %c0_i32 : i32 to index
    %c0_14 = arith.constant 0 : index
    %c0_15 = arith.constant 0 : index
    %13 = vector.load %arg16[%12, %c0_14, %c0_15] : memref<8x8x384xf32, #tpu.memory_space<vmem>>, vector<1x8x384xf32>
    %14 = vector.shape_cast %13 : vector<1x8x384xf32> to vector<8x384xf32>
    %cst_16 = arith.constant dense<0.000000e+00> : vector<8x384xf32>
    %15 = tpu.matmul %11, %9, %cst_16 {dimension_numbers = #tpu.dot_dimension_numbers<[1], [0], [0], [1], [0, 0, 1, 1], [], []>} : vector<8x128xf32>, vector<128x384xf32>, vector<8x384xf32> -> vector<8x384xf32>
    %16 = vector.extract_strided_slice %14 {offsets = [0, 0], sizes = [8, 128], strides = [1, 1]} : vector<8x384xf32> to vector<8x128xf32>
    %17 = vector.extract_strided_slice %15 {offsets = [0, 0], sizes = [8, 128], strides = [1, 1]} : vector<8x384xf32> to vector<8x128xf32>
    %18 = arith.addf %16, %17 : vector<8x128xf32>
    %19 = arith.negf %18 : vector<8x128xf32>
    %20 = math.exp %19 : vector<8x128xf32>
    %cst_17 = arith.constant 1.000000e+00 : f32
    %21 = vector.broadcast %cst_17 : f32 to vector<8x128xf32>
    %22 = arith.addf %21, %20 : vector<8x128xf32>
    %23 = arith.divf %21, %22 : vector<8x128xf32>
    %24 = vector.extract_strided_slice %14 {offsets = [0, 128], sizes = [8, 128], strides = [1, 1]} : vector<8x384xf32> to vector<8x128xf32>
    %25 = vector.extract_strided_slice %15 {offsets = [0, 128], sizes = [8, 128], strides = [1, 1]} : vector<8x384xf32> to vector<8x128xf32>
    %26 = arith.addf %24, %25 : vector<8x128xf32>
    %27 = arith.negf %26 : vector<8x128xf32>
    %28 = math.exp %27 : vector<8x128xf32>
    %cst_18 = arith.constant 1.000000e+00 : f32
    %29 = vector.broadcast %cst_18 : f32 to vector<8x128xf32>
    %30 = arith.addf %29, %28 : vector<8x128xf32>
    %31 = arith.divf %29, %30 : vector<8x128xf32>
    %32 = vector.extract_strided_slice %14 {offsets = [0, 256], sizes = [8, 128], strides = [1, 1]} : vector<8x384xf32> to vector<8x128xf32>
    %33 = vector.extract_strided_slice %15 {offsets = [0, 256], sizes = [8, 128], strides = [1, 1]} : vector<8x384xf32> to vector<8x128xf32>
    %34 = vector.broadcast %10 : vector<1x128xf32> to vector<8x128xf32>
    %35 = arith.addf %33, %34 : vector<8x128xf32>
    %36 = arith.mulf %23, %35 : vector<8x128xf32>
    %37 = arith.addf %32, %36 : vector<8x128xf32>
    %38 = math.tanh %37 : vector<8x128xf32>
    %cst_19 = arith.constant 1.000000e+00 : f32
    %39 = vector.broadcast %cst_19 : f32 to vector<8x128xf32>
    %40 = arith.subf %39, %31 : vector<8x128xf32>
    %41 = arith.mulf %40, %38 : vector<8x128xf32>
    %42 = arith.mulf %31, %11 : vector<8x128xf32>
    %43 = arith.addf %41, %42 : vector<8x128xf32>
    %44 = arith.index_cast %c0_i32 : i32 to index
    %c0_20 = arith.constant 0 : index
    %c0_21 = arith.constant 0 : index
    %45 = vector.load %arg17[%44, %c0_20, %c0_21] : memref<8x8x128xf32, #tpu.memory_space<vmem>>, vector<1x8x128xf32>
    %46 = vector.shape_cast %45 : vector<1x8x128xf32> to vector<8x128xf32>
    %47 = vector.shape_cast %43 : vector<8x128xf32> to vector<1x8x128xf32>
    tpu.vector_store %arg17[%44, %c0_20, %c0_21], %47 {strides = array<i32>} : memref<8x8x128xf32, #tpu.memory_space<vmem>>, vector<1x8x128xf32>,
    %c7_i32 = arith.constant 7 : i32
    %48 = arith.subi %c7_i32, %c0_i32 : i32
    %49 = arith.index_cast %48 : i32 to index
    %c0_22 = arith.constant 0 : index
    %c0_23 = arith.constant 0 : index
    %50 = vector.load %arg18[%49, %c0_22, %c0_23] : memref<8x8x128xf32, #tpu.memory_space<vmem>>, vector<1x8x128xf32>
    %51 = vector.shape_cast %50 : vector<1x8x128xf32> to vector<8x128xf32>
    %52 = vector.shape_cast %43 : vector<8x128xf32> to vector<1x8x128xf32>
    tpu.vector_store %arg18[%49, %c0_22, %c0_23], %52 {strides = array<i32>} : memref<8x8x128xf32, #tpu.memory_space<vmem>>, vector<1x8x128xf32>,
    %c1_i32 = arith.constant 1 : i32
    %53 = arith.index_cast %c1_i32 : i32 to index
    %c0_24 = arith.constant 0 : index
    %c0_25 = arith.constant 0 : index
    %54 = vector.load %arg16[%53, %c0_24, %c0_25] : memref<8x8x384xf32, #tpu.memory_space<vmem>>, vector<1x8x384xf32>
    %55 = vector.shape_cast %54 : vector<1x8x384xf32> to vector<8x384xf32>
    %cst_26 = arith.constant dense<0.000000e+00> : vector<8x384xf32>
    %56 = tpu.matmul %43, %9, %cst_26 {dimension_numbers = #tpu.dot_dimension_numbers<[1], [0], [0], [1], [0, 0, 1, 1], [], []>} : vector<8x128xf32>, vector<128x384xf32>, vector<8x384xf32> -> vector<8x384xf32>
    %57 = vector.extract_strided_slice %55 {offsets = [0, 0], sizes = [8, 128], strides = [1, 1]} : vector<8x384xf32> to vector<8x128xf32>
    %58 = vector.extract_strided_slice %56 {offsets = [0, 0], sizes = [8, 128], strides = [1, 1]} : vector<8x384xf32> to vector<8x128xf32>
    %59 = arith.addf %57, %58 : vector<8x128xf32>
    %60 = arith.negf %59 : vector<8x128xf32>
    %61 = math.exp %60 : vector<8x128xf32>
    %cst_27 = arith.constant 1.000000e+00 : f32
    %62 = vector.broadcast %cst_27 : f32 to vector<8x128xf32>
    %63 = arith.addf %62, %61 : vector<8x128xf32>
    %64 = arith.divf %62, %63 : vector<8x128xf32>
    %65 = vector.extract_strided_slice %55 {offsets = [0, 128], sizes = [8, 128], strides = [1, 1]} : vector<8x384xf32> to vector<8x128xf32>
    %66 = vector.extract_strided_slice %56 {offsets = [0, 128], sizes = [8, 128], strides = [1, 1]} : vector<8x384xf32> to vector<8x128xf32>
    %67 = arith.addf %65, %66 : vector<8x128xf32>
    %68 = arith.negf %67 : vector<8x128xf32>
    %69 = math.exp %68 : vector<8x128xf32>
    %cst_28 = arith.constant 1.000000e+00 : f32
    %70 = vector.broadcast %cst_28 : f32 to vector<8x128xf32>
    %71 = arith.addf %70, %69 : vector<8x128xf32>
    %72 = arith.divf %70, %71 : vector<8x128xf32>
    %73 = vector.extract_strided_slice %55 {offsets = [0, 256], sizes = [8, 128], strides = [1, 1]} : vector<8x384xf32> to vector<8x128xf32>
    %74 = vector.extract_strided_slice %56 {offsets = [0, 256], sizes = [8, 128], strides = [1, 1]} : vector<8x384xf32> to vector<8x128xf32>
    %75 = vector.broadcast %10 : vector<1x128xf32> to vector<8x128xf32>
    %76 = arith.addf %74, %75 : vector<8x128xf32>
    %77 = arith.mulf %64, %76 : vector<8x128xf32>
    %78 = arith.addf %73, %77 : vector<8x128xf32>
    %79 = math.tanh %78 : vector<8x128xf32>
    %cst_29 = arith.constant 1.000000e+00 : f32
    %80 = vector.broadcast %cst_29 : f32 to vector<8x128xf32>
    %81 = arith.subf %80, %72 : vector<8x128xf32>
    %82 = arith.mulf %81, %79 : vector<8x128xf32>
    %83 = arith.mulf %72, %43 : vector<8x128xf32>
    %84 = arith.addf %82, %83 : vector<8x128xf32>
    %85 = arith.index_cast %c1_i32 : i32 to index
    %c0_30 = arith.constant 0 : index
    %c0_31 = arith.constant 0 : index
    %86 = vector.load %arg17[%85, %c0_30, %c0_31] : memref<8x8x128xf32, #tpu.memory_space<vmem>>, vector<1x8x128xf32>
    %87 = vector.shape_cast %86 : vector<1x8x128xf32> to vector<8x128xf32>
    %88 = vector.shape_cast %84 : vector<8x128xf32> to vector<1x8x128xf32>
    tpu.vector_store %arg17[%85, %c0_30, %c0_31], %88 {strides = array<i32>} : memref<8x8x128xf32, #tpu.memory_space<vmem>>, vector<1x8x128xf32>,
    %c7_i32_32 = arith.constant 7 : i32
    %89 = arith.subi %c7_i32_32, %c1_i32 : i32
    %90 = arith.index_cast %89 : i32 to index
    %c0_33 = arith.constant 0 : index
    %c0_34 = arith.constant 0 : index
    %91 = vector.load %arg18[%90, %c0_33, %c0_34] : memref<8x8x128xf32, #tpu.memory_space<vmem>>, vector<1x8x128xf32>
    %92 = vector.shape_cast %91 : vector<1x8x128xf32> to vector<8x128xf32>
    %93 = vector.shape_cast %84 : vector<8x128xf32> to vector<1x8x128xf32>
    tpu.vector_store %arg18[%90, %c0_33, %c0_34], %93 {strides = array<i32>} : memref<8x8x128xf32, #tpu.memory_space<vmem>>, vector<1x8x128xf32>,
    %c2_i32 = arith.constant 2 : i32
    %94 = arith.index_cast %c2_i32 : i32 to index
    %c0_35 = arith.constant 0 : index
    %c0_36 = arith.constant 0 : index
    %95 = vector.load %arg16[%94, %c0_35, %c0_36] : memref<8x8x384xf32, #tpu.memory_space<vmem>>, vector<1x8x384xf32>
    %96 = vector.shape_cast %95 : vector<1x8x384xf32> to vector<8x384xf32>
    %cst_37 = arith.constant dense<0.000000e+00> : vector<8x384xf32>
    %97 = tpu.matmul %84, %9, %cst_37 {dimension_numbers = #tpu.dot_dimension_numbers<[1], [0], [0], [1], [0, 0, 1, 1], [], []>} : vector<8x128xf32>, vector<128x384xf32>, vector<8x384xf32> -> vector<8x384xf32>
    %98 = vector.extract_strided_slice %96 {offsets = [0, 0], sizes = [8, 128], strides = [1, 1]} : vector<8x384xf32> to vector<8x128xf32>
    %99 = vector.extract_strided_slice %97 {offsets = [0, 0], sizes = [8, 128], strides = [1, 1]} : vector<8x384xf32> to vector<8x128xf32>
    %100 = arith.addf %98, %99 : vector<8x128xf32>
    %101 = arith.negf %100 : vector<8x128xf32>
    %102 = math.exp %101 : vector<8x128xf32>
    %cst_38 = arith.constant 1.000000e+00 : f32
    %103 = vector.broadcast %cst_38 : f32 to vector<8x128xf32>
    %104 = arith.addf %103, %102 : vector<8x128xf32>
    %105 = arith.divf %103, %104 : vector<8x128xf32>
    %106 = vector.extract_strided_slice %96 {offsets = [0, 128], sizes = [8, 128], strides = [1, 1]} : vector<8x384xf32> to vector<8x128xf32>
    %107 = vector.extract_strided_slice %97 {offsets = [0, 128], sizes = [8, 128], strides = [1, 1]} : vector<8x384xf32> to vector<8x128xf32>
    %108 = arith.addf %106, %107 : vector<8x128xf32>
    %109 = arith.negf %108 : vector<8x128xf32>
    %110 = math.exp %109 : vector<8x128xf32>
    %cst_39 = arith.constant 1.000000e+00 : f32
    %111 = vector.broadcast %cst_39 : f32 to vector<8x128xf32>
    %112 = arith.addf %111, %110 : vector<8x128xf32>
    %113 = arith.divf %111, %112 : vector<8x128xf32>
    %114 = vector.extract_strided_slice %96 {offsets = [0, 256], sizes = [8, 128], strides = [1, 1]} : vector<8x384xf32> to vector<8x128xf32>
    %115 = vector.extract_strided_slice %97 {offsets = [0, 256], sizes = [8, 128], strides = [1, 1]} : vector<8x384xf32> to vector<8x128xf32>
    %116 = vector.broadcast %10 : vector<1x128xf32> to vector<8x128xf32>
    %117 = arith.addf %115, %116 : vector<8x128xf32>
    %118 = arith.mulf %105, %117 : vector<8x128xf32>
    %119 = arith.addf %114, %118 : vector<8x128xf32>
    %120 = math.tanh %119 : vector<8x128xf32>
    %cst_40 = arith.constant 1.000000e+00 : f32
    %121 = vector.broadcast %cst_40 : f32 to vector<8x128xf32>
    %122 = arith.subf %121, %113 : vector<8x128xf32>
    %123 = arith.mulf %122, %120 : vector<8x128xf32>
    %124 = arith.mulf %113, %84 : vector<8x128xf32>
    %125 = arith.addf %123, %124 : vector<8x128xf32>
    %126 = arith.index_cast %c2_i32 : i32 to index
    %c0_41 = arith.constant 0 : index
    %c0_42 = arith.constant 0 : index
    %127 = vector.load %arg17[%126, %c0_41, %c0_42] : memref<8x8x128xf32, #tpu.memory_space<vmem>>, vector<1x8x128xf32>
    %128 = vector.shape_cast %127 : vector<1x8x128xf32> to vector<8x128xf32>
    %129 = vector.shape_cast %125 : vector<8x128xf32> to vector<1x8x128xf32>
    tpu.vector_store %arg17[%126, %c0_41, %c0_42], %129 {strides = array<i32>} : memref<8x8x128xf32, #tpu.memory_space<vmem>>, vector<1x8x128xf32>,
    %c7_i32_43 = arith.constant 7 : i32
    %130 = arith.subi %c7_i32_43, %c2_i32 : i32
    %131 = arith.index_cast %130 : i32 to index
    %c0_44 = arith.constant 0 : index
    %c0_45 = arith.constant 0 : index
    %132 = vector.load %arg18[%131, %c0_44, %c0_45] : memref<8x8x128xf32, #tpu.memory_space<vmem>>, vector<1x8x128xf32>
    %133 = vector.shape_cast %132 : vector<1x8x128xf32> to vector<8x128xf32>
    %134 = vector.shape_cast %125 : vector<8x128xf32> to vector<1x8x128xf32>
    tpu.vector_store %arg18[%131, %c0_44, %c0_45], %134 {strides = array<i32>} : memref<8x8x128xf32, #tpu.memory_space<vmem>>, vector<1x8x128xf32>,
    %c3_i32 = arith.constant 3 : i32
    %135 = arith.index_cast %c3_i32 : i32 to index
    %c0_46 = arith.constant 0 : index
    %c0_47 = arith.constant 0 : index
    %136 = vector.load %arg16[%135, %c0_46, %c0_47] : memref<8x8x384xf32, #tpu.memory_space<vmem>>, vector<1x8x384xf32>
    %137 = vector.shape_cast %136 : vector<1x8x384xf32> to vector<8x384xf32>
    %cst_48 = arith.constant dense<0.000000e+00> : vector<8x384xf32>
    %138 = tpu.matmul %125, %9, %cst_48 {dimension_numbers = #tpu.dot_dimension_numbers<[1], [0], [0], [1], [0, 0, 1, 1], [], []>} : vector<8x128xf32>, vector<128x384xf32>, vector<8x384xf32> -> vector<8x384xf32>
    %139 = vector.extract_strided_slice %137 {offsets = [0, 0], sizes = [8, 128], strides = [1, 1]} : vector<8x384xf32> to vector<8x128xf32>
    %140 = vector.extract_strided_slice %138 {offsets = [0, 0], sizes = [8, 128], strides = [1, 1]} : vector<8x384xf32> to vector<8x128xf32>
    %141 = arith.addf %139, %140 : vector<8x128xf32>
    %142 = arith.negf %141 : vector<8x128xf32>
    %143 = math.exp %142 : vector<8x128xf32>
    %cst_49 = arith.constant 1.000000e+00 : f32
    %144 = vector.broadcast %cst_49 : f32 to vector<8x128xf32>
    %145 = arith.addf %144, %143 : vector<8x128xf32>
    %146 = arith.divf %144, %145 : vector<8x128xf32>
    %147 = vector.extract_strided_slice %137 {offsets = [0, 128], sizes = [8, 128], strides = [1, 1]} : vector<8x384xf32> to vector<8x128xf32>
    %148 = vector.extract_strided_slice %138 {offsets = [0, 128], sizes = [8, 128], strides = [1, 1]} : vector<8x384xf32> to vector<8x128xf32>
    %149 = arith.addf %147, %148 : vector<8x128xf32>
    %150 = arith.negf %149 : vector<8x128xf32>
    %151 = math.exp %150 : vector<8x128xf32>
    %cst_50 = arith.constant 1.000000e+00 : f32
    %152 = vector.broadcast %cst_50 : f32 to vector<8x128xf32>
    %153 = arith.addf %152, %151 : vector<8x128xf32>
    %154 = arith.divf %152, %153 : vector<8x128xf32>
    %155 = vector.extract_strided_slice %137 {offsets = [0, 256], sizes = [8, 128], strides = [1, 1]} : vector<8x384xf32> to vector<8x128xf32>
    %156 = vector.extract_strided_slice %138 {offsets = [0, 256], sizes = [8, 128], strides = [1, 1]} : vector<8x384xf32> to vector<8x128xf32>
    %157 = vector.broadcast %10 : vector<1x128xf32> to vector<8x128xf32>
    %158 = arith.addf %156, %157 : vector<8x128xf32>
    %159 = arith.mulf %146, %158 : vector<8x128xf32>
    %160 = arith.addf %155, %159 : vector<8x128xf32>
    %161 = math.tanh %160 : vector<8x128xf32>
    %cst_51 = arith.constant 1.000000e+00 : f32
    %162 = vector.broadcast %cst_51 : f32 to vector<8x128xf32>
    %163 = arith.subf %162, %154 : vector<8x128xf32>
    %164 = arith.mulf %163, %161 : vector<8x128xf32>
    %165 = arith.mulf %154, %125 : vector<8x128xf32>
    %166 = arith.addf %164, %165 : vector<8x128xf32>
    %167 = arith.index_cast %c3_i32 : i32 to index
    %c0_52 = arith.constant 0 : index
    %c0_53 = arith.constant 0 : index
    %168 = vector.load %arg17[%167, %c0_52, %c0_53] : memref<8x8x128xf32, #tpu.memory_space<vmem>>, vector<1x8x128xf32>
    %169 = vector.shape_cast %168 : vector<1x8x128xf32> to vector<8x128xf32>
    %170 = vector.shape_cast %166 : vector<8x128xf32> to vector<1x8x128xf32>
    tpu.vector_store %arg17[%167, %c0_52, %c0_53], %170 {strides = array<i32>} : memref<8x8x128xf32, #tpu.memory_space<vmem>>, vector<1x8x128xf32>,
    %c7_i32_54 = arith.constant 7 : i32
    %171 = arith.subi %c7_i32_54, %c3_i32 : i32
    %172 = arith.index_cast %171 : i32 to index
    %c0_55 = arith.constant 0 : index
    %c0_56 = arith.constant 0 : index
    %173 = vector.load %arg18[%172, %c0_55, %c0_56] : memref<8x8x128xf32, #tpu.memory_space<vmem>>, vector<1x8x128xf32>
    %174 = vector.shape_cast %173 : vector<1x8x128xf32> to vector<8x128xf32>
    %175 = vector.shape_cast %166 : vector<8x128xf32> to vector<1x8x128xf32>
    tpu.vector_store %arg18[%172, %c0_55, %c0_56], %175 {strides = array<i32>} : memref<8x8x128xf32, #tpu.memory_space<vmem>>, vector<1x8x128xf32>,
    %c4_i32 = arith.constant 4 : i32
    %176 = arith.index_cast %c4_i32 : i32 to index
    %c0_57 = arith.constant 0 : index
    %c0_58 = arith.constant 0 : index
    %177 = vector.load %arg16[%176, %c0_57, %c0_58] : memref<8x8x384xf32, #tpu.memory_space<vmem>>, vector<1x8x384xf32>
    %178 = vector.shape_cast %177 : vector<1x8x384xf32> to vector<8x384xf32>
    %cst_59 = arith.constant dense<0.000000e+00> : vector<8x384xf32>
    %179 = tpu.matmul %166, %9, %cst_59 {dimension_numbers = #tpu.dot_dimension_numbers<[1], [0], [0], [1], [0, 0, 1, 1], [], []>} : vector<8x128xf32>, vector<128x384xf32>, vector<8x384xf32> -> vector<8x384xf32>
    %180 = vector.extract_strided_slice %178 {offsets = [0, 0], sizes = [8, 128], strides = [1, 1]} : vector<8x384xf32> to vector<8x128xf32>
    %181 = vector.extract_strided_slice %179 {offsets = [0, 0], sizes = [8, 128], strides = [1, 1]} : vector<8x384xf32> to vector<8x128xf32>
    %182 = arith.addf %180, %181 : vector<8x128xf32>
    %183 = arith.negf %182 : vector<8x128xf32>
    %184 = math.exp %183 : vector<8x128xf32>
    %cst_60 = arith.constant 1.000000e+00 : f32
    %185 = vector.broadcast %cst_60 : f32 to vector<8x128xf32>
    %186 = arith.addf %185, %184 : vector<8x128xf32>
    %187 = arith.divf %185, %186 : vector<8x128xf32>
    %188 = vector.extract_strided_slice %178 {offsets = [0, 128], sizes = [8, 128], strides = [1, 1]} : vector<8x384xf32> to vector<8x128xf32>
    %189 = vector.extract_strided_slice %179 {offsets = [0, 128], sizes = [8, 128], strides = [1, 1]} : vector<8x384xf32> to vector<8x128xf32>
    %190 = arith.addf %188, %189 : vector<8x128xf32>
    %191 = arith.negf %190 : vector<8x128xf32>
    %192 = math.exp %191 : vector<8x128xf32>
    %cst_61 = arith.constant 1.000000e+00 : f32
    %193 = vector.broadcast %cst_61 : f32 to vector<8x128xf32>
    %194 = arith.addf %193, %192 : vector<8x128xf32>
    %195 = arith.divf %193, %194 : vector<8x128xf32>
    %196 = vector.extract_strided_slice %178 {offsets = [0, 256], sizes = [8, 128], strides = [1, 1]} : vector<8x384xf32> to vector<8x128xf32>
    %197 = vector.extract_strided_slice %179 {offsets = [0, 256], sizes = [8, 128], strides = [1, 1]} : vector<8x384xf32> to vector<8x128xf32>
    %198 = vector.broadcast %10 : vector<1x128xf32> to vector<8x128xf32>
    %199 = arith.addf %197, %198 : vector<8x128xf32>
    %200 = arith.mulf %187, %199 : vector<8x128xf32>
    %201 = arith.addf %196, %200 : vector<8x128xf32>
    %202 = math.tanh %201 : vector<8x128xf32>
    %cst_62 = arith.constant 1.000000e+00 : f32
    %203 = vector.broadcast %cst_62 : f32 to vector<8x128xf32>
    %204 = arith.subf %203, %195 : vector<8x128xf32>
    %205 = arith.mulf %204, %202 : vector<8x128xf32>
    %206 = arith.mulf %195, %166 : vector<8x128xf32>
    %207 = arith.addf %205, %206 : vector<8x128xf32>
    %208 = arith.index_cast %c4_i32 : i32 to index
    %c0_63 = arith.constant 0 : index
    %c0_64 = arith.constant 0 : index
    %209 = vector.load %arg17[%208, %c0_63, %c0_64] : memref<8x8x128xf32, #tpu.memory_space<vmem>>, vector<1x8x128xf32>
    %210 = vector.shape_cast %209 : vector<1x8x128xf32> to vector<8x128xf32>
    %211 = vector.shape_cast %207 : vector<8x128xf32> to vector<1x8x128xf32>
    tpu.vector_store %arg17[%208, %c0_63, %c0_64], %211 {strides = array<i32>} : memref<8x8x128xf32, #tpu.memory_space<vmem>>, vector<1x8x128xf32>,
    %c7_i32_65 = arith.constant 7 : i32
    %212 = arith.subi %c7_i32_65, %c4_i32 : i32
    %213 = arith.index_cast %212 : i32 to index
    %c0_66 = arith.constant 0 : index
    %c0_67 = arith.constant 0 : index
    %214 = vector.load %arg18[%213, %c0_66, %c0_67] : memref<8x8x128xf32, #tpu.memory_space<vmem>>, vector<1x8x128xf32>
    %215 = vector.shape_cast %214 : vector<1x8x128xf32> to vector<8x128xf32>
    %216 = vector.shape_cast %207 : vector<8x128xf32> to vector<1x8x128xf32>
    tpu.vector_store %arg18[%213, %c0_66, %c0_67], %216 {strides = array<i32>} : memref<8x8x128xf32, #tpu.memory_space<vmem>>, vector<1x8x128xf32>,
    %c5_i32 = arith.constant 5 : i32
    %217 = arith.index_cast %c5_i32 : i32 to index
    %c0_68 = arith.constant 0 : index
    %c0_69 = arith.constant 0 : index
    %218 = vector.load %arg16[%217, %c0_68, %c0_69] : memref<8x8x384xf32, #tpu.memory_space<vmem>>, vector<1x8x384xf32>
    %219 = vector.shape_cast %218 : vector<1x8x384xf32> to vector<8x384xf32>
    %cst_70 = arith.constant dense<0.000000e+00> : vector<8x384xf32>
    %220 = tpu.matmul %207, %9, %cst_70 {dimension_numbers = #tpu.dot_dimension_numbers<[1], [0], [0], [1], [0, 0, 1, 1], [], []>} : vector<8x128xf32>, vector<128x384xf32>, vector<8x384xf32> -> vector<8x384xf32>
    %221 = vector.extract_strided_slice %219 {offsets = [0, 0], sizes = [8, 128], strides = [1, 1]} : vector<8x384xf32> to vector<8x128xf32>
    %222 = vector.extract_strided_slice %220 {offsets = [0, 0], sizes = [8, 128], strides = [1, 1]} : vector<8x384xf32> to vector<8x128xf32>
    %223 = arith.addf %221, %222 : vector<8x128xf32>
    %224 = arith.negf %223 : vector<8x128xf32>
    %225 = math.exp %224 : vector<8x128xf32>
    %cst_71 = arith.constant 1.000000e+00 : f32
    %226 = vector.broadcast %cst_71 : f32 to vector<8x128xf32>
    %227 = arith.addf %226, %225 : vector<8x128xf32>
    %228 = arith.divf %226, %227 : vector<8x128xf32>
    %229 = vector.extract_strided_slice %219 {offsets = [0, 128], sizes = [8, 128], strides = [1, 1]} : vector<8x384xf32> to vector<8x128xf32>
    %230 = vector.extract_strided_slice %220 {offsets = [0, 128], sizes = [8, 128], strides = [1, 1]} : vector<8x384xf32> to vector<8x128xf32>
    %231 = arith.addf %229, %230 : vector<8x128xf32>
    %232 = arith.negf %231 : vector<8x128xf32>
    %233 = math.exp %232 : vector<8x128xf32>
    %cst_72 = arith.constant 1.000000e+00 : f32
    %234 = vector.broadcast %cst_72 : f32 to vector<8x128xf32>
    %235 = arith.addf %234, %233 : vector<8x128xf32>
    %236 = arith.divf %234, %235 : vector<8x128xf32>
    %237 = vector.extract_strided_slice %219 {offsets = [0, 256], sizes = [8, 128], strides = [1, 1]} : vector<8x384xf32> to vector<8x128xf32>
    %238 = vector.extract_strided_slice %220 {offsets = [0, 256], sizes = [8, 128], strides = [1, 1]} : vector<8x384xf32> to vector<8x128xf32>
    %239 = vector.broadcast %10 : vector<1x128xf32> to vector<8x128xf32>
    %240 = arith.addf %238, %239 : vector<8x128xf32>
    %241 = arith.mulf %228, %240 : vector<8x128xf32>
    %242 = arith.addf %237, %241 : vector<8x128xf32>
    %243 = math.tanh %242 : vector<8x128xf32>
    %cst_73 = arith.constant 1.000000e+00 : f32
    %244 = vector.broadcast %cst_73 : f32 to vector<8x128xf32>
    %245 = arith.subf %244, %236 : vector<8x128xf32>
    %246 = arith.mulf %245, %243 : vector<8x128xf32>
    %247 = arith.mulf %236, %207 : vector<8x128xf32>
    %248 = arith.addf %246, %247 : vector<8x128xf32>
    %249 = arith.index_cast %c5_i32 : i32 to index
    %c0_74 = arith.constant 0 : index
    %c0_75 = arith.constant 0 : index
    %250 = vector.load %arg17[%249, %c0_74, %c0_75] : memref<8x8x128xf32, #tpu.memory_space<vmem>>, vector<1x8x128xf32>
    %251 = vector.shape_cast %250 : vector<1x8x128xf32> to vector<8x128xf32>
    %252 = vector.shape_cast %248 : vector<8x128xf32> to vector<1x8x128xf32>
    tpu.vector_store %arg17[%249, %c0_74, %c0_75], %252 {strides = array<i32>} : memref<8x8x128xf32, #tpu.memory_space<vmem>>, vector<1x8x128xf32>,
    %c7_i32_76 = arith.constant 7 : i32
    %253 = arith.subi %c7_i32_76, %c5_i32 : i32
    %254 = arith.index_cast %253 : i32 to index
    %c0_77 = arith.constant 0 : index
    %c0_78 = arith.constant 0 : index
    %255 = vector.load %arg18[%254, %c0_77, %c0_78] : memref<8x8x128xf32, #tpu.memory_space<vmem>>, vector<1x8x128xf32>
    %256 = vector.shape_cast %255 : vector<1x8x128xf32> to vector<8x128xf32>
    %257 = vector.shape_cast %248 : vector<8x128xf32> to vector<1x8x128xf32>
    tpu.vector_store %arg18[%254, %c0_77, %c0_78], %257 {strides = array<i32>} : memref<8x8x128xf32, #tpu.memory_space<vmem>>, vector<1x8x128xf32>,
    %c6_i32 = arith.constant 6 : i32
    %258 = arith.index_cast %c6_i32 : i32 to index
    %c0_79 = arith.constant 0 : index
    %c0_80 = arith.constant 0 : index
    %259 = vector.load %arg16[%258, %c0_79, %c0_80] : memref<8x8x384xf32, #tpu.memory_space<vmem>>, vector<1x8x384xf32>
    %260 = vector.shape_cast %259 : vector<1x8x384xf32> to vector<8x384xf32>
    %cst_81 = arith.constant dense<0.000000e+00> : vector<8x384xf32>
    %261 = tpu.matmul %248, %9, %cst_81 {dimension_numbers = #tpu.dot_dimension_numbers<[1], [0], [0], [1], [0, 0, 1, 1], [], []>} : vector<8x128xf32>, vector<128x384xf32>, vector<8x384xf32> -> vector<8x384xf32>
    %262 = vector.extract_strided_slice %260 {offsets = [0, 0], sizes = [8, 128], strides = [1, 1]} : vector<8x384xf32> to vector<8x128xf32>
    %263 = vector.extract_strided_slice %261 {offsets = [0, 0], sizes = [8, 128], strides = [1, 1]} : vector<8x384xf32> to vector<8x128xf32>
    %264 = arith.addf %262, %263 : vector<8x128xf32>
    %265 = arith.negf %264 : vector<8x128xf32>
    %266 = math.exp %265 : vector<8x128xf32>
    %cst_82 = arith.constant 1.000000e+00 : f32
    %267 = vector.broadcast %cst_82 : f32 to vector<8x128xf32>
    %268 = arith.addf %267, %266 : vector<8x128xf32>
    %269 = arith.divf %267, %268 : vector<8x128xf32>
    %270 = vector.extract_strided_slice %260 {offsets = [0, 128], sizes = [8, 128], strides = [1, 1]} : vector<8x384xf32> to vector<8x128xf32>
    %271 = vector.extract_strided_slice %261 {offsets = [0, 128], sizes = [8, 128], strides = [1, 1]} : vector<8x384xf32> to vector<8x128xf32>
    %272 = arith.addf %270, %271 : vector<8x128xf32>
    %273 = arith.negf %272 : vector<8x128xf32>
    %274 = math.exp %273 : vector<8x128xf32>
    %cst_83 = arith.constant 1.000000e+00 : f32
    %275 = vector.broadcast %cst_83 : f32 to vector<8x128xf32>
    %276 = arith.addf %275, %274 : vector<8x128xf32>
    %277 = arith.divf %275, %276 : vector<8x128xf32>
    %278 = vector.extract_strided_slice %260 {offsets = [0, 256], sizes = [8, 128], strides = [1, 1]} : vector<8x384xf32> to vector<8x128xf32>
    %279 = vector.extract_strided_slice %261 {offsets = [0, 256], sizes = [8, 128], strides = [1, 1]} : vector<8x384xf32> to vector<8x128xf32>
    %280 = vector.broadcast %10 : vector<1x128xf32> to vector<8x128xf32>
    %281 = arith.addf %279, %280 : vector<8x128xf32>
    %282 = arith.mulf %269, %281 : vector<8x128xf32>
    %283 = arith.addf %278, %282 : vector<8x128xf32>
    %284 = math.tanh %283 : vector<8x128xf32>
    %cst_84 = arith.constant 1.000000e+00 : f32
    %285 = vector.broadcast %cst_84 : f32 to vector<8x128xf32>
    %286 = arith.subf %285, %277 : vector<8x128xf32>
    %287 = arith.mulf %286, %284 : vector<8x128xf32>
    %288 = arith.mulf %277, %248 : vector<8x128xf32>
    %289 = arith.addf %287, %288 : vector<8x128xf32>
    %290 = arith.index_cast %c6_i32 : i32 to index
    %c0_85 = arith.constant 0 : index
    %c0_86 = arith.constant 0 : index
    %291 = vector.load %arg17[%290, %c0_85, %c0_86] : memref<8x8x128xf32, #tpu.memory_space<vmem>>, vector<1x8x128xf32>
    %292 = vector.shape_cast %291 : vector<1x8x128xf32> to vector<8x128xf32>
    %293 = vector.shape_cast %289 : vector<8x128xf32> to vector<1x8x128xf32>
    tpu.vector_store %arg17[%290, %c0_85, %c0_86], %293 {strides = array<i32>} : memref<8x8x128xf32, #tpu.memory_space<vmem>>, vector<1x8x128xf32>,
    %c7_i32_87 = arith.constant 7 : i32
    %294 = arith.subi %c7_i32_87, %c6_i32 : i32
    %295 = arith.index_cast %294 : i32 to index
    %c0_88 = arith.constant 0 : index
    %c0_89 = arith.constant 0 : index
    %296 = vector.load %arg18[%295, %c0_88, %c0_89] : memref<8x8x128xf32, #tpu.memory_space<vmem>>, vector<1x8x128xf32>
    %297 = vector.shape_cast %296 : vector<1x8x128xf32> to vector<8x128xf32>
    %298 = vector.shape_cast %289 : vector<8x128xf32> to vector<1x8x128xf32>
    tpu.vector_store %arg18[%295, %c0_88, %c0_89], %298 {strides = array<i32>} : memref<8x8x128xf32, #tpu.memory_space<vmem>>, vector<1x8x128xf32>,
    %c7_i32_90 = arith.constant 7 : i32
    %299 = arith.index_cast %c7_i32_90 : i32 to index
    %c0_91 = arith.constant 0 : index
    %c0_92 = arith.constant 0 : index
    %300 = vector.load %arg16[%299, %c0_91, %c0_92] : memref<8x8x384xf32, #tpu.memory_space<vmem>>, vector<1x8x384xf32>
    %301 = vector.shape_cast %300 : vector<1x8x384xf32> to vector<8x384xf32>
    %cst_93 = arith.constant dense<0.000000e+00> : vector<8x384xf32>
    %302 = tpu.matmul %289, %9, %cst_93 {dimension_numbers = #tpu.dot_dimension_numbers<[1], [0], [0], [1], [0, 0, 1, 1], [], []>} : vector<8x128xf32>, vector<128x384xf32>, vector<8x384xf32> -> vector<8x384xf32>
    %303 = vector.extract_strided_slice %301 {offsets = [0, 0], sizes = [8, 128], strides = [1, 1]} : vector<8x384xf32> to vector<8x128xf32>
    %304 = vector.extract_strided_slice %302 {offsets = [0, 0], sizes = [8, 128], strides = [1, 1]} : vector<8x384xf32> to vector<8x128xf32>
    %305 = arith.addf %303, %304 : vector<8x128xf32>
    %306 = arith.negf %305 : vector<8x128xf32>
    %307 = math.exp %306 : vector<8x128xf32>
    %cst_94 = arith.constant 1.000000e+00 : f32
    %308 = vector.broadcast %cst_94 : f32 to vector<8x128xf32>
    %309 = arith.addf %308, %307 : vector<8x128xf32>
    %310 = arith.divf %308, %309 : vector<8x128xf32>
    %311 = vector.extract_strided_slice %301 {offsets = [0, 128], sizes = [8, 128], strides = [1, 1]} : vector<8x384xf32> to vector<8x128xf32>
    %312 = vector.extract_strided_slice %302 {offsets = [0, 128], sizes = [8, 128], strides = [1, 1]} : vector<8x384xf32> to vector<8x128xf32>
    %313 = arith.addf %311, %312 : vector<8x128xf32>
    %314 = arith.negf %313 : vector<8x128xf32>
    %315 = math.exp %314 : vector<8x128xf32>
    %cst_95 = arith.constant 1.000000e+00 : f32
    %316 = vector.broadcast %cst_95 : f32 to vector<8x128xf32>
    %317 = arith.addf %316, %315 : vector<8x128xf32>
    %318 = arith.divf %316, %317 : vector<8x128xf32>
    %319 = vector.extract_strided_slice %301 {offsets = [0, 256], sizes = [8, 128], strides = [1, 1]} : vector<8x384xf32> to vector<8x128xf32>
    %320 = vector.extract_strided_slice %302 {offsets = [0, 256], sizes = [8, 128], strides = [1, 1]} : vector<8x384xf32> to vector<8x128xf32>
    %321 = vector.broadcast %10 : vector<1x128xf32> to vector<8x128xf32>
    %322 = arith.addf %320, %321 : vector<8x128xf32>
    %323 = arith.mulf %310, %322 : vector<8x128xf32>
    %324 = arith.addf %319, %323 : vector<8x128xf32>
    %325 = math.tanh %324 : vector<8x128xf32>
    %cst_96 = arith.constant 1.000000e+00 : f32
    %326 = vector.broadcast %cst_96 : f32 to vector<8x128xf32>
    %327 = arith.subf %326, %318 : vector<8x128xf32>
    %328 = arith.mulf %327, %325 : vector<8x128xf32>
    %329 = arith.mulf %318, %289 : vector<8x128xf32>
    %330 = arith.addf %328, %329 : vector<8x128xf32>
    %331 = arith.index_cast %c7_i32_90 : i32 to index
    %c0_97 = arith.constant 0 : index
    %c0_98 = arith.constant 0 : index
    %332 = vector.load %arg17[%331, %c0_97, %c0_98] : memref<8x8x128xf32, #tpu.memory_space<vmem>>, vector<1x8x128xf32>
    %333 = vector.shape_cast %332 : vector<1x8x128xf32> to vector<8x128xf32>
    %334 = vector.shape_cast %330 : vector<8x128xf32> to vector<1x8x128xf32>
    tpu.vector_store %arg17[%331, %c0_97, %c0_98], %334 {strides = array<i32>} : memref<8x8x128xf32, #tpu.memory_space<vmem>>, vector<1x8x128xf32>,
    %c7_i32_99 = arith.constant 7 : i32
    %335 = arith.subi %c7_i32_99, %c7_i32_90 : i32
    %336 = arith.index_cast %335 : i32 to index
    %c0_100 = arith.constant 0 : index
    %c0_101 = arith.constant 0 : index
    %337 = vector.load %arg18[%336, %c0_100, %c0_101] : memref<8x8x128xf32, #tpu.memory_space<vmem>>, vector<1x8x128xf32>
    %338 = vector.shape_cast %337 : vector<1x8x128xf32> to vector<8x128xf32>
    %339 = vector.shape_cast %330 : vector<8x128xf32> to vector<1x8x128xf32>
    tpu.vector_store %arg18[%336, %c0_100, %c0_101], %339 {strides = array<i32>} : memref<8x8x128xf32, #tpu.memory_space<vmem>>, vector<1x8x128xf32>,
    %c8_i32 = arith.constant 8 : i32
    %c0_102 = arith.constant 0 : index
    %c0_103 = arith.constant 0 : index
    %c0_104 = arith.constant 0 : index
    %340 = vector.load %arg17[%c0_102, %c0_103, %c0_104] : memref<8x8x128xf32, #tpu.memory_space<vmem>>, vector<8x8x128xf32>
    %341 = vector.shape_cast %340 : vector<8x8x128xf32> to vector<64x128xf32>
    %c0_105 = arith.constant 0 : index
    %c0_106 = arith.constant 0 : index
    %c0_107 = arith.constant 0 : index
    %342 = vector.load %arg18[%c0_105, %c0_106, %c0_107] : memref<8x8x128xf32, #tpu.memory_space<vmem>>, vector<8x8x128xf32>
    %343 = vector.shape_cast %342 : vector<8x8x128xf32> to vector<64x128xf32>
    %c0_108 = arith.constant 0 : index
    %c0_109 = arith.constant 0 : index
    %344 = vector.load %arg6[%c0_108, %c0_109] : memref<128x384xf32, #tpu.memory_space<vmem>>, vector<128x384xf32>
    %cst_110 = arith.constant dense<0.000000e+00> : vector<64x384xf32>
    %345 = tpu.matmul %341, %344, %cst_110 {dimension_numbers = #tpu.dot_dimension_numbers<[1], [0], [0], [1], [0, 0, 1, 1], [], []>} : vector<64x128xf32>, vector<128x384xf32>, vector<64x384xf32> -> vector<64x384xf32>
    %c0_111 = arith.constant 0 : index
    %c0_112 = arith.constant 0 : index
    %346 = vector.load %arg7[%c0_111, %c0_112] : memref<128x384xf32, #tpu.memory_space<vmem>>, vector<128x384xf32>
    %cst_113 = arith.constant dense<0.000000e+00> : vector<64x384xf32>
    %347 = tpu.matmul %343, %346, %cst_113 {dimension_numbers = #tpu.dot_dimension_numbers<[1], [0], [0], [1], [0, 0, 1, 1], [], []>} : vector<64x128xf32>, vector<128x384xf32>, vector<64x384xf32> -> vector<64x384xf32>
    %348 = arith.addf %345, %347 : vector<64x384xf32>
    %c0_114 = arith.constant 0 : index
    %c0_115 = arith.constant 0 : index
    %349 = vector.load %arg9[%c0_114, %c0_115] : memref<1x384xf32, #tpu.memory_space<vmem>>, vector<1x384xf32>
    %350 = vector.broadcast %349 : vector<1x384xf32> to vector<64x384xf32>
    %351 = arith.addf %348, %350 : vector<64x384xf32>
    %352 = vector.shape_cast %351 : vector<64x384xf32> to vector<8x8x384xf32>
    %c0_116 = arith.constant 0 : index
    %c0_117 = arith.constant 0 : index
    %c0_118 = arith.constant 0 : index
    %353 = vector.load %arg16[%c0_116, %c0_117, %c0_118] : memref<8x8x384xf32, #tpu.memory_space<vmem>>, vector<8x8x384xf32>
    tpu.vector_store %arg16[%c0_116, %c0_117, %c0_118], %352 {strides = array<i32>} : memref<8x8x384xf32, #tpu.memory_space<vmem>>, vector<8x8x384xf32>,
    %c0_119 = arith.constant 0 : index
    %c0_120 = arith.constant 0 : index
    %354 = vector.load %arg8[%c0_119, %c0_120] : memref<128x384xf32, #tpu.memory_space<vmem>>, vector<128x384xf32>
    %c0_121 = arith.constant 0 : index
    %c0_122 = arith.constant 0 : index
    %355 = vector.load %arg10[%c0_121, %c0_122] : memref<1x128xf32, #tpu.memory_space<vmem>>, vector<1x128xf32>
    %cst_123 = arith.constant 0.000000e+00 : f32
    %356 = vector.broadcast %cst_123 : f32 to vector<8x128xf32>
    %c0_i32_124 = arith.constant 0 : i32
    %357 = arith.index_cast %c0_i32_124 : i32 to index
    %c0_125 = arith.constant 0 : index
    %c0_126 = arith.constant 0 : index
    %358 = vector.load %arg16[%357, %c0_125, %c0_126] : memref<8x8x384xf32, #tpu.memory_space<vmem>>, vector<1x8x384xf32>
    %359 = vector.shape_cast %358 : vector<1x8x384xf32> to vector<8x384xf32>
    %cst_127 = arith.constant dense<0.000000e+00> : vector<8x384xf32>
    %360 = tpu.matmul %356, %354, %cst_127 {dimension_numbers = #tpu.dot_dimension_numbers<[1], [0], [0], [1], [0, 0, 1, 1], [], []>} : vector<8x128xf32>, vector<128x384xf32>, vector<8x384xf32> -> vector<8x384xf32>
    %361 = vector.extract_strided_slice %359 {offsets = [0, 0], sizes = [8, 128], strides = [1, 1]} : vector<8x384xf32> to vector<8x128xf32>
    %362 = vector.extract_strided_slice %360 {offsets = [0, 0], sizes = [8, 128], strides = [1, 1]} : vector<8x384xf32> to vector<8x128xf32>
    %363 = arith.addf %361, %362 : vector<8x128xf32>
    %364 = arith.negf %363 : vector<8x128xf32>
    %365 = math.exp %364 : vector<8x128xf32>
    %cst_128 = arith.constant 1.000000e+00 : f32
    %366 = vector.broadcast %cst_128 : f32 to vector<8x128xf32>
    %367 = arith.addf %366, %365 : vector<8x128xf32>
    %368 = arith.divf %366, %367 : vector<8x128xf32>
    %369 = vector.extract_strided_slice %359 {offsets = [0, 128], sizes = [8, 128], strides = [1, 1]} : vector<8x384xf32> to vector<8x128xf32>
    %370 = vector.extract_strided_slice %360 {offsets = [0, 128], sizes = [8, 128], strides = [1, 1]} : vector<8x384xf32> to vector<8x128xf32>
    %371 = arith.addf %369, %370 : vector<8x128xf32>
    %372 = arith.negf %371 : vector<8x128xf32>
    %373 = math.exp %372 : vector<8x128xf32>
    %cst_129 = arith.constant 1.000000e+00 : f32
    %374 = vector.broadcast %cst_129 : f32 to vector<8x128xf32>
    %375 = arith.addf %374, %373 : vector<8x128xf32>
    %376 = arith.divf %374, %375 : vector<8x128xf32>
    %377 = vector.extract_strided_slice %359 {offsets = [0, 256], sizes = [8, 128], strides = [1, 1]} : vector<8x384xf32> to vector<8x128xf32>
    %378 = vector.extract_strided_slice %360 {offsets = [0, 256], sizes = [8, 128], strides = [1, 1]} : vector<8x384xf32> to vector<8x128xf32>
    %379 = vector.broadcast %355 : vector<1x128xf32> to vector<8x128xf32>
    %380 = arith.addf %378, %379 : vector<8x128xf32>
    %381 = arith.mulf %368, %380 : vector<8x128xf32>
    %382 = arith.addf %377, %381 : vector<8x128xf32>
    %383 = math.tanh %382 : vector<8x128xf32>
    %cst_130 = arith.constant 1.000000e+00 : f32
    %384 = vector.broadcast %cst_130 : f32 to vector<8x128xf32>
    %385 = arith.subf %384, %376 : vector<8x128xf32>
    %386 = arith.mulf %385, %383 : vector<8x128xf32>
    %387 = arith.mulf %376, %356 : vector<8x128xf32>
    %388 = arith.addf %386, %387 : vector<8x128xf32>
    %389 = arith.index_cast %c0_i32_124 : i32 to index
    %c0_131 = arith.constant 0 : index
    %c0_132 = arith.constant 0 : index
    %390 = vector.load %arg17[%389, %c0_131, %c0_132] : memref<8x8x128xf32, #tpu.memory_space<vmem>>, vector<1x8x128xf32>
    %391 = vector.shape_cast %390 : vector<1x8x128xf32> to vector<8x128xf32>
    %392 = vector.shape_cast %388 : vector<8x128xf32> to vector<1x8x128xf32>
    tpu.vector_store %arg17[%389, %c0_131, %c0_132], %392 {strides = array<i32>} : memref<8x8x128xf32, #tpu.memory_space<vmem>>, vector<1x8x128xf32>,
    %c7_i32_133 = arith.constant 7 : i32
    %393 = arith.subi %c7_i32_133, %c0_i32_124 : i32
    %394 = arith.index_cast %393 : i32 to index
    %c0_134 = arith.constant 0 : index
    %c0_135 = arith.constant 0 : index
    %395 = vector.load %arg18[%394, %c0_134, %c0_135] : memref<8x8x128xf32, #tpu.memory_space<vmem>>, vector<1x8x128xf32>
    %396 = vector.shape_cast %395 : vector<1x8x128xf32> to vector<8x128xf32>
    %397 = vector.shape_cast %388 : vector<8x128xf32> to vector<1x8x128xf32>
    tpu.vector_store %arg18[%394, %c0_134, %c0_135], %397 {strides = array<i32>} : memref<8x8x128xf32, #tpu.memory_space<vmem>>, vector<1x8x128xf32>,
    %c1_i32_136 = arith.constant 1 : i32
    %398 = arith.index_cast %c1_i32_136 : i32 to index
    %c0_137 = arith.constant 0 : index
    %c0_138 = arith.constant 0 : index
    %399 = vector.load %arg16[%398, %c0_137, %c0_138] : memref<8x8x384xf32, #tpu.memory_space<vmem>>, vector<1x8x384xf32>
    %400 = vector.shape_cast %399 : vector<1x8x384xf32> to vector<8x384xf32>
    %cst_139 = arith.constant dense<0.000000e+00> : vector<8x384xf32>
    %401 = tpu.matmul %388, %354, %cst_139 {dimension_numbers = #tpu.dot_dimension_numbers<[1], [0], [0], [1], [0, 0, 1, 1], [], []>} : vector<8x128xf32>, vector<128x384xf32>, vector<8x384xf32> -> vector<8x384xf32>
    %402 = vector.extract_strided_slice %400 {offsets = [0, 0], sizes = [8, 128], strides = [1, 1]} : vector<8x384xf32> to vector<8x128xf32>
    %403 = vector.extract_strided_slice %401 {offsets = [0, 0], sizes = [8, 128], strides = [1, 1]} : vector<8x384xf32> to vector<8x128xf32>
    %404 = arith.addf %402, %403 : vector<8x128xf32>
    %405 = arith.negf %404 : vector<8x128xf32>
    %406 = math.exp %405 : vector<8x128xf32>
    %cst_140 = arith.constant 1.000000e+00 : f32
    %407 = vector.broadcast %cst_140 : f32 to vector<8x128xf32>
    %408 = arith.addf %407, %406 : vector<8x128xf32>
    %409 = arith.divf %407, %408 : vector<8x128xf32>
    %410 = vector.extract_strided_slice %400 {offsets = [0, 128], sizes = [8, 128], strides = [1, 1]} : vector<8x384xf32> to vector<8x128xf32>
    %411 = vector.extract_strided_slice %401 {offsets = [0, 128], sizes = [8, 128], strides = [1, 1]} : vector<8x384xf32> to vector<8x128xf32>
    %412 = arith.addf %410, %411 : vector<8x128xf32>
    %413 = arith.negf %412 : vector<8x128xf32>
    %414 = math.exp %413 : vector<8x128xf32>
    %cst_141 = arith.constant 1.000000e+00 : f32
    %415 = vector.broadcast %cst_141 : f32 to vector<8x128xf32>
    %416 = arith.addf %415, %414 : vector<8x128xf32>
    %417 = arith.divf %415, %416 : vector<8x128xf32>
    %418 = vector.extract_strided_slice %400 {offsets = [0, 256], sizes = [8, 128], strides = [1, 1]} : vector<8x384xf32> to vector<8x128xf32>
    %419 = vector.extract_strided_slice %401 {offsets = [0, 256], sizes = [8, 128], strides = [1, 1]} : vector<8x384xf32> to vector<8x128xf32>
    %420 = vector.broadcast %355 : vector<1x128xf32> to vector<8x128xf32>
    %421 = arith.addf %419, %420 : vector<8x128xf32>
    %422 = arith.mulf %409, %421 : vector<8x128xf32>
    %423 = arith.addf %418, %422 : vector<8x128xf32>
    %424 = math.tanh %423 : vector<8x128xf32>
    %cst_142 = arith.constant 1.000000e+00 : f32
    %425 = vector.broadcast %cst_142 : f32 to vector<8x128xf32>
    %426 = arith.subf %425, %417 : vector<8x128xf32>
    %427 = arith.mulf %426, %424 : vector<8x128xf32>
    %428 = arith.mulf %417, %388 : vector<8x128xf32>
    %429 = arith.addf %427, %428 : vector<8x128xf32>
    %430 = arith.index_cast %c1_i32_136 : i32 to index
    %c0_143 = arith.constant 0 : index
    %c0_144 = arith.constant 0 : index
    %431 = vector.load %arg17[%430, %c0_143, %c0_144] : memref<8x8x128xf32, #tpu.memory_space<vmem>>, vector<1x8x128xf32>
    %432 = vector.shape_cast %431 : vector<1x8x128xf32> to vector<8x128xf32>
    %433 = vector.shape_cast %429 : vector<8x128xf32> to vector<1x8x128xf32>
    tpu.vector_store %arg17[%430, %c0_143, %c0_144], %433 {strides = array<i32>} : memref<8x8x128xf32, #tpu.memory_space<vmem>>, vector<1x8x128xf32>,
    %c7_i32_145 = arith.constant 7 : i32
    %434 = arith.subi %c7_i32_145, %c1_i32_136 : i32
    %435 = arith.index_cast %434 : i32 to index
    %c0_146 = arith.constant 0 : index
    %c0_147 = arith.constant 0 : index
    %436 = vector.load %arg18[%435, %c0_146, %c0_147] : memref<8x8x128xf32, #tpu.memory_space<vmem>>, vector<1x8x128xf32>
    %437 = vector.shape_cast %436 : vector<1x8x128xf32> to vector<8x128xf32>
    %438 = vector.shape_cast %429 : vector<8x128xf32> to vector<1x8x128xf32>
    tpu.vector_store %arg18[%435, %c0_146, %c0_147], %438 {strides = array<i32>} : memref<8x8x128xf32, #tpu.memory_space<vmem>>, vector<1x8x128xf32>,
    %c2_i32_148 = arith.constant 2 : i32
    %439 = arith.index_cast %c2_i32_148 : i32 to index
    %c0_149 = arith.constant 0 : index
    %c0_150 = arith.constant 0 : index
    %440 = vector.load %arg16[%439, %c0_149, %c0_150] : memref<8x8x384xf32, #tpu.memory_space<vmem>>, vector<1x8x384xf32>
    %441 = vector.shape_cast %440 : vector<1x8x384xf32> to vector<8x384xf32>
    %cst_151 = arith.constant dense<0.000000e+00> : vector<8x384xf32>
    %442 = tpu.matmul %429, %354, %cst_151 {dimension_numbers = #tpu.dot_dimension_numbers<[1], [0], [0], [1], [0, 0, 1, 1], [], []>} : vector<8x128xf32>, vector<128x384xf32>, vector<8x384xf32> -> vector<8x384xf32>
    %443 = vector.extract_strided_slice %441 {offsets = [0, 0], sizes = [8, 128], strides = [1, 1]} : vector<8x384xf32> to vector<8x128xf32>
    %444 = vector.extract_strided_slice %442 {offsets = [0, 0], sizes = [8, 128], strides = [1, 1]} : vector<8x384xf32> to vector<8x128xf32>
    %445 = arith.addf %443, %444 : vector<8x128xf32>
    %446 = arith.negf %445 : vector<8x128xf32>
    %447 = math.exp %446 : vector<8x128xf32>
    %cst_152 = arith.constant 1.000000e+00 : f32
    %448 = vector.broadcast %cst_152 : f32 to vector<8x128xf32>
    %449 = arith.addf %448, %447 : vector<8x128xf32>
    %450 = arith.divf %448, %449 : vector<8x128xf32>
    %451 = vector.extract_strided_slice %441 {offsets = [0, 128], sizes = [8, 128], strides = [1, 1]} : vector<8x384xf32> to vector<8x128xf32>
    %452 = vector.extract_strided_slice %442 {offsets = [0, 128], sizes = [8, 128], strides = [1, 1]} : vector<8x384xf32> to vector<8x128xf32>
    %453 = arith.addf %451, %452 : vector<8x128xf32>
    %454 = arith.negf %453 : vector<8x128xf32>
    %455 = math.exp %454 : vector<8x128xf32>
    %cst_153 = arith.constant 1.000000e+00 : f32
    %456 = vector.broadcast %cst_153 : f32 to vector<8x128xf32>
    %457 = arith.addf %456, %455 : vector<8x128xf32>
    %458 = arith.divf %456, %457 : vector<8x128xf32>
    %459 = vector.extract_strided_slice %441 {offsets = [0, 256], sizes = [8, 128], strides = [1, 1]} : vector<8x384xf32> to vector<8x128xf32>
    %460 = vector.extract_strided_slice %442 {offsets = [0, 256], sizes = [8, 128], strides = [1, 1]} : vector<8x384xf32> to vector<8x128xf32>
    %461 = vector.broadcast %355 : vector<1x128xf32> to vector<8x128xf32>
    %462 = arith.addf %460, %461 : vector<8x128xf32>
    %463 = arith.mulf %450, %462 : vector<8x128xf32>
    %464 = arith.addf %459, %463 : vector<8x128xf32>
    %465 = math.tanh %464 : vector<8x128xf32>
    %cst_154 = arith.constant 1.000000e+00 : f32
    %466 = vector.broadcast %cst_154 : f32 to vector<8x128xf32>
    %467 = arith.subf %466, %458 : vector<8x128xf32>
    %468 = arith.mulf %467, %465 : vector<8x128xf32>
    %469 = arith.mulf %458, %429 : vector<8x128xf32>
    %470 = arith.addf %468, %469 : vector<8x128xf32>
    %471 = arith.index_cast %c2_i32_148 : i32 to index
    %c0_155 = arith.constant 0 : index
    %c0_156 = arith.constant 0 : index
    %472 = vector.load %arg17[%471, %c0_155, %c0_156] : memref<8x8x128xf32, #tpu.memory_space<vmem>>, vector<1x8x128xf32>
    %473 = vector.shape_cast %472 : vector<1x8x128xf32> to vector<8x128xf32>
    %474 = vector.shape_cast %470 : vector<8x128xf32> to vector<1x8x128xf32>
    tpu.vector_store %arg17[%471, %c0_155, %c0_156], %474 {strides = array<i32>} : memref<8x8x128xf32, #tpu.memory_space<vmem>>, vector<1x8x128xf32>,
    %c7_i32_157 = arith.constant 7 : i32
    %475 = arith.subi %c7_i32_157, %c2_i32_148 : i32
    %476 = arith.index_cast %475 : i32 to index
    %c0_158 = arith.constant 0 : index
    %c0_159 = arith.constant 0 : index
    %477 = vector.load %arg18[%476, %c0_158, %c0_159] : memref<8x8x128xf32, #tpu.memory_space<vmem>>, vector<1x8x128xf32>
    %478 = vector.shape_cast %477 : vector<1x8x128xf32> to vector<8x128xf32>
    %479 = vector.shape_cast %470 : vector<8x128xf32> to vector<1x8x128xf32>
    tpu.vector_store %arg18[%476, %c0_158, %c0_159], %479 {strides = array<i32>} : memref<8x8x128xf32, #tpu.memory_space<vmem>>, vector<1x8x128xf32>,
    %c3_i32_160 = arith.constant 3 : i32
    %480 = arith.index_cast %c3_i32_160 : i32 to index
    %c0_161 = arith.constant 0 : index
    %c0_162 = arith.constant 0 : index
    %481 = vector.load %arg16[%480, %c0_161, %c0_162] : memref<8x8x384xf32, #tpu.memory_space<vmem>>, vector<1x8x384xf32>
    %482 = vector.shape_cast %481 : vector<1x8x384xf32> to vector<8x384xf32>
    %cst_163 = arith.constant dense<0.000000e+00> : vector<8x384xf32>
    %483 = tpu.matmul %470, %354, %cst_163 {dimension_numbers = #tpu.dot_dimension_numbers<[1], [0], [0], [1], [0, 0, 1, 1], [], []>} : vector<8x128xf32>, vector<128x384xf32>, vector<8x384xf32> -> vector<8x384xf32>
    %484 = vector.extract_strided_slice %482 {offsets = [0, 0], sizes = [8, 128], strides = [1, 1]} : vector<8x384xf32> to vector<8x128xf32>
    %485 = vector.extract_strided_slice %483 {offsets = [0, 0], sizes = [8, 128], strides = [1, 1]} : vector<8x384xf32> to vector<8x128xf32>
    %486 = arith.addf %484, %485 : vector<8x128xf32>
    %487 = arith.negf %486 : vector<8x128xf32>
    %488 = math.exp %487 : vector<8x128xf32>
    %cst_164 = arith.constant 1.000000e+00 : f32
    %489 = vector.broadcast %cst_164 : f32 to vector<8x128xf32>
    %490 = arith.addf %489, %488 : vector<8x128xf32>
    %491 = arith.divf %489, %490 : vector<8x128xf32>
    %492 = vector.extract_strided_slice %482 {offsets = [0, 128], sizes = [8, 128], strides = [1, 1]} : vector<8x384xf32> to vector<8x128xf32>
    %493 = vector.extract_strided_slice %483 {offsets = [0, 128], sizes = [8, 128], strides = [1, 1]} : vector<8x384xf32> to vector<8x128xf32>
    %494 = arith.addf %492, %493 : vector<8x128xf32>
    %495 = arith.negf %494 : vector<8x128xf32>
    %496 = math.exp %495 : vector<8x128xf32>
    %cst_165 = arith.constant 1.000000e+00 : f32
    %497 = vector.broadcast %cst_165 : f32 to vector<8x128xf32>
    %498 = arith.addf %497, %496 : vector<8x128xf32>
    %499 = arith.divf %497, %498 : vector<8x128xf32>
    %500 = vector.extract_strided_slice %482 {offsets = [0, 256], sizes = [8, 128], strides = [1, 1]} : vector<8x384xf32> to vector<8x128xf32>
    %501 = vector.extract_strided_slice %483 {offsets = [0, 256], sizes = [8, 128], strides = [1, 1]} : vector<8x384xf32> to vector<8x128xf32>
    %502 = vector.broadcast %355 : vector<1x128xf32> to vector<8x128xf32>
    %503 = arith.addf %501, %502 : vector<8x128xf32>
    %504 = arith.mulf %491, %503 : vector<8x128xf32>
    %505 = arith.addf %500, %504 : vector<8x128xf32>
    %506 = math.tanh %505 : vector<8x128xf32>
    %cst_166 = arith.constant 1.000000e+00 : f32
    %507 = vector.broadcast %cst_166 : f32 to vector<8x128xf32>
    %508 = arith.subf %507, %499 : vector<8x128xf32>
    %509 = arith.mulf %508, %506 : vector<8x128xf32>
    %510 = arith.mulf %499, %470 : vector<8x128xf32>
    %511 = arith.addf %509, %510 : vector<8x128xf32>
    %512 = arith.index_cast %c3_i32_160 : i32 to index
    %c0_167 = arith.constant 0 : index
    %c0_168 = arith.constant 0 : index
    %513 = vector.load %arg17[%512, %c0_167, %c0_168] : memref<8x8x128xf32, #tpu.memory_space<vmem>>, vector<1x8x128xf32>
    %514 = vector.shape_cast %513 : vector<1x8x128xf32> to vector<8x128xf32>
    %515 = vector.shape_cast %511 : vector<8x128xf32> to vector<1x8x128xf32>
    tpu.vector_store %arg17[%512, %c0_167, %c0_168], %515 {strides = array<i32>} : memref<8x8x128xf32, #tpu.memory_space<vmem>>, vector<1x8x128xf32>,
    %c7_i32_169 = arith.constant 7 : i32
    %516 = arith.subi %c7_i32_169, %c3_i32_160 : i32
    %517 = arith.index_cast %516 : i32 to index
    %c0_170 = arith.constant 0 : index
    %c0_171 = arith.constant 0 : index
    %518 = vector.load %arg18[%517, %c0_170, %c0_171] : memref<8x8x128xf32, #tpu.memory_space<vmem>>, vector<1x8x128xf32>
    %519 = vector.shape_cast %518 : vector<1x8x128xf32> to vector<8x128xf32>
    %520 = vector.shape_cast %511 : vector<8x128xf32> to vector<1x8x128xf32>
    tpu.vector_store %arg18[%517, %c0_170, %c0_171], %520 {strides = array<i32>} : memref<8x8x128xf32, #tpu.memory_space<vmem>>, vector<1x8x128xf32>,
    %c4_i32_172 = arith.constant 4 : i32
    %521 = arith.index_cast %c4_i32_172 : i32 to index
    %c0_173 = arith.constant 0 : index
    %c0_174 = arith.constant 0 : index
    %522 = vector.load %arg16[%521, %c0_173, %c0_174] : memref<8x8x384xf32, #tpu.memory_space<vmem>>, vector<1x8x384xf32>
    %523 = vector.shape_cast %522 : vector<1x8x384xf32> to vector<8x384xf32>
    %cst_175 = arith.constant dense<0.000000e+00> : vector<8x384xf32>
    %524 = tpu.matmul %511, %354, %cst_175 {dimension_numbers = #tpu.dot_dimension_numbers<[1], [0], [0], [1], [0, 0, 1, 1], [], []>} : vector<8x128xf32>, vector<128x384xf32>, vector<8x384xf32> -> vector<8x384xf32>
    %525 = vector.extract_strided_slice %523 {offsets = [0, 0], sizes = [8, 128], strides = [1, 1]} : vector<8x384xf32> to vector<8x128xf32>
    %526 = vector.extract_strided_slice %524 {offsets = [0, 0], sizes = [8, 128], strides = [1, 1]} : vector<8x384xf32> to vector<8x128xf32>
    %527 = arith.addf %525, %526 : vector<8x128xf32>
    %528 = arith.negf %527 : vector<8x128xf32>
    %529 = math.exp %528 : vector<8x128xf32>
    %cst_176 = arith.constant 1.000000e+00 : f32
    %530 = vector.broadcast %cst_176 : f32 to vector<8x128xf32>
    %531 = arith.addf %530, %529 : vector<8x128xf32>
    %532 = arith.divf %530, %531 : vector<8x128xf32>
    %533 = vector.extract_strided_slice %523 {offsets = [0, 128], sizes = [8, 128], strides = [1, 1]} : vector<8x384xf32> to vector<8x128xf32>
    %534 = vector.extract_strided_slice %524 {offsets = [0, 128], sizes = [8, 128], strides = [1, 1]} : vector<8x384xf32> to vector<8x128xf32>
    %535 = arith.addf %533, %534 : vector<8x128xf32>
    %536 = arith.negf %535 : vector<8x128xf32>
    %537 = math.exp %536 : vector<8x128xf32>
    %cst_177 = arith.constant 1.000000e+00 : f32
    %538 = vector.broadcast %cst_177 : f32 to vector<8x128xf32>
    %539 = arith.addf %538, %537 : vector<8x128xf32>
    %540 = arith.divf %538, %539 : vector<8x128xf32>
    %541 = vector.extract_strided_slice %523 {offsets = [0, 256], sizes = [8, 128], strides = [1, 1]} : vector<8x384xf32> to vector<8x128xf32>
    %542 = vector.extract_strided_slice %524 {offsets = [0, 256], sizes = [8, 128], strides = [1, 1]} : vector<8x384xf32> to vector<8x128xf32>
    %543 = vector.broadcast %355 : vector<1x128xf32> to vector<8x128xf32>
    %544 = arith.addf %542, %543 : vector<8x128xf32>
    %545 = arith.mulf %532, %544 : vector<8x128xf32>
    %546 = arith.addf %541, %545 : vector<8x128xf32>
    %547 = math.tanh %546 : vector<8x128xf32>
    %cst_178 = arith.constant 1.000000e+00 : f32
    %548 = vector.broadcast %cst_178 : f32 to vector<8x128xf32>
    %549 = arith.subf %548, %540 : vector<8x128xf32>
    %550 = arith.mulf %549, %547 : vector<8x128xf32>
    %551 = arith.mulf %540, %511 : vector<8x128xf32>
    %552 = arith.addf %550, %551 : vector<8x128xf32>
    %553 = arith.index_cast %c4_i32_172 : i32 to index
    %c0_179 = arith.constant 0 : index
    %c0_180 = arith.constant 0 : index
    %554 = vector.load %arg17[%553, %c0_179, %c0_180] : memref<8x8x128xf32, #tpu.memory_space<vmem>>, vector<1x8x128xf32>
    %555 = vector.shape_cast %554 : vector<1x8x128xf32> to vector<8x128xf32>
    %556 = vector.shape_cast %552 : vector<8x128xf32> to vector<1x8x128xf32>
    tpu.vector_store %arg17[%553, %c0_179, %c0_180], %556 {strides = array<i32>} : memref<8x8x128xf32, #tpu.memory_space<vmem>>, vector<1x8x128xf32>,
    %c7_i32_181 = arith.constant 7 : i32
    %557 = arith.subi %c7_i32_181, %c4_i32_172 : i32
    %558 = arith.index_cast %557 : i32 to index
    %c0_182 = arith.constant 0 : index
    %c0_183 = arith.constant 0 : index
    %559 = vector.load %arg18[%558, %c0_182, %c0_183] : memref<8x8x128xf32, #tpu.memory_space<vmem>>, vector<1x8x128xf32>
    %560 = vector.shape_cast %559 : vector<1x8x128xf32> to vector<8x128xf32>
    %561 = vector.shape_cast %552 : vector<8x128xf32> to vector<1x8x128xf32>
    tpu.vector_store %arg18[%558, %c0_182, %c0_183], %561 {strides = array<i32>} : memref<8x8x128xf32, #tpu.memory_space<vmem>>, vector<1x8x128xf32>,
    %c5_i32_184 = arith.constant 5 : i32
    %562 = arith.index_cast %c5_i32_184 : i32 to index
    %c0_185 = arith.constant 0 : index
    %c0_186 = arith.constant 0 : index
    %563 = vector.load %arg16[%562, %c0_185, %c0_186] : memref<8x8x384xf32, #tpu.memory_space<vmem>>, vector<1x8x384xf32>
    %564 = vector.shape_cast %563 : vector<1x8x384xf32> to vector<8x384xf32>
    %cst_187 = arith.constant dense<0.000000e+00> : vector<8x384xf32>
    %565 = tpu.matmul %552, %354, %cst_187 {dimension_numbers = #tpu.dot_dimension_numbers<[1], [0], [0], [1], [0, 0, 1, 1], [], []>} : vector<8x128xf32>, vector<128x384xf32>, vector<8x384xf32> -> vector<8x384xf32>
    %566 = vector.extract_strided_slice %564 {offsets = [0, 0], sizes = [8, 128], strides = [1, 1]} : vector<8x384xf32> to vector<8x128xf32>
    %567 = vector.extract_strided_slice %565 {offsets = [0, 0], sizes = [8, 128], strides = [1, 1]} : vector<8x384xf32> to vector<8x128xf32>
    %568 = arith.addf %566, %567 : vector<8x128xf32>
    %569 = arith.negf %568 : vector<8x128xf32>
    %570 = math.exp %569 : vector<8x128xf32>
    %cst_188 = arith.constant 1.000000e+00 : f32
    %571 = vector.broadcast %cst_188 : f32 to vector<8x128xf32>
    %572 = arith.addf %571, %570 : vector<8x128xf32>
    %573 = arith.divf %571, %572 : vector<8x128xf32>
    %574 = vector.extract_strided_slice %564 {offsets = [0, 128], sizes = [8, 128], strides = [1, 1]} : vector<8x384xf32> to vector<8x128xf32>
    %575 = vector.extract_strided_slice %565 {offsets = [0, 128], sizes = [8, 128], strides = [1, 1]} : vector<8x384xf32> to vector<8x128xf32>
    %576 = arith.addf %574, %575 : vector<8x128xf32>
    %577 = arith.negf %576 : vector<8x128xf32>
    %578 = math.exp %577 : vector<8x128xf32>
    %cst_189 = arith.constant 1.000000e+00 : f32
    %579 = vector.broadcast %cst_189 : f32 to vector<8x128xf32>
    %580 = arith.addf %579, %578 : vector<8x128xf32>
    %581 = arith.divf %579, %580 : vector<8x128xf32>
    %582 = vector.extract_strided_slice %564 {offsets = [0, 256], sizes = [8, 128], strides = [1, 1]} : vector<8x384xf32> to vector<8x128xf32>
    %583 = vector.extract_strided_slice %565 {offsets = [0, 256], sizes = [8, 128], strides = [1, 1]} : vector<8x384xf32> to vector<8x128xf32>
    %584 = vector.broadcast %355 : vector<1x128xf32> to vector<8x128xf32>
    %585 = arith.addf %583, %584 : vector<8x128xf32>
    %586 = arith.mulf %573, %585 : vector<8x128xf32>
    %587 = arith.addf %582, %586 : vector<8x128xf32>
    %588 = math.tanh %587 : vector<8x128xf32>
    %cst_190 = arith.constant 1.000000e+00 : f32
    %589 = vector.broadcast %cst_190 : f32 to vector<8x128xf32>
    %590 = arith.subf %589, %581 : vector<8x128xf32>
    %591 = arith.mulf %590, %588 : vector<8x128xf32>
    %592 = arith.mulf %581, %552 : vector<8x128xf32>
    %593 = arith.addf %591, %592 : vector<8x128xf32>
    %594 = arith.index_cast %c5_i32_184 : i32 to index
    %c0_191 = arith.constant 0 : index
    %c0_192 = arith.constant 0 : index
    %595 = vector.load %arg17[%594, %c0_191, %c0_192] : memref<8x8x128xf32, #tpu.memory_space<vmem>>, vector<1x8x128xf32>
    %596 = vector.shape_cast %595 : vector<1x8x128xf32> to vector<8x128xf32>
    %597 = vector.shape_cast %593 : vector<8x128xf32> to vector<1x8x128xf32>
    tpu.vector_store %arg17[%594, %c0_191, %c0_192], %597 {strides = array<i32>} : memref<8x8x128xf32, #tpu.memory_space<vmem>>, vector<1x8x128xf32>,
    %c7_i32_193 = arith.constant 7 : i32
    %598 = arith.subi %c7_i32_193, %c5_i32_184 : i32
    %599 = arith.index_cast %598 : i32 to index
    %c0_194 = arith.constant 0 : index
    %c0_195 = arith.constant 0 : index
    %600 = vector.load %arg18[%599, %c0_194, %c0_195] : memref<8x8x128xf32, #tpu.memory_space<vmem>>, vector<1x8x128xf32>
    %601 = vector.shape_cast %600 : vector<1x8x128xf32> to vector<8x128xf32>
    %602 = vector.shape_cast %593 : vector<8x128xf32> to vector<1x8x128xf32>
    tpu.vector_store %arg18[%599, %c0_194, %c0_195], %602 {strides = array<i32>} : memref<8x8x128xf32, #tpu.memory_space<vmem>>, vector<1x8x128xf32>,
    %c6_i32_196 = arith.constant 6 : i32
    %603 = arith.index_cast %c6_i32_196 : i32 to index
    %c0_197 = arith.constant 0 : index
    %c0_198 = arith.constant 0 : index
    %604 = vector.load %arg16[%603, %c0_197, %c0_198] : memref<8x8x384xf32, #tpu.memory_space<vmem>>, vector<1x8x384xf32>
    %605 = vector.shape_cast %604 : vector<1x8x384xf32> to vector<8x384xf32>
    %cst_199 = arith.constant dense<0.000000e+00> : vector<8x384xf32>
    %606 = tpu.matmul %593, %354, %cst_199 {dimension_numbers = #tpu.dot_dimension_numbers<[1], [0], [0], [1], [0, 0, 1, 1], [], []>} : vector<8x128xf32>, vector<128x384xf32>, vector<8x384xf32> -> vector<8x384xf32>
    %607 = vector.extract_strided_slice %605 {offsets = [0, 0], sizes = [8, 128], strides = [1, 1]} : vector<8x384xf32> to vector<8x128xf32>
    %608 = vector.extract_strided_slice %606 {offsets = [0, 0], sizes = [8, 128], strides = [1, 1]} : vector<8x384xf32> to vector<8x128xf32>
    %609 = arith.addf %607, %608 : vector<8x128xf32>
    %610 = arith.negf %609 : vector<8x128xf32>
    %611 = math.exp %610 : vector<8x128xf32>
    %cst_200 = arith.constant 1.000000e+00 : f32
    %612 = vector.broadcast %cst_200 : f32 to vector<8x128xf32>
    %613 = arith.addf %612, %611 : vector<8x128xf32>
    %614 = arith.divf %612, %613 : vector<8x128xf32>
    %615 = vector.extract_strided_slice %605 {offsets = [0, 128], sizes = [8, 128], strides = [1, 1]} : vector<8x384xf32> to vector<8x128xf32>
    %616 = vector.extract_strided_slice %606 {offsets = [0, 128], sizes = [8, 128], strides = [1, 1]} : vector<8x384xf32> to vector<8x128xf32>
    %617 = arith.addf %615, %616 : vector<8x128xf32>
    %618 = arith.negf %617 : vector<8x128xf32>
    %619 = math.exp %618 : vector<8x128xf32>
    %cst_201 = arith.constant 1.000000e+00 : f32
    %620 = vector.broadcast %cst_201 : f32 to vector<8x128xf32>
    %621 = arith.addf %620, %619 : vector<8x128xf32>
    %622 = arith.divf %620, %621 : vector<8x128xf32>
    %623 = vector.extract_strided_slice %605 {offsets = [0, 256], sizes = [8, 128], strides = [1, 1]} : vector<8x384xf32> to vector<8x128xf32>
    %624 = vector.extract_strided_slice %606 {offsets = [0, 256], sizes = [8, 128], strides = [1, 1]} : vector<8x384xf32> to vector<8x128xf32>
    %625 = vector.broadcast %355 : vector<1x128xf32> to vector<8x128xf32>
    %626 = arith.addf %624, %625 : vector<8x128xf32>
    %627 = arith.mulf %614, %626 : vector<8x128xf32>
    %628 = arith.addf %623, %627 : vector<8x128xf32>
    %629 = math.tanh %628 : vector<8x128xf32>
    %cst_202 = arith.constant 1.000000e+00 : f32
    %630 = vector.broadcast %cst_202 : f32 to vector<8x128xf32>
    %631 = arith.subf %630, %622 : vector<8x128xf32>
    %632 = arith.mulf %631, %629 : vector<8x128xf32>
    %633 = arith.mulf %622, %593 : vector<8x128xf32>
    %634 = arith.addf %632, %633 : vector<8x128xf32>
    %635 = arith.index_cast %c6_i32_196 : i32 to index
    %c0_203 = arith.constant 0 : index
    %c0_204 = arith.constant 0 : index
    %636 = vector.load %arg17[%635, %c0_203, %c0_204] : memref<8x8x128xf32, #tpu.memory_space<vmem>>, vector<1x8x128xf32>
    %637 = vector.shape_cast %636 : vector<1x8x128xf32> to vector<8x128xf32>
    %638 = vector.shape_cast %634 : vector<8x128xf32> to vector<1x8x128xf32>
    tpu.vector_store %arg17[%635, %c0_203, %c0_204], %638 {strides = array<i32>} : memref<8x8x128xf32, #tpu.memory_space<vmem>>, vector<1x8x128xf32>,
    %c7_i32_205 = arith.constant 7 : i32
    %639 = arith.subi %c7_i32_205, %c6_i32_196 : i32
    %640 = arith.index_cast %639 : i32 to index
    %c0_206 = arith.constant 0 : index
    %c0_207 = arith.constant 0 : index
    %641 = vector.load %arg18[%640, %c0_206, %c0_207] : memref<8x8x128xf32, #tpu.memory_space<vmem>>, vector<1x8x128xf32>
    %642 = vector.shape_cast %641 : vector<1x8x128xf32> to vector<8x128xf32>
    %643 = vector.shape_cast %634 : vector<8x128xf32> to vector<1x8x128xf32>
    tpu.vector_store %arg18[%640, %c0_206, %c0_207], %643 {strides = array<i32>} : memref<8x8x128xf32, #tpu.memory_space<vmem>>, vector<1x8x128xf32>,
    %c7_i32_208 = arith.constant 7 : i32
    %644 = arith.index_cast %c7_i32_208 : i32 to index
    %c0_209 = arith.constant 0 : index
    %c0_210 = arith.constant 0 : index
    %645 = vector.load %arg16[%644, %c0_209, %c0_210] : memref<8x8x384xf32, #tpu.memory_space<vmem>>, vector<1x8x384xf32>
    %646 = vector.shape_cast %645 : vector<1x8x384xf32> to vector<8x384xf32>
    %cst_211 = arith.constant dense<0.000000e+00> : vector<8x384xf32>
    %647 = tpu.matmul %634, %354, %cst_211 {dimension_numbers = #tpu.dot_dimension_numbers<[1], [0], [0], [1], [0, 0, 1, 1], [], []>} : vector<8x128xf32>, vector<128x384xf32>, vector<8x384xf32> -> vector<8x384xf32>
    %648 = vector.extract_strided_slice %646 {offsets = [0, 0], sizes = [8, 128], strides = [1, 1]} : vector<8x384xf32> to vector<8x128xf32>
    %649 = vector.extract_strided_slice %647 {offsets = [0, 0], sizes = [8, 128], strides = [1, 1]} : vector<8x384xf32> to vector<8x128xf32>
    %650 = arith.addf %648, %649 : vector<8x128xf32>
    %651 = arith.negf %650 : vector<8x128xf32>
    %652 = math.exp %651 : vector<8x128xf32>
    %cst_212 = arith.constant 1.000000e+00 : f32
    %653 = vector.broadcast %cst_212 : f32 to vector<8x128xf32>
    %654 = arith.addf %653, %652 : vector<8x128xf32>
    %655 = arith.divf %653, %654 : vector<8x128xf32>
    %656 = vector.extract_strided_slice %646 {offsets = [0, 128], sizes = [8, 128], strides = [1, 1]} : vector<8x384xf32> to vector<8x128xf32>
    %657 = vector.extract_strided_slice %647 {offsets = [0, 128], sizes = [8, 128], strides = [1, 1]} : vector<8x384xf32> to vector<8x128xf32>
    %658 = arith.addf %656, %657 : vector<8x128xf32>
    %659 = arith.negf %658 : vector<8x128xf32>
    %660 = math.exp %659 : vector<8x128xf32>
    %cst_213 = arith.constant 1.000000e+00 : f32
    %661 = vector.broadcast %cst_213 : f32 to vector<8x128xf32>
    %662 = arith.addf %661, %660 : vector<8x128xf32>
    %663 = arith.divf %661, %662 : vector<8x128xf32>
    %664 = vector.extract_strided_slice %646 {offsets = [0, 256], sizes = [8, 128], strides = [1, 1]} : vector<8x384xf32> to vector<8x128xf32>
    %665 = vector.extract_strided_slice %647 {offsets = [0, 256], sizes = [8, 128], strides = [1, 1]} : vector<8x384xf32> to vector<8x128xf32>
    %666 = vector.broadcast %355 : vector<1x128xf32> to vector<8x128xf32>
    %667 = arith.addf %665, %666 : vector<8x128xf32>
    %668 = arith.mulf %655, %667 : vector<8x128xf32>
    %669 = arith.addf %664, %668 : vector<8x128xf32>
    %670 = math.tanh %669 : vector<8x128xf32>
    %cst_214 = arith.constant 1.000000e+00 : f32
    %671 = vector.broadcast %cst_214 : f32 to vector<8x128xf32>
    %672 = arith.subf %671, %663 : vector<8x128xf32>
    %673 = arith.mulf %672, %670 : vector<8x128xf32>
    %674 = arith.mulf %663, %634 : vector<8x128xf32>
    %675 = arith.addf %673, %674 : vector<8x128xf32>
    %676 = arith.index_cast %c7_i32_208 : i32 to index
    %c0_215 = arith.constant 0 : index
    %c0_216 = arith.constant 0 : index
    %677 = vector.load %arg17[%676, %c0_215, %c0_216] : memref<8x8x128xf32, #tpu.memory_space<vmem>>, vector<1x8x128xf32>
    %678 = vector.shape_cast %677 : vector<1x8x128xf32> to vector<8x128xf32>
    %679 = vector.shape_cast %675 : vector<8x128xf32> to vector<1x8x128xf32>
    tpu.vector_store %arg17[%676, %c0_215, %c0_216], %679 {strides = array<i32>} : memref<8x8x128xf32, #tpu.memory_space<vmem>>, vector<1x8x128xf32>,
    %c7_i32_217 = arith.constant 7 : i32
    %680 = arith.subi %c7_i32_217, %c7_i32_208 : i32
    %681 = arith.index_cast %680 : i32 to index
    %c0_218 = arith.constant 0 : index
    %c0_219 = arith.constant 0 : index
    %682 = vector.load %arg18[%681, %c0_218, %c0_219] : memref<8x8x128xf32, #tpu.memory_space<vmem>>, vector<1x8x128xf32>
    %683 = vector.shape_cast %682 : vector<1x8x128xf32> to vector<8x128xf32>
    %684 = vector.shape_cast %675 : vector<8x128xf32> to vector<1x8x128xf32>
    tpu.vector_store %arg18[%681, %c0_218, %c0_219], %684 {strides = array<i32>} : memref<8x8x128xf32, #tpu.memory_space<vmem>>, vector<1x8x128xf32>,
    %c8_i32_220 = arith.constant 8 : i32
    %685 = vector.extract_strided_slice %675 {offsets = [0, 0], sizes = [8, 32], strides = [1, 1]} : vector<8x128xf32> to vector<8x32xf32>
    %686 = vector.extract_strided_slice %675 {offsets = [0, 32], sizes = [8, 32], strides = [1, 1]} : vector<8x128xf32> to vector<8x32xf32>
    %c0_221 = arith.constant 0 : index
    %c0_222 = arith.constant 0 : index
    %c0_223 = arith.constant 0 : index
    %687 = vector.load %arg17[%c0_221, %c0_222, %c0_223] : memref<8x8x128xf32, #tpu.memory_space<vmem>>, vector<8x8x128xf32>
    %c0_224 = arith.constant 0 : index
    %c0_225 = arith.constant 0 : index
    %c0_226 = arith.constant 0 : index
    %688 = vector.load %arg18[%c0_224, %c0_225, %c0_226] : memref<8x8x128xf32, #tpu.memory_space<vmem>>, vector<8x8x128xf32>
    %689 = vector.extract_strided_slice %687 {offsets = [0, 0, 0], sizes = [8, 8, 32], strides = [1, 1, 1]} : vector<8x8x128xf32> to vector<8x8x32xf32>
    %690 = vector.extract_strided_slice %688 {offsets = [0, 0, 32], sizes = [8, 8, 32], strides = [1, 1, 1]} : vector<8x8x128xf32> to vector<8x8x32xf32>
    %691 = vector.shape_cast %686 : vector<8x32xf32> to vector<1x8x32xf32>
    %692 = vector.broadcast %691 : vector<1x8x32xf32> to vector<8x8x32xf32>
    %693 = arith.mulf %689, %692 : vector<8x8x32xf32>
    %cst_227 = arith.constant dense<0.000000e+00> : vector<8x8xf32>
    %694 = vector.multi_reduction <add>, %693, %cst_227 [2] : vector<8x8x32xf32> to vector<8x8xf32>
    %695 = vector.shape_cast %685 : vector<8x32xf32> to vector<1x8x32xf32>
    %696 = vector.broadcast %695 : vector<1x8x32xf32> to vector<8x8x32xf32>
    %697 = arith.mulf %690, %696 : vector<8x8x32xf32>
    %cst_228 = arith.constant dense<0.000000e+00> : vector<8x8xf32>
    %698 = vector.multi_reduction <add>, %697, %cst_228 [2] : vector<8x8x32xf32> to vector<8x8xf32>
    %699 = arith.addf %694, %698 : vector<8x8xf32>
    %700 = tpu.transpose %699, [1, 0] : vector<8x8xf32> -> vector<8x8xf32>
    %cst_229 = arith.constant dense<0xFF800000> : vector<8xf32>
    %701 = vector.multi_reduction <maximumf>, %700, %cst_229 [1] : vector<8x8xf32> to vector<8xf32>
    %702 = vector.shape_cast %701 : vector<8xf32> to vector<8x1xf32>
    %703 = vector.broadcast %702 : vector<8x1xf32> to vector<8x8xf32>
    %704 = arith.subf %700, %703 : vector<8x8xf32>
    %705 = math.exp %704 : vector<8x8xf32>
    %cst_230 = arith.constant dense<0.000000e+00> : vector<8xf32>
    %706 = vector.multi_reduction <add>, %705, %cst_230 [1] : vector<8x8xf32> to vector<8xf32>
    %707 = vector.shape_cast %706 : vector<8xf32> to vector<8x1xf32>
    %708 = vector.broadcast %707 : vector<8x1xf32> to vector<8x8xf32>
    %709 = arith.divf %705, %708 : vector<8x8xf32>
    %c0_231 = arith.constant 0 : index
    %c0_232 = arith.constant 0 : index
    %710 = vector.load %arg14[%c0_231, %c0_232] : memref<8x8xf32, #tpu.memory_space<vmem>>, vector<8x8xf32>
    tpu.vector_store %arg14[%c0_231, %c0_232], %709 {strides = array<i32>} : memref<8x8xf32, #tpu.memory_space<vmem>>, vector<8x8xf32>,
    %711 = tpu.transpose %709, [1, 0] : vector<8x8xf32> -> vector<8x8xf32>
    %712 = vector.shape_cast %711 : vector<8x8xf32> to vector<8x8x1xf32>
    %713 = vector.broadcast %712 : vector<8x8x1xf32> to vector<8x8x32xf32>
    %714 = arith.mulf %713, %689 : vector<8x8x32xf32>
    %cst_233 = arith.constant dense<0.000000e+00> : vector<8x32xf32>
    %715 = vector.multi_reduction <add>, %714, %cst_233 [0] : vector<8x8x32xf32> to vector<8x32xf32>
    %716 = vector.shape_cast %711 : vector<8x8xf32> to vector<8x8x1xf32>
    %717 = vector.broadcast %716 : vector<8x8x1xf32> to vector<8x8x32xf32>
    %718 = arith.mulf %717, %690 : vector<8x8x32xf32>
    %cst_234 = arith.constant dense<0.000000e+00> : vector<8x32xf32>
    %719 = vector.multi_reduction <add>, %718, %cst_234 [0] : vector<8x8x32xf32> to vector<8x32xf32>
    %c0_235 = arith.constant 0 : index
    %c0_236 = arith.constant 0 : index
    %720 = vector.load %arg11[%c0_235, %c0_236] : memref<32x1xf32, #tpu.memory_space<vmem>>, vector<32x1xf32>
    %cst_237 = arith.constant dense<0.000000e+00> : vector<8x1xf32>
    %721 = tpu.matmul %715, %720, %cst_237 {dimension_numbers = #tpu.dot_dimension_numbers<[1], [0], [0], [1], [0, 0, 1, 1], [], []>} : vector<8x32xf32>, vector<32x1xf32>, vector<8x1xf32> -> vector<8x1xf32>
    %c0_238 = arith.constant 0 : index
    %c0_239 = arith.constant 0 : index
    %722 = vector.load %arg12[%c0_238, %c0_239] : memref<32x1xf32, #tpu.memory_space<vmem>>, vector<32x1xf32>
    %cst_240 = arith.constant dense<0.000000e+00> : vector<8x1xf32>
    %723 = tpu.matmul %719, %722, %cst_240 {dimension_numbers = #tpu.dot_dimension_numbers<[1], [0], [0], [1], [0, 0, 1, 1], [], []>} : vector<8x32xf32>, vector<32x1xf32>, vector<8x1xf32> -> vector<8x1xf32>
    %724 = arith.addf %721, %723 : vector<8x1xf32>
    %c0_241 = arith.constant 0 : index
    %c0_242 = arith.constant 0 : index
    %725 = vector.load %arg13[%c0_241, %c0_242] : memref<1x1xf32, #tpu.memory_space<vmem>>, vector<1x1xf32>
    %726 = vector.broadcast %725 : vector<1x1xf32> to vector<8x1xf32>
    %727 = arith.addf %724, %726 : vector<8x1xf32>
    %c0_243 = arith.constant 0 : index
    %c0_244 = arith.constant 0 : index
    %728 = vector.load %arg15[%c0_243, %c0_244] : memref<8x1xf32, #tpu.memory_space<vmem>>, vector<8x1xf32>
    tpu.vector_store %arg15[%c0_243, %c0_244], %727 {strides = array<i32>} : memref<8x1xf32, #tpu.memory_space<vmem>>, vector<8x1xf32>,
    return
  }
  func.func @transform_0(%arg0: i32) -> (i32, i32, i32) {
    %c0_i32 = arith.constant 0 : i32
    %c0_i32_0 = arith.constant 0 : i32
    %c0_i32_1 = arith.constant 0 : i32
    return %c0_i32, %arg0, %c0_i32_0 : i32, i32, i32
  }
  func.func @transform_1(%arg0: i32) -> (i32, i32) {
    %c0_i32 = arith.constant 0 : i32
    %c0_i32_0 = arith.constant 0 : i32
    %c0_i32_1 = arith.constant 0 : i32
    return %c0_i32, %c0_i32_0 : i32, i32
  }
  func.func @transform_2(%arg0: i32) -> (i32, i32) {
    %c0_i32 = arith.constant 0 : i32
    %c0_i32_0 = arith.constant 0 : i32
    %c0_i32_1 = arith.constant 0 : i32
    return %c0_i32, %c0_i32_0 : i32, i32
  }
  func.func @transform_3(%arg0: i32) -> (i32, i32) {
    %c0_i32 = arith.constant 0 : i32
    %c0_i32_0 = arith.constant 0 : i32
    %c0_i32_1 = arith.constant 0 : i32
    return %c0_i32, %c0_i32_0 : i32, i32
  }
  func.func @transform_4(%arg0: i32) -> (i32, i32) {
    %c0_i32 = arith.constant 0 : i32
    %c0_i32_0 = arith.constant 0 : i32
    %c0_i32_1 = arith.constant 0 : i32
    return %c0_i32, %c0_i32_0 : i32, i32
  }
  func.func @transform_5(%arg0: i32) -> (i32, i32) {
    %c0_i32 = arith.constant 0 : i32
    %c0_i32_0 = arith.constant 0 : i32
    %c0_i32_1 = arith.constant 0 : i32
    return %c0_i32, %c0_i32_0 : i32, i32
  }
  func.func @transform_6(%arg0: i32) -> (i32, i32) {
    %c0_i32 = arith.constant 0 : i32
    %c0_i32_0 = arith.constant 0 : i32
    %c0_i32_1 = arith.constant 0 : i32
    return %c0_i32, %c0_i32_0 : i32, i32
  }
  func.func @transform_7(%arg0: i32) -> (i32, i32) {
    %c0_i32 = arith.constant 0 : i32
    %c0_i32_0 = arith.constant 0 : i32
    %c0_i32_1 = arith.constant 0 : i32
    return %c0_i32, %c0_i32_0 : i32, i32
  }
  func.func @transform_8(%arg0: i32) -> (i32, i32) {
    %c0_i32 = arith.constant 0 : i32
    %c0_i32_0 = arith.constant 0 : i32
    %c0_i32_1 = arith.constant 0 : i32
    return %c0_i32, %c0_i32_0 : i32, i32
  }
  func.func @transform_9(%arg0: i32) -> (i32, i32) {
    %c0_i32 = arith.constant 0 : i32
    %c0_i32_0 = arith.constant 0 : i32
    %c0_i32_1 = arith.constant 0 : i32
    return %c0_i32, %c0_i32_0 : i32, i32
  }
  func.func @transform_10(%arg0: i32) -> (i32, i32) {
    %c0_i32 = arith.constant 0 : i32
    %c0_i32_0 = arith.constant 0 : i32
    %c0_i32_1 = arith.constant 0 : i32
    return %c0_i32, %c0_i32_0 : i32, i32
  }
  func.func @transform_11(%arg0: i32) -> (i32, i32) {
    %c0_i32 = arith.constant 0 : i32
    %c0_i32_0 = arith.constant 0 : i32
    %c0_i32_1 = arith.constant 0 : i32
    return %c0_i32, %c0_i32_0 : i32, i32
  }
  func.func @transform_12(%arg0: i32) -> (i32, i32) {
    %c0_i32 = arith.constant 0 : i32
    %c0_i32_0 = arith.constant 0 : i32
    %c0_i32_1 = arith.constant 0 : i32
    return %c0_i32, %c0_i32_0 : i32, i32
  }
  func.func @transform_13(%arg0: i32) -> (i32, i32) {
    %c0_i32 = arith.constant 0 : i32
    %c0_i32_0 = arith.constant 0 : i32
    return %arg0, %c0_i32 : i32, i32
  }
  func.func @transform_14(%arg0: i32) -> (i32, i32) {
    %c0_i32 = arith.constant 0 : i32
    %c0_i32_0 = arith.constant 0 : i32
    return %arg0, %c0_i32 : i32, i32
  }
}

</mosaic_0001>

<bundles_post_ra>
// kernel: tpu_custom_call.1
= control target key start
LH: loop header
LB: loop body
LE: loop exit
PB: predicated region body
PF: predicated region fallthrough
CT: control target
= control target key end

     0   :  { %s8241_s0 = inlined_call_operand.vmem [shape: f32[8,8,12], index: 0, kind: input, shape index: {}]   ;;  %s8242_s1 = inlined_call_operand.hbm [shape: f32[12,384], index: 1, kind: input, shape index: {}]   ;;  %s8243_s2 = inlined_call_operand.hbm [shape: f32[128,384], index: 2, kind: input, shape index: {}]   ;;  %s8244_s3 = inlined_call_operand.vmem [shape: f32[1,384], index: 3, kind: input, shape index: {}]   ;;  %s8245_s4 = inlined_call_operand.vmem [shape: f32[1,128], index: 4, kind: input, shape index: {}]   ;;  %s8246_s5 = inlined_call_operand.hbm [shape: f32[128,384], index: 5, kind: input, shape index: {}]   ;;  %s8247_s6 = inlined_call_operand.hbm [shape: f32[128,384], index: 6, kind: input, shape index: {}]   ;;  %s8248_s7 = inlined_call_operand.hbm [shape: f32[128,384], index: 7, kind: input, shape index: {}]   ;;  %s8249_s8 = inlined_call_operand.vmem [shape: f32[1,384], index: 8, kind: input, shape index: {}]   ;;  %s8250_s9 = inlined_call_operand.vmem [shape: f32[1,128], index: 9, kind: input, shape index: {}]   ;;  %s8251_s10 = inlined_call_operand.vmem [shape: f32[32,1], index: 10, kind: input, shape index: {}]   ;;  %s8252_s11 = inlined_call_operand.vmem [shape: f32[32,1], index: 11, kind: input, shape index: {}]   ;;  %s8253_s12 = inlined_call_operand.<no memory space> [shape: f32[1,1], index: 12, kind: input, shape index: {}]   ;;  %s8254_s13 = inlined_call_operand.hbm [shape: f32[8,8], index: 13, kind: output, shape index: {0}]   ;;  %s8255_s14 = inlined_call_operand.vmem [shape: f32[8,1], index: 14, kind: output, shape index: {1}]  }
   0x1   :  { %v20_v0 = vstv %s8253_s12 }
   0x2   :  { %21 = vst [vmem:[#allocation5] sm:$0x1] %v20_v0 }
   0x3   :  { %22 = vsyncpa [#allocation7], 0 }
   0x4   :  { %23 = vsyncpa [#allocation10], 0 }
   0x5   :  { %24 = vsyncpa [#allocation13], 0 }
   0x6   :  { %25 = vsyncpa [#allocation8], 0  ;;  %s6946_s15 = smov [#allocation9]   ;;  %s6947_s17 = smov [#allocation12]  }
   0x7   :  { %s45_s16 = sshll.u32 %s6946_s15, 4  ;;  %s73_s18 = sshll.u32 %s6947_s17, 4  ;;  %s46_s16 = int_to_ptr.vmem [resolvable:$true] %s45_s16  ;;  %s7038_s18 = int_to_ptr.vmem [resolvable:$true] %s73_s18 }
   0x8   :  { %s6806_s21 = scalar_lea.hbm %s8243_s2, 6144 }
   0x9   :  { %p6807_p0 = scmp.ne.s32.totalorder %s8243_s2, %s6806_s21  ;;  %p6810_p1 = scmp.lt.u32.totalorder %s6806_s21, %s8243_s2 }
   0xb   :  { %p6812_p2 = pnand %p6810_p1, %p6807_p0 }
   0xd   :  { %6815 = shalt.err (!%p6812_p2)
}
   0xe   :  { %s6816_s25 = scalar_lea.vmem %s46_s16, 6144  ;;  %p6821_p4 = scmp.lt.s32.totalorder %s46_s16, %s46_s16 }
   0xf   :  { %p6817_p3 = scmp.ne.s32.totalorder %s46_s16, %s6816_s25  ;;  %p6822_p5 = scmp.lt.s32.totalorder %s6816_s25, %s6816_s25 }
  0x11   :  { %p6823_p6 = por %p6822_p5, %p6821_p4 }
  0x13   :  { %p6824_p7 = pnand %p6823_p6, %p6817_p3 }
  0x15   :  { %6827 = shalt.err (!%p6824_p7)
}
  0x16   :  { %s6948_s26 = smov 384   ;;  %s6949_s27 = smov 24  }
  0x17   :  { %51 = dma.hbm_to_vmem [thread:$0]  %s8243_s2, 6144, %s46_s16, [#allocation10], %s6948_s26, %s6948_s26, %s6949_s27  }
  0x18   :  { %s6828_s17 = scalar_lea.hbm %s8247_s6, 6144 }
  0x19   :  { %p6829_p8 = scmp.ne.s32.totalorder %s8247_s6, %s6828_s17  ;;  %p6832_p9 = scmp.lt.u32.totalorder %s6828_s17, %s8247_s6 }
  0x1b   :  { %p6834_p10 = pnand %p6832_p9, %p6829_p8 }
  0x1d   :  { %6837 = shalt.err (!%p6834_p10)
}
  0x1e   :  { %s6838_s23 = scalar_lea.vmem %s7038_s18, 6144  ;;  %p6843_p12 = scmp.lt.s32.totalorder %s7038_s18, %s7038_s18 }
  0x1f   :  { %p6839_p11 = scmp.ne.s32.totalorder %s7038_s18, %s6838_s23  ;;  %p6844_p13 = scmp.lt.s32.totalorder %s6838_s23, %s6838_s23 }
  0x21   :  { %p6845_p0 = por %p6844_p13, %p6843_p12 }
  0x23   :  { %p6846_p1 = pnand %p6845_p0, %p6839_p11 }
  0x25   :  { %6849 = shalt.err (!%p6846_p1)
}
  0x26   :  { %79 = dma.hbm_to_vmem [thread:$0]  %s8247_s6, 6144, %s7038_s18, [#allocation13], %s6948_s26, %s6948_s26, %s6949_s27  }
  0x27   :  { %s6950_s12 = smov [#allocation6]   ;;  %s6951_s25 = smov [#allocation11]  }
  0x28   :  { %s33_s24 = sshll.u32 %s6950_s12, 4  ;;  %s61_s28 = sshll.u32 %s6951_s25, 4  ;;  %s34_s24 = int_to_ptr.vmem [resolvable:$true] %s33_s24  ;;  %s7075_s28 = int_to_ptr.vmem [resolvable:$true] %s61_s28 }
  0x29   :  { %s6850_s15 = scalar_lea.hbm %s8242_s1, 768 }
  0x2a   :  { %p6851_p2 = scmp.ne.s32.totalorder %s8242_s1, %s6850_s15  ;;  %p6854_p3 = scmp.lt.u32.totalorder %s6850_s15, %s8242_s1 }
  0x2c   :  { %p6856_p4 = pnand %p6854_p3, %p6851_p2 }
  0x2e   :  { %6859 = shalt.err (!%p6856_p4)
}
  0x2f   :  { %s6860_s6 = scalar_lea.vmem %s34_s24, 768  ;;  %p6865_p6 = scmp.lt.s32.totalorder %s34_s24, %s34_s24 }
  0x30   :  { %p6861_p5 = scmp.ne.s32.totalorder %s34_s24, %s6860_s6  ;;  %p6866_p7 = scmp.lt.s32.totalorder %s6860_s6, %s6860_s6 }
  0x32   :  { %p6867_p8 = por %p6866_p7, %p6865_p6 }
  0x34   :  { %p6868_p9 = pnand %p6867_p8, %p6861_p5 }
  0x36   :  { %6871 = shalt.err (!%p6868_p9)
}
  0x37   :  { %39 = dma.hbm_to_vmem [thread:$0]  %s8242_s1, 768, %s34_s24, [#allocation7], %s6948_s26, %s6948_s26, %s6949_s27  }
  0x38   :  { %s6872_s16 = scalar_lea.hbm %s8246_s5, 6144 }
  0x39   :  { %p6873_p10 = scmp.ne.s32.totalorder %s8246_s5, %s6872_s16  ;;  %p6876_p11 = scmp.lt.u32.totalorder %s6872_s16, %s8246_s5 }
  0x3b   :  { %p6878_p12 = pnand %p6876_p11, %p6873_p10 }
  0x3d   :  { %6881 = shalt.err (!%p6878_p12)
}
  0x3e   :  { %s6882_s15 = scalar_lea.vmem %s7075_s28, 6144  ;;  %p6887_p0 = scmp.lt.s32.totalorder %s7075_s28, %s7075_s28 }
  0x3f   :  { %p6883_p13 = scmp.ne.s32.totalorder %s7075_s28, %s6882_s15  ;;  %p6888_p1 = scmp.lt.s32.totalorder %s6882_s15, %s6882_s15 }
  0x41   :  { %p6889_p2 = por %p6888_p1, %p6887_p0 }
  0x43   :  { %p6890_p3 = pnand %p6889_p2, %p6883_p13 }
  0x45   :  { %6893 = shalt.err (!%p6890_p3)
}
  0x46   :  { %67 = dma.hbm_to_vmem [thread:$0]  %s8246_s5, 6144, %s7075_s28, [#allocation10], %s6948_s26, %s6948_s26, %s6949_s27  }
  0x47   :  { %s6952_s17 = smov [#allocation14]   ;;  %s6894_s6 = scalar_lea.hbm %s8248_s7, 6144 }
  0x48   :  { %s85_s19 = sshll.u32 %s6952_s17, 4  ;;  %p6895_p4 = scmp.ne.s32.totalorder %s8248_s7, %s6894_s6  ;;  %s86_s19 = int_to_ptr.vmem [resolvable:$true] %s85_s19 }
  0x49   :  { %p6898_p5 = scmp.lt.u32.totalorder %s6894_s6, %s8248_s7 }
  0x4b   :  { %p6900_p6 = pnand %p6898_p5, %p6895_p4 }
  0x4d   :  { %6903 = shalt.err (!%p6900_p6)
}
  0x4e   :  { %s6904_s16 = scalar_lea.vmem %s86_s19, 6144  ;;  %p6909_p8 = scmp.lt.s32.totalorder %s86_s19, %s86_s19 }
  0x4f   :  { %p6905_p7 = scmp.ne.s32.totalorder %s86_s19, %s6904_s16  ;;  %p6910_p9 = scmp.lt.s32.totalorder %s6904_s16, %s6904_s16 }
  0x51   :  { %p6911_p10 = por %p6910_p9, %p6909_p8 }
  0x53   :  { %p6912_p11 = pnand %p6911_p10, %p6905_p7 }
  0x55   :  { %6915 = shalt.err (!%p6912_p11)
}
  0x56   :  { %91 = dma.hbm_to_vmem [thread:$0]  %s8248_s7, 6144, %s86_s19, [#allocation13], %s6948_s26, %s6948_s26, %s6949_s27  }
  0x57   :  { %6938 = dma.done.wait [#allocation7], 768  }
  0x58   :  { %6939 = vsyncadd [#allocation7], 4294966528 }
  0x59   :  { %6940 = dma.done.wait [#allocation10], 12288  }
  0x5a   :  { %6941 = vsyncadd [#allocation10], 4294955008 }
  0x5b   :  { %6942 = dma.done.wait [#allocation13], 12288  }
  0x5c   :  { %6943 = vsyncadd [#allocation13], 4294955008  ;;  %v6953_v1 = vmov 0.0   ;;  %vm173_vm0 = vcmask 1043456   ;;  %vm6954_vm1 = vmmov 1   ;;  %v126_v3 = vld [vmem:[#allocation6 + $0x8] sm:$0xff] }
  0x5d   :  { %247 = vmatprep.mubr.f32.mxu0 %v6953_v1  ;;  %vm7128_vm2 = vmpackc.low %vm173_vm0, %vm6954_vm1  ;;  %v129_v4 = vld [vmem:[#allocation6 + $0x20] sm:$0xf]  ;;  %v128_v7 = vld [vmem:[#allocation6 + $0x18] sm:$0xf]  ;;  %vm148_vm3 = vcmask 97280   ;;  %v6955_v50 = vmov 0.0|0.0  }
  0x5e   :  { %v125_v5 = vld [vmem:[#allocation6] sm:$0xff]  ;;  %v5491_v6 = vpack.c.bf16 %v129_v4, %v126_v3  ;;  %v426_v9 = vld [vmem:[#allocation9 + $0x8] sm:$0xff]  ;;  %v429_v11 = vld [vmem:[#allocation9 + $0x20] sm:$0xff]  ;;  %vm6956_vm4 = vmmov 0   ;;  %s6958_s7 = smov 96   ;;  %vm3885_vm5 = vcmask 261120  }
  0x5f   :  { %v117_v8 = vld [vmem:[%s8241_s0] sm:$0xff]  ;;  %v5494_v10 = vpack.c.bf16 %v128_v7, %v125_v5  ;;  %v425_v12 = vld [vmem:[#allocation9] sm:$0xff]  ;;  %v428_v13 = vld [vmem:[#allocation9 + $0x18] sm:$0xff]  ;;  %v7138_v14 = vpack.c.bf16 %v429_v11, %v426_v9  ;;  %vm4027_vm6 = vcmask 1041409   ;;  %vm4029_vm7 = vcmask 1042434  }
  0x60   :  { %4809 = vmatprep.mubr.msk.f32.mxu1 %vm148_vm3, %v117_v8  ;;  %5493 = vmatprep.subr.msk.bf16.mxu0 %vm7128_vm2, %v5491_v6  ;;  %v432_v15 = vld [vmem:[#allocation9 + $0x38] sm:$0xff]  ;;  %v435_v16 = vld [vmem:[#allocation9 + $0x50] sm:$0xff]  ;;  %v7142_v17 = vpack.c.bf16 %v428_v13, %v425_v12  ;;  %v434_v20 = vld [vmem:[#allocation9 + $0x48] sm:$0xff]  ;;  %vm4031_vm8 = vcmask 1043459   ;;  %vm4033_vm9 = vcmask 1044484   ;;  %vm4035_vm10 = vcmask 1045509  }
  0x61   :  { %5496 = vmatpush1.bf16.msk.msra.mxu0 %vm7128_vm2, %v5494_v10  ;;  %v7145_v18 = vpack.c.bf16 %v435_v16, %v432_v15  ;;  %v431_v19 = vld [vmem:[#allocation9 + $0x30] sm:$0xff]  ;;  %v438_v21 = vld [vmem:[#allocation9 + $0x68] sm:$0xff]  ;;  %v441_v22 = vld [vmem:[#allocation9 + $0x80] sm:$0xff]  ;;  %vm4037_vm11 = vcmask 1046534   ;;  %vm4039_vm12 = vcmask 1047559   ;;  %vm4074_vm13 = vcmask 64512  }
  0x62   :  { %5504 = vmatprep.subr.bf16.mxu0 %v7138_v14  ;;  %v118_v23 = vld [vmem:[%s8241_s0 + $0x8] sm:$0xff]  ;;  %v7153_v24 = vpack.c.bf16 %v434_v20, %v431_v19  ;;  %v7156_v25 = vpack.c.bf16 %v441_v22, %v438_v21  ;;  %v437_v26 = vld [vmem:[#allocation9 + $0x60] sm:$0xff]  ;;  %v446_v37 = vld [vmem:[#allocation9 + $0xa8] sm:$0xff]  ;;  %vm4206_vm14 = vcmask 523520  }
  0x63   :  { %v440_v27 = vld [vmem:[#allocation9 + $0x78] sm:$0xff]  ;;  %v447_v29 = vld [vmem:[#allocation9 + $0xb0] sm:$0xff]  ;;  %v127_v30 = vld [vmem:[#allocation6 + $0x10] sm:$0xff] }
  0x64   :  { %4411 = vmatmul.mubr.msk.f32.vlgmr.msra.gmra.mrb[0].mxu0 %vm148_vm3, %v117_v8  ;;  %v444_v28 = vld [vmem:[#allocation9 + $0x98] sm:$0xff]  ;;  %v7164_v33 = vpack.c.bf16 %v440_v27, %v437_v26  ;;  %v443_v36 = vld [vmem:[#allocation9 + $0x90] sm:$0xff]  ;;  %v450_v39 = vld [vmem:[#allocation9 + $0xc8] sm:$0xff] }
  0x65   :  { %5506 = vmatpush1.bf16.msra.mxu0 %v7142_v17  ;;  %253 = vmatprep.mubr.f32.mxu0 %v6953_v1  ;;  %v130_v31 = vld [vmem:[#allocation6 + $0x28] sm:$0xf]  ;;  %v119_v32 = vld [vmem:[%s8241_s0 + $0x10] sm:$0xff]  ;;  %v7167_v35 = vpack.c.bf16 %v447_v29, %v444_v28  ;;  %v427_v38 = vld [vmem:[#allocation9 + $0x10] sm:$0xff]  ;;  %v7181_v44 = vpack.c.bf16 %v446_v37, %v443_v36  ;;  %v133_v37 = vlaneseq }
  0x66   :  { %5508 = vmatprep.subr.bf16.mxu0 %v7145_v18  ;;  %v5497_v34 = vpack.c.bf16 %v130_v31, %v127_v30  ;;  %v453_v40 = vld [vmem:[#allocation9 + $0xe0] sm:$0xff]  ;;  %v430_v41 = vld [vmem:[#allocation9 + $0x28] sm:$0xff]  ;;  %v436_v46 = vld [vmem:[#allocation9 + $0x58] sm:$0xff] }
  0x67   :  { %v7174_v42 = vpack.c.bf16 %v430_v41, %v427_v38  ;;  %v120_v43 = vld [vmem:[%s8241_s0 + $0x18] sm:$0xff]  ;;  %v7184_v47 = vpack.c.bf16 %v453_v40, %v450_v39  ;;  %v452_v49 = vld [vmem:[#allocation9 + $0xd8] sm:$0xff]  ;;  %v459_v52 = vld [vmem:[#allocation9 + $0x110] sm:$0xff]  ;;  %v7310_v38 = vshrl.u32 %v133_v37, 7 }
  0x68   :  { %4412 = vmatmul.mubr.msk.f32.gmra.mrb[2].mxu0 %vm148_vm3, %v118_v23  ;;  %5499 = vmatprep.subr.msk.bf16.mxu1 %vm7128_vm2, %v5497_v34  ;;  %v433_v45 = vld [vmem:[#allocation9 + $0x40] sm:$0xff]  ;;  %v456_v51 = vld [vmem:[#allocation9 + $0xf8] sm:$0xff]  ;;  %v121_v54 = vld [vmem:[%s8241_s0 + $0x20] sm:$0xff] }
  0x69   :  { %5510 = vmatpush1.bf16.msra.mxu0 %v7153_v24  ;;  %259 = vmatprep.mubr.f32.mxu0 %v6953_v1  ;;  %v449_v48 = vld [vmem:[#allocation9 + $0xc0] sm:$0xff]  ;;  %v7190_v53 = vpack.c.bf16 %v436_v46, %v433_v45  ;;  %v439_v56 = vld [vmem:[#allocation9 + $0x70] sm:$0xff]  ;;  %v442_v57 = vld [vmem:[#allocation9 + $0x88] sm:$0xff]  ;;  %v7200_v58 = vpack.c.bf16 %v459_v52, %v456_v51  ;;  %v7313_v39 = vsub.s32 2, %v7310_v38 }
  0x6a   :  { %5512 = vmatprep.subr.bf16.mxu0 %v7156_v25  ;;  %5502 = vmatpush3.bf16.msk.msra.mxu1 %vm7128_vm2, %v5497_v34  ;;  %v7197_v55 = vpack.c.bf16 %v452_v49, %v449_v48  ;;  %v455_v59 = vld [vmem:[#allocation9 + $0xf0] sm:$0xff]  ;;  %v458_v60 = vld [vmem:[#allocation9 + $0x108] sm:$0xff]  ;;  %v465_v62 = vld [vmem:[#allocation9 + $0x140] sm:$0xff]  ;;  %v7206_v63 = vpack.c.bf16 %v442_v57, %v439_v56  ;;  %v7329_v57 = vsub.s32 1, %v7310_v38 }
  0x6b   :  { %5535 = vmatprep.subr.bf16.mxu1 %v6955_v50  ;;  %v462_v61 = vld [vmem:[#allocation9 + $0x128] sm:$0xff]  ;;  %v122_v0 = vld [vmem:[%s8241_s0 + $0x28] sm:$0xff]  ;;  %v7213_v2 = vpack.c.bf16 %v458_v60, %v455_v59  ;;  %v445_v3 = vld [vmem:[#allocation9 + $0xa0] sm:$0xff] }
  0x6c   :  { %4413 = vmatmul.mubr.msk.f32.gmra.mrb[4].mxu0 %vm148_vm3, %v119_v32  ;;  %v448_v4 = vld [vmem:[#allocation9 + $0xb8] sm:$0xff]  ;;  %v7216_v5 = vpack.c.bf16 %v465_v62, %v462_v61  ;;  %v461_v6 = vld [vmem:[#allocation9 + $0x120] sm:$0xff]  ;;  %v471_v9 = vld [vmem:[#allocation9 + $0x170] sm:$0xff] }
  0x6d   :  { %5514 = vmatpush1.bf16.msra.mxu0 %v7164_v33  ;;  %265 = vmatprep.mubr.f32.mxu0 %v6953_v1  ;;  %v464_v7 = vld [vmem:[#allocation9 + $0x138] sm:$0xff]  ;;  %v7222_v10 = vpack.c.bf16 %v448_v4, %v445_v3  ;;  %v451_v13 = vld [vmem:[#allocation9 + $0xd0] sm:$0xff]  ;;  %v454_v15 = vld [vmem:[#allocation9 + $0xe8] sm:$0xff] }
  0x6e   :  { %5516 = vmatprep.subr.bf16.mxu0 %v7167_v35  ;;  %4810 = vmatmul.mubr.msk.f32.vlgmr.msra.gmra.mrb[0].mxu1 %vm148_vm3, %v118_v23  ;;  %v468_v8 = vld [vmem:[#allocation9 + $0x158] sm:$0xff]  ;;  %v7229_v12 = vpack.c.bf16 %v464_v7, %v461_v6  ;;  %v467_v19 = vld [vmem:[#allocation9 + $0x150] sm:$0xff]  ;;  %v470_v20 = vld [vmem:[#allocation9 + $0x168] sm:$0xff]  ;;  %v7238_v21 = vpack.c.bf16 %v454_v15, %v451_v13 }
  0x6f   :  { %5537 = vmatpush3.bf16.msra.mxu1 %v7174_v42  ;;  %4812 = vmatprep.mubr.msk.f32.mxu1 %vm148_vm3, %v119_v32  ;;  %v123_v11 = vld [vmem:[%s8241_s0 + $0x30] sm:$0xff]  ;;  %v7232_v16 = vpack.c.bf16 %v471_v9, %v468_v8  ;;  %v124_v22 = vld [vmem:[%s8241_s0 + $0x38] sm:$0xff]  ;;  %v7245_v23 = vpack.c.bf16 %v470_v20, %v467_v19  ;;  %v463_v29 = vld [vmem:[#allocation9 + $0x130] sm:$0xff] }
  0x70   :  { %4414 = vmatmul.mubr.msk.f32.gmra.mrb[6].mxu0 %vm148_vm3, %v120_v43  ;;  %5538 = vmatprep.subr.bf16.mxu1 %v6955_v50  ;;  %v457_v26 = vld [vmem:[#allocation9 + $0x100] sm:$0xff]  ;;  %v460_v27 = vld [vmem:[#allocation9 + $0x118] sm:$0xff]  ;;  %v466_v30 = vld [vmem:[#allocation9 + $0x148] sm:$0xff] }
  0x71   :  { %5518 = vmatpush1.bf16.msra.mxu0 %v7181_v44  ;;  %271 = vmatprep.mubr.f32.mxu0 %v6953_v1  ;;  %v7252_v28 = vpack.c.bf16 %v460_v27, %v457_v26  ;;  %v7262_v31 = vpack.c.bf16 %v466_v30, %v463_v29  ;;  %v469_v32 = vld [vmem:[#allocation9 + $0x160] sm:$0xff]  ;;  %v472_v34 = vld [vmem:[#allocation9 + $0x178] sm:$0xff]  ;;  %v131_v40 = vld [vmem:[%s8244_s3] sm:$0x7] }
  0x72   :  { %5520 = vmatprep.subr.bf16.mxu0 %v7184_v47  ;;  %4813 = vmatmul.mubr.msk.f32.gmra.mrb[2].mxu1 %vm148_vm3, %v120_v43  ;;  %v7271_v36 = vpack.c.bf16 %v472_v34, %v469_v32  ;;  %v144_v41 = vrot.slane %v131_v40, %v7313_v39  ;;  %v7339_v4 = vrot.slane %v131_v40, %v7329_v57  ;;  %v7350_v30 = vld [vmem:[%s8245_s4] ss:$0 sm:$0xff] }
  0x73   :  { %5540 = vmatpush3.bf16.msra.mxu1 %v7190_v53  ;;  %4815 = vmatprep.mubr.msk.f32.mxu1 %vm148_vm3, %v121_v54 }
  0x74   :  { %4415 = vmatmul.mubr.msk.f32.gmra.mrb[8].mxu0 %vm148_vm3, %v121_v54  ;;  %5541 = vmatprep.subr.bf16.mxu1 %v6955_v50  ;;  %v7326_v54 = vsub.s32 0, %v7310_v38 }
  0x75   :  { %5522 = vmatpush1.bf16.msra.mxu0 %v7197_v55  ;;  %277 = vmatprep.mubr.f32.mxu0 %v6953_v1 }
  0x76   :  { %5524 = vmatprep.subr.bf16.mxu0 %v7200_v58  ;;  %4816 = vmatmul.mubr.msk.f32.gmra.mrb[4].mxu1 %vm148_vm3, %v122_v0  ;;  %v7334_v61 = vrot.slane %v131_v40, %v7326_v54 }
  0x77   :  { %5543 = vmatpush3.bf16.msra.mxu1 %v7206_v63  ;;  %4818 = vmatprep.mubr.msk.f32.mxu1 %vm148_vm3, %v123_v11 }
  0x78   :  { %4416 = vmatmul.mubr.msk.f32.gmra.mrb[10].mxu0 %vm148_vm3, %v122_v0  ;;  %5544 = vmatprep.subr.bf16.mxu1 %v6955_v50 }
  0x79   :  { %5526 = vmatpush1.bf16.msra.mxu0 %v7213_v2  ;;  %283 = vmatprep.mubr.f32.mxu0 %v6953_v1 }
  0x7a   :  { %5528 = vmatprep.subr.bf16.mxu0 %v7216_v5  ;;  %4819 = vmatmul.mubr.msk.f32.gmra.mrb[6].mxu1 %vm148_vm3, %v124_v22 }
  0x7b   :  { %5546 = vmatpush3.bf16.msra.mxu1 %v7222_v10  ;;  %4853 = vmatprep.mubr.msk.f32.mxu1 %vm6956_vm4, %v6953_v1 }
  0x7c   :  { %4417 = vmatmul.mubr.msk.f32.gmra.mrb[12].mxu0 %vm148_vm3, %v123_v11  ;;  %5547 = vmatprep.subr.bf16.mxu1 %v6955_v50 }
  0x7d   :  { %5530 = vmatpush1.bf16.msra.mxu0 %v7229_v12  ;;  %289 = vmatprep.mubr.f32.mxu0 %v6953_v1 }
  0x7e   :  { %5532 = vmatprep.subr.bf16.mxu0 %v7232_v16 }
  0x7f   :  { %5549 = vmatpush3.bf16.msra.mxu1 %v7238_v21 }
  0x80   :  { %4418 = vmatmul.mubr.msk.f32.gmra.mrb[14].mxu0 %vm148_vm3, %v124_v22  ;;  %5550 = vmatprep.subr.bf16.mxu1 %v6955_v50 }
  0x81   :  { %5534 = vmatpush1.bf16.msra.mxu0 %v7245_v23  ;;  %541 = vmatprep.mubr.f32.mxu0 %v6953_v1 }
  0x82   :  { %5560 = vmatprep.subr.bf16.mxu0 %v7138_v14 }
  0x83   :  { %5552 = vmatpush3.bf16.msra.mxu1 %v7252_v28 }
  0x84   :  { %542 = vmatmul.mubr.f32.vlgmr.msra.gmra.mrb[0].mxu0 %v6953_v1  ;;  %5553 = vmatprep.subr.bf16.mxu1 %v6955_v50 }
  0x85   :  { %5562 = vmatpush1.bf16.msra.mxu0 %v7142_v17  ;;  %717 = vmatprep.mubr.f32.mxu0 %v6953_v1 }
  0x86   :  { %5564 = vmatprep.subr.bf16.mxu0 %v7145_v18 }
  0x87   :  { %5555 = vmatpush3.bf16.msra.mxu1 %v7262_v31 }
  0x88   :  { %5556 = vmatprep.subr.bf16.mxu1 %v6955_v50 }
  0x89   :  { %5566 = vmatpush1.bf16.msra.mxu0 %v7153_v24 }
  0x8a   :  { %5568 = vmatprep.subr.bf16.mxu0 %v7156_v25 }
  0x8b   :  { %5558 = vmatpush3.bf16.msra.mxu1 %v7271_v36 }
  0x8c   :  { %5591 = vmatprep.subr.bf16.mxu1 %v6955_v50 }
  0x8d   :  { %5570 = vmatpush1.bf16.msra.mxu0 %v7164_v33 }
  0x8e   :  { %4854 = vmatmul.mubr.f32.vlgmr.msra.gmra.mrb[8].mxu1 %v6953_v1  ;;  %5572 = vmatprep.subr.bf16.mxu0 %v7167_v35 }
  0x8f   :  { %5593 = vmatpush3.bf16.msra.mxu1 %v7174_v42  ;;  %4888 = vmatprep.mubr.msk.f32.mxu1 %vm6956_vm4, %v6953_v1 }
  0x90   :  { %5594 = vmatprep.subr.bf16.mxu1 %v6955_v50 }
  0x91   :  { %5574 = vmatpush1.bf16.msra.mxu0 %v7181_v44 }
  0x92   :  { %5576 = vmatprep.subr.bf16.mxu0 %v7184_v47 }
  0x93   :  { %5596 = vmatpush3.bf16.msra.mxu1 %v7190_v53 }
  0x94   :  { %5597 = vmatprep.subr.bf16.mxu1 %v6955_v50 }
  0x95   :  { %5578 = vmatpush1.bf16.msra.mxu0 %v7197_v55 }
  0x96   :  { %5580 = vmatprep.subr.bf16.mxu0 %v7200_v58 }
  0x97   :  { %5599 = vmatpush3.bf16.msra.mxu1 %v7206_v63 }
  0x98   :  { %5600 = vmatprep.subr.bf16.mxu1 %v6955_v50 }
  0x99   :  { %5582 = vmatpush1.bf16.msra.mxu0 %v7213_v2 }
  0x9a   :  { %5584 = vmatprep.subr.bf16.mxu0 %v7216_v5 }
  0x9b   :  { %5602 = vmatpush3.bf16.msra.mxu1 %v7222_v10 }
  0x9c   :  { %5603 = vmatprep.subr.bf16.mxu1 %v6955_v50 }
  0x9d   :  { %5586 = vmatpush1.bf16.msra.mxu0 %v7229_v12 }
  0x9e   :  { %5588 = vmatprep.subr.bf16.mxu0 %v7232_v16 }
  0x9f   :  { %5605 = vmatpush3.bf16.msra.mxu1 %v7238_v21 }
  0xa0   :  { %5606 = vmatprep.subr.bf16.mxu1 %v6955_v50 }
  0xa1   :  { %5590 = vmatpush1.bf16.msra.mxu0 %v7245_v23 }
  0xa2   :  { %5616 = vmatprep.subr.bf16.mxu0 %v7138_v14 }
  0xa3   :  { %5608 = vmatpush3.bf16.msra.mxu1 %v7252_v28 }
  0xa4   :  { %5609 = vmatprep.subr.bf16.mxu1 %v6955_v50 }
  0xa7   :  { %5611 = vmatpush3.bf16.msra.mxu1 %v7262_v31 }
  0xa8   :  { %5612 = vmatprep.subr.bf16.mxu1 %v6955_v50 }
  0xab   :  { %5614 = vmatpush3.bf16.msra.mxu1 %v7271_v36 }
  0xac   :  { %5647 = vmatprep.subr.bf16.mxu1 %v6955_v50 }
 0x141   :  { %v4811_v43 = vpop.f32.mrb[0].mxu1 }
 0x142   :  { %v7319_v45 = vadd.f32 %v4811_v43, %v144_v41  ;;  %v362_v46 = vpop.f32.mrb[1].mxu1 }
 0x143   :  { %v363_v43 = vadd.f32 %v362_v46, %v144_v41 }
 0x145   :  { %v4814_v48 = vpop.f32.mrb[2].mxu1 }
 0x146   :  { %v7321_v49 = vadd.f32 %v4814_v48, %v144_v41  ;;  %v372_v51 = vpop.f32.mrb[3].mxu1 }
 0x147   :  { %v7323_v52 = vadd.f32 %v372_v51, %v144_v41 }
 0x149   :  { %v4817_v56 = vpop.f32.mrb[4].mxu1 }
 0x14a   :  { %v7331_v59 = vadd.f32 %v4817_v56, %v144_v41  ;;  %v382_v60 = vpop.f32.mrb[5].mxu1 }
 0x14b   :  { %v7336_v62 = vadd.f32 %v382_v60, %v144_v41 }
 0x14d   :  { %v4820_v0 = vpop.f32.mrb[6].mxu1 }
 0x14e   :  { %v7341_v6 = vadd.f32 %v4820_v0, %v144_v41  ;;  %v392_v7 = vpop.f32.mrb[7].mxu1 }
 0x14f   :  { %v7344_v11 = vadd.f32 %v392_v7, %v144_v41 }
 0x157   :  { %v543_v3 = vpop.f32.mrb[0].mxu0 }
 0x158   :  { %v6539_v8 = vadd.f32 %v543_v3, %v7334_v61  ;;  %v545_v9 = vpop.f32.mrb[1].mxu0 }
 0x159   :  { %v6540_v15 = vadd.f32 %v545_v9, %v7339_v4 }
 0x15a   :  { %v4428_v13 = vmul.f32 -1.442695, %v6539_v8 }
 0x15b   :  { %v4429_v19 = vmul.f32 -1.442695, %v6540_v15 }
 0x15c   :  { %6641 = vpow2.f32 %v4428_v13 }
 0x15d   :  { %6643 = vpow2.f32 %v4429_v19 }
 0x161   :  { %v614_v20 = vpop.f32.mrb[8].mxu1 }
 0x162   :  { %v4855_v22 = vpop.f32.mrb[9].mxu1  ;;  %v638_v34 = vadd.f32 %v7350_v30, %v614_v20 }
 0x166   :  { %v6642_v26 = vpop.eup %6641 }
 0x167   :  { %v622_v27 = vadd.f32 1.0, %v6642_v26  ;;  %v6644_v29 = vpop.eup %6643 }
 0x168   :  { %v629_v32 = vadd.f32 1.0, %v6644_v29 }
 0x169   :  { %6645 = vrcp.f32 %v622_v27 }
 0x16a   :  { %6647 = vrcp.f32 %v629_v32 }
 0x173   :  { %v6646_v40 = vpop.eup %6645 }
 0x174   :  { %v639_v48 = vmul.f32 %v6646_v40, %v638_v34  ;;  %v6648_v56 = vpop.eup %6647 }
 0x175   :  { %v642_v60 = vsub.f32 1.0, %v6648_v56  ;;  %v644_v3 = vmul.f32 0.0, %v6648_v56 }
 0x176   :  { %v640_v51 = vadd.f32 %v639_v48, %v363_v43 }
 0x178   :  { %6649 = vtanh.f32 %v640_v51 }
 0x182   :  { %v6650_v0 = vpop.eup %6649 }
 0x183   :  { %v643_v7 = vmul.f32 %v6650_v0, %v642_v60 }
 0x185   :  { %v7353_v8 = vadd.f32 %v644_v3, %v643_v7 }
 0x187   :  { %718 = vmatmul.mubr.f32.vlgmr.msra.gmra.mrb[2].mxu0 %v7353_v8  ;;  %4889 = vmatmul.mubr.f32.vlgmr.msra.gmra.mrb[10].mxu1 %v7353_v8 }
 0x188   :  { %5618 = vmatpush1.bf16.msra.mxu0 %v7142_v17  ;;  %5649 = vmatpush3.bf16.msra.mxu1 %v7174_v42 }
 0x189   :  { %5620 = vmatprep.subr.bf16.mxu0 %v7145_v18  ;;  %5650 = vmatprep.subr.bf16.mxu1 %v6955_v50 }
 0x18a   :  { %888 = vmatprep.mubr.f32.mxu0 %v6953_v1  ;;  %4923 = vmatprep.mubr.msk.f32.mxu1 %vm6956_vm4, %v6953_v1 }
 0x18c   :  { %5622 = vmatpush1.bf16.msra.mxu0 %v7153_v24  ;;  %5652 = vmatpush3.bf16.msra.mxu1 %v7190_v53 }
 0x18d   :  { %5624 = vmatprep.subr.bf16.mxu0 %v7156_v25  ;;  %5653 = vmatprep.subr.bf16.mxu1 %v6955_v50 }
 0x190   :  { %5626 = vmatpush1.bf16.msra.mxu0 %v7164_v33  ;;  %5655 = vmatpush3.bf16.msra.mxu1 %v7206_v63 }
 0x191   :  { %5628 = vmatprep.subr.bf16.mxu0 %v7167_v35  ;;  %5656 = vmatprep.subr.bf16.mxu1 %v6955_v50 }
 0x194   :  { %5630 = vmatpush1.bf16.msra.mxu0 %v7181_v44  ;;  %5658 = vmatpush3.bf16.msra.mxu1 %v7222_v10 }
 0x195   :  { %5632 = vmatprep.subr.bf16.mxu0 %v7184_v47  ;;  %5659 = vmatprep.subr.bf16.mxu1 %v6955_v50 }
 0x198   :  { %5634 = vmatpush1.bf16.msra.mxu0 %v7197_v55  ;;  %5661 = vmatpush3.bf16.msra.mxu1 %v7238_v21 }
 0x199   :  { %5636 = vmatprep.subr.bf16.mxu0 %v7200_v58  ;;  %5662 = vmatprep.subr.bf16.mxu1 %v6955_v50 }
 0x19c   :  { %5638 = vmatpush1.bf16.msra.mxu0 %v7213_v2  ;;  %5664 = vmatpush3.bf16.msra.mxu1 %v7252_v28 }
 0x19d   :  { %5640 = vmatprep.subr.bf16.mxu0 %v7216_v5  ;;  %5665 = vmatprep.subr.bf16.mxu1 %v6955_v50 }
 0x1a0   :  { %5642 = vmatpush1.bf16.msra.mxu0 %v7229_v12  ;;  %5667 = vmatpush3.bf16.msra.mxu1 %v7262_v31 }
 0x1a1   :  { %5644 = vmatprep.subr.bf16.mxu0 %v7232_v16  ;;  %5668 = vmatprep.subr.bf16.mxu1 %v6955_v50 }
 0x1a4   :  { %5646 = vmatpush1.bf16.msra.mxu0 %v7245_v23  ;;  %5670 = vmatpush3.bf16.msra.mxu1 %v7271_v36 }
 0x1a5   :  { %5672 = vmatprep.subr.bf16.mxu0 %v7138_v14  ;;  %5703 = vmatprep.subr.bf16.mxu1 %v6955_v50 }
 0x25a   :  { %v719_v41 = vpop.f32.mrb[2].mxu0  ;;  %v790_v46 = vpop.f32.mrb[10].mxu1 }
 0x25b   :  { %v6541_v9 = vadd.f32 %v719_v41, %v7334_v61  ;;  %v721_v13 = vpop.f32.mrb[3].mxu0  ;;  %v4890_v15 = vpop.f32.mrb[11].mxu1  ;;  %v808_v34 = vadd.f32 %v7350_v30, %v790_v46 }
 0x25c   :  { %v6542_v20 = vadd.f32 %v721_v13, %v7339_v4 }
 0x25d   :  { %v4431_v19 = vmul.f32 -1.442695, %v6541_v9 }
 0x25e   :  { %v4432_v22 = vmul.f32 -1.442695, %v6542_v20 }
 0x25f   :  { %6651 = vpow2.f32 %v4431_v19 }
 0x260   :  { %6653 = vpow2.f32 %v4432_v22 }
 0x269   :  { %v6652_v26 = vpop.eup %6651 }
 0x26a   :  { %v798_v27 = vadd.f32 1.0, %v6652_v26  ;;  %v6654_v29 = vpop.eup %6653 }
 0x26b   :  { %v805_v32 = vadd.f32 1.0, %v6654_v29 }
 0x26c   :  { %6655 = vrcp.f32 %v798_v27 }
 0x26d   :  { %6657 = vrcp.f32 %v805_v32 }
 0x276   :  { %v6656_v40 = vpop.eup %6655 }
 0x277   :  { %v809_v43 = vmul.f32 %v6656_v40, %v808_v34  ;;  %v6658_v51 = vpop.eup %6657 }
 0x278   :  { %v812_v56 = vsub.f32 1.0, %v6658_v51  ;;  %v814_v3 = vmul.f32 %v6658_v51, %v7353_v8 }
 0x279   :  { %v810_v48 = vadd.f32 %v809_v43, %v7319_v45 }
 0x27b   :  { %6659 = vtanh.f32 %v810_v48 }
 0x285   :  { %v6660_v60 = vpop.eup %6659 }
 0x286   :  { %v813_v0 = vmul.f32 %v6660_v60, %v812_v56 }
 0x288   :  { %v7397_v7 = vadd.f32 %v814_v3, %v813_v0 }
 0x28a   :  { %889 = vmatmul.mubr.f32.vlgmr.msra.gmra.mrb[4].mxu0 %v7397_v7  ;;  %4924 = vmatmul.mubr.f32.vlgmr.msra.gmra.mrb[12].mxu1 %v7397_v7 }
 0x28b   :  { %5674 = vmatpush1.bf16.msra.mxu0 %v7142_v17  ;;  %5705 = vmatpush3.bf16.msra.mxu1 %v7174_v42 }
 0x28c   :  { %5676 = vmatprep.subr.bf16.mxu0 %v7145_v18  ;;  %5706 = vmatprep.subr.bf16.mxu1 %v6955_v50 }
 0x28d   :  { %1059 = vmatprep.mubr.f32.mxu0 %v6953_v1  ;;  %4958 = vmatprep.mubr.msk.f32.mxu1 %vm6956_vm4, %v6953_v1 }
 0x28f   :  { %5678 = vmatpush1.bf16.msra.mxu0 %v7153_v24  ;;  %5708 = vmatpush3.bf16.msra.mxu1 %v7190_v53 }
 0x290   :  { %5680 = vmatprep.subr.bf16.mxu0 %v7156_v25  ;;  %5709 = vmatprep.subr.bf16.mxu1 %v6955_v50 }
 0x293   :  { %5682 = vmatpush1.bf16.msra.mxu0 %v7164_v33  ;;  %5711 = vmatpush3.bf16.msra.mxu1 %v7206_v63 }
 0x294   :  { %5684 = vmatprep.subr.bf16.mxu0 %v7167_v35  ;;  %5712 = vmatprep.subr.bf16.mxu1 %v6955_v50 }
 0x297   :  { %5686 = vmatpush1.bf16.msra.mxu0 %v7181_v44  ;;  %5714 = vmatpush3.bf16.msra.mxu1 %v7222_v10 }
 0x298   :  { %5688 = vmatprep.subr.bf16.mxu0 %v7184_v47  ;;  %5715 = vmatprep.subr.bf16.mxu1 %v6955_v50 }
 0x29b   :  { %5690 = vmatpush1.bf16.msra.mxu0 %v7197_v55  ;;  %5717 = vmatpush3.bf16.msra.mxu1 %v7238_v21 }
 0x29c   :  { %5692 = vmatprep.subr.bf16.mxu0 %v7200_v58  ;;  %5718 = vmatprep.subr.bf16.mxu1 %v6955_v50 }
 0x29f   :  { %5694 = vmatpush1.bf16.msra.mxu0 %v7213_v2  ;;  %5720 = vmatpush3.bf16.msra.mxu1 %v7252_v28 }
 0x2a0   :  { %5696 = vmatprep.subr.bf16.mxu0 %v7216_v5  ;;  %5721 = vmatprep.subr.bf16.mxu1 %v6955_v50 }
 0x2a3   :  { %5698 = vmatpush1.bf16.msra.mxu0 %v7229_v12  ;;  %5723 = vmatpush3.bf16.msra.mxu1 %v7262_v31 }
 0x2a4   :  { %5700 = vmatprep.subr.bf16.mxu0 %v7232_v16  ;;  %5724 = vmatprep.subr.bf16.mxu1 %v6955_v50 }
 0x2a7   :  { %5702 = vmatpush1.bf16.msra.mxu0 %v7245_v23  ;;  %5726 = vmatpush3.bf16.msra.mxu1 %v7271_v36 }
 0x2a8   :  { %5728 = vmatprep.subr.bf16.mxu0 %v7138_v14  ;;  %5759 = vmatprep.subr.bf16.mxu1 %v6955_v50 }
 0x35d   :  { %v890_v45 = vpop.f32.mrb[4].mxu0  ;;  %v961_v41 = vpop.f32.mrb[12].mxu1 }
 0x35e   :  { %v6543_v46 = vadd.f32 %v890_v45, %v7334_v61  ;;  %v892_v9 = vpop.f32.mrb[5].mxu0  ;;  %v4925_v13 = vpop.f32.mrb[13].mxu1  ;;  %v979_v32 = vadd.f32 %v7350_v30, %v961_v41 }
 0x35f   :  { %v6544_v19 = vadd.f32 %v892_v9, %v7339_v4 }
 0x360   :  { %v4433_v15 = vmul.f32 -1.442695, %v6543_v46 }
 0x361   :  { %v4434_v20 = vmul.f32 -1.442695, %v6544_v19 }
 0x362   :  { %6661 = vpow2.f32 %v4433_v15 }
 0x363   :  { %6663 = vpow2.f32 %v4434_v20 }
 0x36c   :  { %v6662_v22 = vpop.eup %6661 }
 0x36d   :  { %v969_v26 = vadd.f32 1.0, %v6662_v22  ;;  %v6664_v27 = vpop.eup %6663 }
 0x36e   :  { %v976_v29 = vadd.f32 1.0, %v6664_v27 }
 0x36f   :  { %6665 = vrcp.f32 %v969_v26 }
 0x370   :  { %6667 = vrcp.f32 %v976_v29 }
 0x379   :  { %v6666_v34 = vpop.eup %6665 }
 0x37a   :  { %v980_v40 = vmul.f32 %v6666_v34, %v979_v32  ;;  %v6668_v48 = vpop.eup %6667 }
 0x37b   :  { %v983_v51 = vsub.f32 1.0, %v6668_v48  ;;  %v985_v0 = vmul.f32 %v6668_v48, %v7397_v7 }
 0x37c   :  { %v981_v43 = vadd.f32 %v980_v40, %v7323_v52 }
 0x37e   :  { %6669 = vtanh.f32 %v981_v43 }
 0x388   :  { %v6670_v56 = vpop.eup %6669 }
 0x389   :  { %v984_v60 = vmul.f32 %v6670_v56, %v983_v51 }
 0x38b   :  { %v7441_v3 = vadd.f32 %v985_v0, %v984_v60 }
 0x38d   :  { %1060 = vmatmul.mubr.f32.vlgmr.msra.gmra.mrb[6].mxu0 %v7441_v3  ;;  %4959 = vmatmul.mubr.f32.vlgmr.msra.gmra.mrb[14].mxu1 %v7441_v3 }
 0x38e   :  { %5730 = vmatpush1.bf16.msra.mxu0 %v7142_v17  ;;  %5761 = vmatpush3.bf16.msra.mxu1 %v7174_v42 }
 0x38f   :  { %5732 = vmatprep.subr.bf16.mxu0 %v7145_v18  ;;  %5762 = vmatprep.subr.bf16.mxu1 %v6955_v50 }
 0x390   :  { %1230 = vmatprep.mubr.f32.mxu0 %v6953_v1  ;;  %4993 = vmatprep.mubr.msk.f32.mxu1 %vm6956_vm4, %v6953_v1 }
 0x392   :  { %5734 = vmatpush1.bf16.msra.mxu0 %v7153_v24  ;;  %5764 = vmatpush3.bf16.msra.mxu1 %v7190_v53 }
 0x393   :  { %5736 = vmatprep.subr.bf16.mxu0 %v7156_v25  ;;  %5765 = vmatprep.subr.bf16.mxu1 %v6955_v50 }
 0x396   :  { %5738 = vmatpush1.bf16.msra.mxu0 %v7164_v33  ;;  %5767 = vmatpush3.bf16.msra.mxu1 %v7206_v63 }
 0x397   :  { %5740 = vmatprep.subr.bf16.mxu0 %v7167_v35  ;;  %5768 = vmatprep.subr.bf16.mxu1 %v6955_v50 }
 0x39a   :  { %5742 = vmatpush1.bf16.msra.mxu0 %v7181_v44  ;;  %5770 = vmatpush3.bf16.msra.mxu1 %v7222_v10 }
 0x39b   :  { %5744 = vmatprep.subr.bf16.mxu0 %v7184_v47  ;;  %5771 = vmatprep.subr.bf16.mxu1 %v6955_v50 }
 0x39e   :  { %5746 = vmatpush1.bf16.msra.mxu0 %v7197_v55  ;;  %5773 = vmatpush3.bf16.msra.mxu1 %v7238_v21 }
 0x39f   :  { %5748 = vmatprep.subr.bf16.mxu0 %v7200_v58  ;;  %5774 = vmatprep.subr.bf16.mxu1 %v6955_v50 }
 0x3a2   :  { %5750 = vmatpush1.bf16.msra.mxu0 %v7213_v2  ;;  %5776 = vmatpush3.bf16.msra.mxu1 %v7252_v28 }
 0x3a3   :  { %5752 = vmatprep.subr.bf16.mxu0 %v7216_v5  ;;  %5777 = vmatprep.subr.bf16.mxu1 %v6955_v50 }
 0x3a6   :  { %5754 = vmatpush1.bf16.msra.mxu0 %v7229_v12  ;;  %5779 = vmatpush3.bf16.msra.mxu1 %v7262_v31 }
 0x3a7   :  { %5756 = vmatprep.subr.bf16.mxu0 %v7232_v16  ;;  %5780 = vmatprep.subr.bf16.mxu1 %v6955_v50 }
 0x3aa   :  { %5758 = vmatpush1.bf16.msra.mxu0 %v7245_v23  ;;  %5782 = vmatpush3.bf16.msra.mxu1 %v7271_v36 }
 0x3ab   :  { %5784 = vmatprep.subr.bf16.mxu0 %v7138_v14  ;;  %5815 = vmatprep.subr.bf16.mxu1 %v6955_v50 }
 0x460   :  { %v1061_v52 = vpop.f32.mrb[6].mxu0  ;;  %v1132_v45 = vpop.f32.mrb[14].mxu1 }
 0x461   :  { %v6545_v41 = vadd.f32 %v1061_v52, %v7334_v61  ;;  %v1063_v46 = vpop.f32.mrb[7].mxu0  ;;  %v4960_v9 = vpop.f32.mrb[15].mxu1  ;;  %v1150_v29 = vadd.f32 %v7350_v30, %v1132_v45 }
 0x462   :  { %v6546_v15 = vadd.f32 %v1063_v46, %v7339_v4 }
 0x463   :  { %v4435_v13 = vmul.f32 -1.442695, %v6545_v41 }
 0x464   :  { %v4436_v19 = vmul.f32 -1.442695, %v6546_v15 }
 0x465   :  { %6671 = vpow2.f32 %v4435_v13 }
 0x466   :  { %6673 = vpow2.f32 %v4436_v19 }
 0x46f   :  { %v6672_v20 = vpop.eup %6671 }
 0x470   :  { %v1140_v22 = vadd.f32 1.0, %v6672_v20  ;;  %v6674_v26 = vpop.eup %6673 }
 0x471   :  { %v1147_v27 = vadd.f32 1.0, %v6674_v26 }
 0x472   :  { %6675 = vrcp.f32 %v1140_v22 }
 0x473   :  { %6677 = vrcp.f32 %v1147_v27 }
 0x47c   :  { %v6676_v32 = vpop.eup %6675 }
 0x47d   :  { %v1151_v34 = vmul.f32 %v6676_v32, %v1150_v29  ;;  %v6678_v43 = vpop.eup %6677 }
 0x47e   :  { %v1154_v48 = vsub.f32 1.0, %v6678_v43  ;;  %v1156_v60 = vmul.f32 %v6678_v43, %v7441_v3 }
 0x47f   :  { %v1152_v40 = vadd.f32 %v1151_v34, %v7321_v49 }
 0x481   :  { %6679 = vtanh.f32 %v1152_v40 }
 0x48b   :  { %v6680_v51 = vpop.eup %6679 }
 0x48c   :  { %v1155_v56 = vmul.f32 %v6680_v51, %v1154_v48 }
 0x48e   :  { %v7485_v0 = vadd.f32 %v1156_v60, %v1155_v56 }
 0x490   :  { %1231 = vmatmul.mubr.f32.vlgmr.msra.gmra.mrb[8].mxu0 %v7485_v0  ;;  %4994 = vmatmul.mubr.f32.vlgmr.msra.gmra.mrb[16].mxu1 %v7485_v0 }
 0x491   :  { %5786 = vmatpush1.bf16.msra.mxu0 %v7142_v17  ;;  %5817 = vmatpush3.bf16.msra.mxu1 %v7174_v42 }
 0x492   :  { %5788 = vmatprep.subr.bf16.mxu0 %v7145_v18  ;;  %5818 = vmatprep.subr.bf16.mxu1 %v6955_v50 }
 0x493   :  { %1401 = vmatprep.mubr.f32.mxu0 %v6953_v1  ;;  %5028 = vmatprep.mubr.msk.f32.mxu1 %vm6956_vm4, %v6953_v1 }
 0x495   :  { %5790 = vmatpush1.bf16.msra.mxu0 %v7153_v24  ;;  %5820 = vmatpush3.bf16.msra.mxu1 %v7190_v53 }
 0x496   :  { %5792 = vmatprep.subr.bf16.mxu0 %v7156_v25  ;;  %5821 = vmatprep.subr.bf16.mxu1 %v6955_v50 }
 0x499   :  { %5794 = vmatpush1.bf16.msra.mxu0 %v7164_v33  ;;  %5823 = vmatpush3.bf16.msra.mxu1 %v7206_v63 }
 0x49a   :  { %5796 = vmatprep.subr.bf16.mxu0 %v7167_v35  ;;  %5824 = vmatprep.subr.bf16.mxu1 %v6955_v50 }
 0x49d   :  { %5798 = vmatpush1.bf16.msra.mxu0 %v7181_v44  ;;  %5826 = vmatpush3.bf16.msra.mxu1 %v7222_v10 }
 0x49e   :  { %5800 = vmatprep.subr.bf16.mxu0 %v7184_v47  ;;  %5827 = vmatprep.subr.bf16.mxu1 %v6955_v50 }
 0x4a1   :  { %5802 = vmatpush1.bf16.msra.mxu0 %v7197_v55  ;;  %5829 = vmatpush3.bf16.msra.mxu1 %v7238_v21 }
 0x4a2   :  { %5804 = vmatprep.subr.bf16.mxu0 %v7200_v58  ;;  %5830 = vmatprep.subr.bf16.mxu1 %v6955_v50 }
 0x4a5   :  { %5806 = vmatpush1.bf16.msra.mxu0 %v7213_v2  ;;  %5832 = vmatpush3.bf16.msra.mxu1 %v7252_v28 }
 0x4a6   :  { %5808 = vmatprep.subr.bf16.mxu0 %v7216_v5  ;;  %5833 = vmatprep.subr.bf16.mxu1 %v6955_v50 }
 0x4a9   :  { %5810 = vmatpush1.bf16.msra.mxu0 %v7229_v12  ;;  %5835 = vmatpush3.bf16.msra.mxu1 %v7262_v31 }
 0x4aa   :  { %5812 = vmatprep.subr.bf16.mxu0 %v7232_v16  ;;  %5836 = vmatprep.subr.bf16.mxu1 %v6955_v50 }
 0x4ad   :  { %5814 = vmatpush1.bf16.msra.mxu0 %v7245_v23  ;;  %5838 = vmatpush3.bf16.msra.mxu1 %v7271_v36 }
 0x4ae   :  { %5840 = vmatprep.subr.bf16.mxu0 %v7138_v14  ;;  %5871 = vmatprep.subr.bf16.mxu1 %v6955_v50 }
 0x563   :  { %v1232_v49 = vpop.f32.mrb[8].mxu0  ;;  %v1303_v52 = vpop.f32.mrb[16].mxu1 }
 0x564   :  { %v6547_v45 = vadd.f32 %v1232_v49, %v7334_v61  ;;  %v1234_v41 = vpop.f32.mrb[9].mxu0  ;;  %v4995_v46 = vpop.f32.mrb[17].mxu1  ;;  %v1321_v27 = vadd.f32 %v7350_v30, %v1303_v52 }
 0x565   :  { %v6548_v13 = vadd.f32 %v1234_v41, %v7339_v4 }
 0x566   :  { %v4437_v9 = vmul.f32 -1.442695, %v6547_v45 }
 0x567   :  { %v4438_v15 = vmul.f32 -1.442695, %v6548_v13 }
 0x568   :  { %6681 = vpow2.f32 %v4437_v9 }
 0x569   :  { %6683 = vpow2.f32 %v4438_v15 }
 0x572   :  { %v6682_v19 = vpop.eup %6681 }
 0x573   :  { %v1311_v20 = vadd.f32 1.0, %v6682_v19  ;;  %v6684_v22 = vpop.eup %6683 }
 0x574   :  { %v1318_v26 = vadd.f32 1.0, %v6684_v22 }
 0x575   :  { %6685 = vrcp.f32 %v1311_v20 }
 0x576   :  { %6687 = vrcp.f32 %v1318_v26 }
 0x57f   :  { %v6686_v29 = vpop.eup %6685 }
 0x580   :  { %v1322_v32 = vmul.f32 %v6686_v29, %v1321_v27  ;;  %v6688_v40 = vpop.eup %6687 }
 0x581   :  { %v1325_v43 = vsub.f32 1.0, %v6688_v40  ;;  %v1327_v56 = vmul.f32 %v6688_v40, %v7485_v0 }
 0x582   :  { %v1323_v34 = vadd.f32 %v1322_v32, %v7336_v62 }
 0x584   :  { %6689 = vtanh.f32 %v1323_v34 }
 0x58e   :  { %v6690_v48 = vpop.eup %6689 }
 0x58f   :  { %v1326_v51 = vmul.f32 %v6690_v48, %v1325_v43 }
 0x591   :  { %v7529_v60 = vadd.f32 %v1327_v56, %v1326_v51 }
 0x593   :  { %1402 = vmatmul.mubr.f32.vlgmr.msra.gmra.mrb[10].mxu0 %v7529_v60  ;;  %5029 = vmatmul.mubr.f32.vlgmr.msra.gmra.mrb[18].mxu1 %v7529_v60 }
 0x594   :  { %5842 = vmatpush1.bf16.msra.mxu0 %v7142_v17  ;;  %5873 = vmatpush3.bf16.msra.mxu1 %v7174_v42 }
 0x595   :  { %5844 = vmatprep.subr.bf16.mxu0 %v7145_v18  ;;  %5874 = vmatprep.subr.bf16.mxu1 %v6955_v50 }
 0x596   :  { %1572 = vmatprep.mubr.f32.mxu0 %v6953_v1  ;;  %5063 = vmatprep.mubr.msk.f32.mxu1 %vm6956_vm4, %v6953_v1 }
 0x598   :  { %5846 = vmatpush1.bf16.msra.mxu0 %v7153_v24  ;;  %5876 = vmatpush3.bf16.msra.mxu1 %v7190_v53 }
 0x599   :  { %5848 = vmatprep.subr.bf16.mxu0 %v7156_v25  ;;  %5877 = vmatprep.subr.bf16.mxu1 %v6955_v50 }
 0x59c   :  { %5850 = vmatpush1.bf16.msra.mxu0 %v7164_v33  ;;  %5879 = vmatpush3.bf16.msra.mxu1 %v7206_v63 }
 0x59d   :  { %5852 = vmatprep.subr.bf16.mxu0 %v7167_v35  ;;  %5880 = vmatprep.subr.bf16.mxu1 %v6955_v50 }
 0x5a0   :  { %5854 = vmatpush1.bf16.msra.mxu0 %v7181_v44  ;;  %5882 = vmatpush3.bf16.msra.mxu1 %v7222_v10 }
 0x5a1   :  { %5856 = vmatprep.subr.bf16.mxu0 %v7184_v47  ;;  %5883 = vmatprep.subr.bf16.mxu1 %v6955_v50 }
 0x5a4   :  { %5858 = vmatpush1.bf16.msra.mxu0 %v7197_v55  ;;  %5885 = vmatpush3.bf16.msra.mxu1 %v7238_v21 }
 0x5a5   :  { %5860 = vmatprep.subr.bf16.mxu0 %v7200_v58  ;;  %5886 = vmatprep.subr.bf16.mxu1 %v6955_v50 }
 0x5a8   :  { %5862 = vmatpush1.bf16.msra.mxu0 %v7213_v2  ;;  %5888 = vmatpush3.bf16.msra.mxu1 %v7252_v28 }
 0x5a9   :  { %5864 = vmatprep.subr.bf16.mxu0 %v7216_v5  ;;  %5889 = vmatprep.subr.bf16.mxu1 %v6955_v50 }
 0x5ac   :  { %5866 = vmatpush1.bf16.msra.mxu0 %v7229_v12  ;;  %5891 = vmatpush3.bf16.msra.mxu1 %v7262_v31 }
 0x5ad   :  { %5868 = vmatprep.subr.bf16.mxu0 %v7232_v16  ;;  %5892 = vmatprep.subr.bf16.mxu1 %v6955_v50 }
 0x5b0   :  { %5870 = vmatpush1.bf16.msra.mxu0 %v7245_v23  ;;  %5894 = vmatpush3.bf16.msra.mxu1 %v7271_v36 }
 0x5b1   :  { %5896 = vmatprep.subr.bf16.mxu0 %v7138_v14  ;;  %5927 = vmatprep.subr.bf16.mxu1 %v6955_v50 }
 0x666   :  { %v1403_v62 = vpop.f32.mrb[10].mxu0  ;;  %v1474_v49 = vpop.f32.mrb[18].mxu1 }
 0x667   :  { %v6549_v52 = vadd.f32 %v1403_v62, %v7334_v61  ;;  %v1405_v45 = vpop.f32.mrb[11].mxu0  ;;  %v5030_v41 = vpop.f32.mrb[19].mxu1  ;;  %v1492_v14 = vadd.f32 %v7350_v30, %v1474_v49  ;;  %v1909_v62 = vld [vmem:[#allocation12] sm:$0xff]  ;;  %v1912_v49 = vld [vmem:[#allocation12 + $0x18] sm:$0xff] }
 0x668   :  { %v6550_v9 = vadd.f32 %v1405_v45, %v7339_v4  ;;  %v5953_v45 = vpack.c.bf16 %v1912_v49, %v1909_v62  ;;  %v1916_v41 = vld [vmem:[#allocation12 + $0x38] sm:$0xff] }
 0x669   :  { %v4439_v46 = vmul.f32 -1.442695, %v6549_v52 }
 0x66a   :  { %v4440_v13 = vmul.f32 -1.442695, %v6550_v9  ;;  %v1917_v9 = vld [vmem:[#allocation12 + $0x40] sm:$0xff] }
 0x66b   :  { %6691 = vpow2.f32 %v4439_v46  ;;  %v1919_v46 = vld [vmem:[#allocation12 + $0x50] sm:$0xff] }
 0x66c   :  { %6693 = vpow2.f32 %v4440_v13  ;;  %v5955_v13 = vpack.c.bf16 %v1919_v46, %v1916_v41  ;;  %v1947_v41 = vld [vmem:[#allocation12 + $0x130] sm:$0xff] }
 0x675   :  { %v6692_v15 = vpop.eup %6691 }
 0x676   :  { %v1482_v19 = vadd.f32 1.0, %v6692_v15  ;;  %v6694_v20 = vpop.eup %6693  ;;  %v1920_v15 = vld [vmem:[#allocation12 + $0x58] sm:$0xff] }
 0x677   :  { %v1489_v22 = vadd.f32 1.0, %v6694_v20  ;;  %v1918_v20 = vld [vmem:[#allocation12 + $0x48] sm:$0xff] }
 0x678   :  { %6695 = vrcp.f32 %v1482_v19  ;;  %v1915_v19 = vld [vmem:[#allocation12 + $0x30] sm:$0xff] }
 0x679   :  { %6697 = vrcp.f32 %v1489_v22  ;;  %v5987_v22 = vpack.c.bf16 %v1920_v15, %v1917_v9  ;;  %v1950_v9 = vld [vmem:[#allocation12 + $0x148] sm:$0xff]  ;;  %v1948_v15 = vld [vmem:[#allocation12 + $0x138] sm:$0xff] }
 0x682   :  { %v6696_v26 = vpop.eup %6695 }
 0x683   :  { %v1493_v27 = vmul.f32 %v6696_v26, %v1492_v14  ;;  %v6698_v32 = vpop.eup %6697  ;;  %v5957_v14 = vpack.c.bf16 %v1918_v20, %v1915_v19  ;;  %v1922_v26 = vld [vmem:[#allocation12 + $0x68] sm:$0xff]  ;;  %v6007_v19 = vpack.c.bf16 %v1950_v9, %v1947_v41  ;;  %v1869_v41 = vld [vmem:[#allocation11 + $0x40] sm:$0xff] }
 0x684   :  { %v1496_v34 = vsub.f32 1.0, %v6698_v32  ;;  %v1498_v48 = vmul.f32 %v6698_v32, %v7529_v60 }
 0x685   :  { %v1494_v29 = vadd.f32 %v1493_v27, %v7331_v59  ;;  %v1913_v59 = vld [vmem:[#allocation12 + $0x20] sm:$0xff] }
 0x686   :  { %v1925_v27 = vld [vmem:[#allocation12 + $0x80] sm:$0xff] }
 0x687   :  { %6699 = vtanh.f32 %v1494_v29  ;;  %v1923_v29 = vld [vmem:[#allocation12 + $0x70] sm:$0xff]  ;;  %v5959_v32 = vpack.c.bf16 %v1925_v27, %v1922_v26  ;;  %v1953_v26 = vld [vmem:[#allocation12 + $0x160] sm:$0xff] }
 0x691   :  { %v6700_v40 = vpop.eup %6699 }
 0x692   :  { %v1497_v43 = vmul.f32 %v6700_v40, %v1496_v34  ;;  %v1926_v34 = vld [vmem:[#allocation12 + $0x88] sm:$0xff]  ;;  %v1921_v40 = vld [vmem:[#allocation12 + $0x60] sm:$0xff] }
 0x694   :  { %v7573_v51 = vadd.f32 %v1498_v48, %v1497_v43  ;;  %v1924_v43 = vld [vmem:[#allocation12 + $0x78] sm:$0xff]  ;;  %v5991_v48 = vpack.c.bf16 %v1926_v34, %v1923_v29  ;;  %v1954_v34 = vld [vmem:[#allocation12 + $0x168] sm:$0xff] }
 0x695   :  { %v1956_v29 = vld [vmem:[#allocation12 + $0x178] sm:$0xff] }
 0x696   :  { %1573 = vmatmul.mubr.f32.vlgmr.msra.gmra.mrb[12].mxu0 %v7573_v51  ;;  %5064 = vmatmul.mubr.f32.vlgmr.msra.gmra.mrb[20].mxu1 %v7573_v51 }
 0x697   :  { %5898 = vmatpush1.bf16.msra.mxu0 %v7142_v17  ;;  %5929 = vmatpush3.bf16.msra.mxu1 %v7174_v42 }
 0x698   :  { %5900 = vmatprep.subr.bf16.mxu0 %v7145_v18  ;;  %5930 = vmatprep.subr.bf16.mxu1 %v6955_v50 }
 0x699   :  { %1743 = vmatprep.mubr.f32.mxu0 %v6953_v1  ;;  %5098 = vmatprep.mubr.msk.f32.mxu1 %vm6956_vm4, %v6953_v1 }
 0x69b   :  { %5902 = vmatpush1.bf16.msra.mxu0 %v7153_v24  ;;  %5932 = vmatpush3.bf16.msra.mxu1 %v7190_v53 }
 0x69c   :  { %5904 = vmatprep.subr.bf16.mxu0 %v7156_v25  ;;  %5933 = vmatprep.subr.bf16.mxu1 %v6955_v50 }
 0x69f   :  { %5906 = vmatpush1.bf16.msra.mxu0 %v7164_v33  ;;  %5935 = vmatpush3.bf16.msra.mxu1 %v7206_v63 }
 0x6a0   :  { %5908 = vmatprep.subr.bf16.mxu0 %v7167_v35  ;;  %5936 = vmatprep.subr.bf16.mxu1 %v6955_v50 }
 0x6a3   :  { %5910 = vmatpush1.bf16.msra.mxu0 %v7181_v44  ;;  %5938 = vmatpush3.bf16.msra.mxu1 %v7222_v10 }
 0x6a4   :  { %5912 = vmatprep.subr.bf16.mxu0 %v7184_v47  ;;  %5939 = vmatprep.subr.bf16.mxu1 %v6955_v50 }
 0x6a7   :  { %5914 = vmatpush1.bf16.msra.mxu0 %v7197_v55  ;;  %5941 = vmatpush3.bf16.msra.mxu1 %v7238_v21 }
 0x6a8   :  { %5916 = vmatprep.subr.bf16.mxu0 %v7200_v58  ;;  %5942 = vmatprep.subr.bf16.mxu1 %v6955_v50 }
 0x6ab   :  { %5918 = vmatpush1.bf16.msra.mxu0 %v7213_v2  ;;  %5944 = vmatpush3.bf16.msra.mxu1 %v7252_v28 }
 0x6ac   :  { %5920 = vmatprep.subr.bf16.mxu0 %v7216_v5  ;;  %5945 = vmatprep.subr.bf16.mxu1 %v6955_v50 }
 0x6af   :  { %5922 = vmatpush1.bf16.msra.mxu0 %v7229_v12  ;;  %5947 = vmatpush3.bf16.msra.mxu1 %v7262_v31 }
 0x6b0   :  { %5924 = vmatprep.subr.bf16.mxu0 %v7232_v16  ;;  %5948 = vmatprep.subr.bf16.mxu1 %v6955_v50 }
 0x6b3   :  { %5926 = vmatpush1.bf16.msra.mxu0 %v7245_v23  ;;  %5950 = vmatpush3.bf16.msra.mxu1 %v7271_v36  ;;  %v1910_v36 = vld [vmem:[#allocation12 + $0x8] sm:$0xff] }
 0x6b4   :  { %v5951_v56 = vpack.c.bf16 %v1913_v59, %v1910_v36  ;;  %v1941_v36 = vld [vmem:[#allocation12 + $0x100] sm:$0xff] }
 0x6b6   :  { %5952 = vmatprep.subr.bf16.mxu0 %v5951_v56  ;;  %v1939_v56 = vld [vmem:[#allocation12 + $0xf0] sm:$0xff] }
 0x769   :  { %v1574_v17 = vpop.f32.mrb[12].mxu0  ;;  %v1645_v18 = vpop.f32.mrb[20].mxu1 }
 0x76a   :  { %v6551_v24 = vadd.f32 %v1574_v17, %v7334_v61  ;;  %v1576_v25 = vpop.f32.mrb[13].mxu0  ;;  %v5065_v33 = vpop.f32.mrb[21].mxu1  ;;  %v1663_v63 = vadd.f32 %v7350_v30, %v1645_v18  ;;  %v1911_v30 = vld [vmem:[#allocation12 + $0x10] sm:$0xff]  ;;  %v5961_v17 = vpack.c.bf16 %v1924_v43, %v1921_v40  ;;  %v1928_v18 = vld [vmem:[#allocation12 + $0x98] sm:$0xff]  ;;  %v6011_v40 = vpack.c.bf16 %v1956_v29, %v1953_v26  ;;  %v1873_v29 = vld [vmem:[#allocation11 + $0x60] sm:$0xff] }
 0x76b   :  { %v6552_v42 = vadd.f32 %v1576_v25, %v7339_v4  ;;  %v1929_v25 = vld [vmem:[#allocation12 + $0xa0] sm:$0xff]  ;;  %v1875_v26 = vld [vmem:[#allocation11 + $0x70] sm:$0xff] }
 0x76c   :  { %v4441_v35 = vmul.f32 -1.442695, %v6551_v24  ;;  %v1931_v24 = vld [vmem:[#allocation12 + $0xb0] sm:$0xff] }
 0x76d   :  { %v4442_v44 = vmul.f32 -1.442695, %v6552_v42  ;;  %v5963_v33 = vpack.c.bf16 %v1931_v24, %v1928_v18  ;;  %v1927_v42 = vld [vmem:[#allocation12 + $0x90] sm:$0xff] }
 0x76e   :  { %6701 = vpow2.f32 %v4441_v35  ;;  %v1932_v35 = vld [vmem:[#allocation12 + $0xb8] sm:$0xff]  ;;  %v1863_v18 = vld [vmem:[#allocation11 + $0x10] sm:$0xff] }
 0x76f   :  { %6703 = vpow2.f32 %v4442_v44  ;;  %v1930_v44 = vld [vmem:[#allocation12 + $0xa8] sm:$0xff] }
 0x778   :  { %v6702_v47 = vpop.eup %6701 }
 0x779   :  { %v1653_v53 = vadd.f32 1.0, %v6702_v47  ;;  %v6704_v55 = vpop.eup %6703  ;;  %v5995_v47 = vpack.c.bf16 %v1932_v35, %v1929_v25  ;;  %v1866_v25 = vld [vmem:[#allocation11 + $0x28] sm:$0xff] }
 0x77a   :  { %v1660_v58 = vadd.f32 1.0, %v6704_v55  ;;  %v1934_v55 = vld [vmem:[#allocation12 + $0xc8] sm:$0xff] }
 0x77b   :  { %6705 = vrcp.f32 %v1653_v53  ;;  %v5965_v53 = vpack.c.bf16 %v1930_v44, %v1927_v42 }
 0x77c   :  { %6707 = vrcp.f32 %v1660_v58  ;;  %v1937_v58 = vld [vmem:[#allocation12 + $0xe0] sm:$0xff] }
 0x785   :  { %v6706_v2 = vpop.eup %6705 }
 0x786   :  { %v1664_v5 = vmul.f32 %v6706_v2, %v1663_v63  ;;  %v6708_v12 = vpop.eup %6707  ;;  %v1935_v63 = vld [vmem:[#allocation12 + $0xd0] sm:$0xff]  ;;  %v5967_v2 = vpack.c.bf16 %v1937_v58, %v1934_v55 }
 0x787   :  { %v1667_v16 = vsub.f32 1.0, %v6708_v12  ;;  %v1669_v28 = vmul.f32 %v6708_v12, %v7573_v51  ;;  %v1936_v12 = vld [vmem:[#allocation12 + $0xd8] sm:$0xff] }
 0x788   :  { %v1665_v10 = vadd.f32 %v1664_v5, %v7344_v11  ;;  %v1914_v11 = vld [vmem:[#allocation12 + $0x28] sm:$0xff] }
 0x789   :  { %v5983_v52 = vpack.c.bf16 %v1914_v11, %v1911_v30  ;;  %v1938_v5 = vld [vmem:[#allocation12 + $0xe8] sm:$0xff]  ;;  %v1944_v30 = vld [vmem:[#allocation12 + $0x118] sm:$0xff] }
 0x78a   :  { %6709 = vtanh.f32 %v1665_v10  ;;  %v1933_v10 = vld [vmem:[#allocation12 + $0xc0] sm:$0xff]  ;;  %v1942_v11 = vld [vmem:[#allocation12 + $0x108] sm:$0xff]  ;;  %v6003_v62 = vpack.c.bf16 %v1944_v30, %v1941_v36  ;;  %v1864_v30 = vld [vmem:[#allocation11 + $0x18] sm:$0xff] }
 0x78b   :  { %5984 = vmatprep.subr.bf16.mxu1 %v5983_v52  ;;  %v5973_v49 = vpack.c.bf16 %v1942_v11, %v1939_v56 }
 0x794   :  { %v6710_v21 = vpop.eup %6709 }
 0x795   :  { %v1668_v23 = vmul.f32 %v6710_v21, %v1667_v16  ;;  %v5999_v16 = vpack.c.bf16 %v1938_v5, %v1935_v63  ;;  %v5969_v21 = vpack.c.bf16 %v1936_v12, %v1933_v10 }
 0x797   :  { %v7615_v31 = vadd.f32 %v1669_v28, %v1668_v23  ;;  %v1940_v23 = vld [vmem:[#allocation12 + $0xf8] sm:$0xff]  ;;  %v1943_v28 = vld [vmem:[#allocation12 + $0x110] sm:$0xff] }
 0x798   :  { %v5971_v59 = vpack.c.bf16 %v1943_v28, %v1940_v23 }
 0x799   :  { %1744 = vmatmul.mubr.f32.vlgmr.msra.gmra.mrb[14].mxu0 %v7615_v31  ;;  %5099 = vmatmul.mubr.f32.vlgmr.msra.gmra.mrb[22].mxu1 %v7615_v31 }
 0x79a   :  { %2021 = vmatprep.mubr.f32.mxu0 %v6953_v1  ;;  %5954 = vmatpush1.bf16.msra.mxu0 %v5953_v45  ;;  %v1949_v45 = vld [vmem:[#allocation12 + $0x140] sm:$0xff] }
 0x79b   :  { %5986 = vmatpush3.bf16.msra.mxu1 %v5983_v52  ;;  %5956 = vmatprep.subr.bf16.mxu0 %v5955_v13  ;;  %v1946_v52 = vld [vmem:[#allocation12 + $0x128] sm:$0xff]  ;;  %v1945_v13 = vld [vmem:[#allocation12 + $0x120] sm:$0xff] }
 0x79c   :  { %5988 = vmatprep.subr.bf16.mxu1 %v5987_v22  ;;  %v5975_v46 = vpack.c.bf16 %v1949_v45, %v1946_v52  ;;  %v5977_v20 = vpack.c.bf16 %v1948_v15, %v1945_v13  ;;  %v1871_v52 = vld [vmem:[#allocation11 + $0x50] sm:$0xff]  ;;  %v1870_v15 = vld [vmem:[#allocation11 + $0x48] sm:$0xff] }
 0x79d   :  { %v1867_v13 = vld [vmem:[#allocation11 + $0x30] sm:$0xff] }
 0x79e   :  { %5958 = vmatpush1.bf16.msra.mxu0 %v5957_v14  ;;  %v1955_v14 = vld [vmem:[#allocation12 + $0x170] sm:$0xff] }
 0x79f   :  { %5990 = vmatpush3.bf16.msra.mxu1 %v5987_v22  ;;  %5960 = vmatprep.subr.bf16.mxu0 %v5959_v32  ;;  %v1952_v22 = vld [vmem:[#allocation12 + $0x158] sm:$0xff]  ;;  %v1951_v32 = vld [vmem:[#allocation12 + $0x150] sm:$0xff] }
 0x7a0   :  { %5992 = vmatprep.subr.bf16.mxu1 %v5991_v48  ;;  %v5979_v27 = vpack.c.bf16 %v1955_v14, %v1952_v22  ;;  %v5981_v43 = vpack.c.bf16 %v1954_v34, %v1951_v32  ;;  %v1877_v22 = vld [vmem:[#allocation11 + $0x80] sm:$0xff]  ;;  %v6021_v14 = vpack.c.bf16 %v1870_v15, %v1867_v13  ;;  %v1876_v32 = vld [vmem:[#allocation11 + $0x78] sm:$0xff]  ;;  %v1907_v15 = vld [vmem:[#allocation11 + $0x170] sm:$0xff] }
 0x7a1   :  { %v1904_v13 = vld [vmem:[#allocation11 + $0x158] sm:$0xff] }
 0x7a2   :  { %5962 = vmatpush1.bf16.msra.mxu0 %v5961_v17  ;;  %v1865_v17 = vld [vmem:[#allocation11 + $0x20] sm:$0xff] }
 0x7a3   :  { %5994 = vmatpush3.bf16.msra.mxu1 %v5991_v48  ;;  %5964 = vmatprep.subr.bf16.mxu0 %v5963_v33  ;;  %v1862_v48 = vld [vmem:[#allocation11 + $0x8] sm:$0xff]  ;;  %v6047_v33 = vpack.c.bf16 %v1866_v25, %v1863_v18  ;;  %v1881_v18 = vld [vmem:[#allocation11 + $0xa0] sm:$0xff]  ;;  %v1879_v25 = vld [vmem:[#allocation11 + $0x90] sm:$0xff] }
 0x7a4   :  { %5996 = vmatprep.subr.bf16.mxu1 %v5995_v47  ;;  %v6015_v24 = vpack.c.bf16 %v1865_v17, %v1862_v48  ;;  %v1883_v48 = vld [vmem:[#allocation11 + $0xb0] sm:$0xff]  ;;  %v6025_v17 = vpack.c.bf16 %v1876_v32, %v1873_v29  ;;  %v2459_v29 = vld [vmem:[#allocation14 + $0x8] sm:$0xff]  ;;  %v2462_v32 = vld [vmem:[#allocation14 + $0x20] sm:$0xff] }
 0x7a6   :  { %5966 = vmatpush1.bf16.msra.mxu0 %v5965_v53 }
 0x7a7   :  { %5998 = vmatpush3.bf16.msra.mxu1 %v5995_v47  ;;  %5968 = vmatprep.subr.bf16.mxu0 %v5967_v2 }
 0x7a8   :  { %6000 = vmatprep.subr.bf16.mxu1 %v5999_v16 }
 0x7aa   :  { %5970 = vmatpush1.bf16.msra.mxu0 %v5969_v21 }
 0x7ab   :  { %6002 = vmatpush3.bf16.msra.mxu1 %v5999_v16  ;;  %5972 = vmatprep.subr.bf16.mxu0 %v5971_v59  ;;  %v6805_v16 = vld [vmem:[%s8245_s4] ss:$0 sm:$0xff]  ;;  %v1861_v59 = vld [vmem:[#allocation11] sm:$0xff] }
 0x7ac   :  { %6004 = vmatprep.subr.bf16.mxu1 %v6003_v62  ;;  %v6017_v45 = vpack.c.bf16 %v1864_v30, %v1861_v59  ;;  %v1898_v30 = vld [vmem:[#allocation11 + $0x128] sm:$0xff] }
 0x7ae   :  { %5974 = vmatpush1.bf16.msra.mxu0 %v5973_v49  ;;  %v1868_v49 = vld [vmem:[#allocation11 + $0x38] sm:$0xff] }
 0x7af   :  { %6006 = vmatpush3.bf16.msra.mxu1 %v6003_v62  ;;  %5976 = vmatprep.subr.bf16.mxu0 %v5975_v46  ;;  %v1872_v46 = vld [vmem:[#allocation11 + $0x58] sm:$0xff] }
 0x7b0   :  { %6008 = vmatprep.subr.bf16.mxu1 %v6007_v19 }
 0x7b2   :  { %5978 = vmatpush1.bf16.msra.mxu0 %v5977_v20  ;;  %v1874_v20 = vld [vmem:[#allocation11 + $0x68] sm:$0xff] }
 0x7b3   :  { %6010 = vmatpush3.bf16.msra.mxu1 %v6007_v19  ;;  %5980 = vmatprep.subr.bf16.mxu0 %v5979_v27  ;;  %v6019_v19 = vpack.c.bf16 %v1871_v52, %v1868_v49  ;;  %v1878_v27 = vld [vmem:[#allocation11 + $0x88] sm:$0xff]  ;;  %v6023_v34 = vpack.c.bf16 %v1877_v22, %v1874_v20  ;;  %v6043_v22 = vpack.c.bf16 %v1907_v15, %v1904_v13  ;;  %v2484_v15 = vld [vmem:[#allocation14 + $0xd0] sm:$0xff] }
 0x7b4   :  { %6012 = vmatprep.subr.bf16.mxu1 %v6011_v40 }
 0x7b6   :  { %5982 = vmatpush1.bf16.msra.mxu0 %v5981_v43  ;;  %v1880_v43 = vld [vmem:[#allocation11 + $0x98] sm:$0xff] }
 0x7b7   :  { %6014 = vmatpush3.bf16.msra.mxu1 %v6011_v40  ;;  %6016 = vmatprep.subr.bf16.mxu0 %v6015_v24  ;;  %v6055_v40 = vpack.c.bf16 %v1878_v27, %v1875_v26  ;;  %v1884_v24 = vld [vmem:[#allocation11 + $0xb8] sm:$0xff]  ;;  %v1906_v26 = vld [vmem:[#allocation11 + $0x168] sm:$0xff] }
 0x7b8   :  { %6048 = vmatprep.subr.bf16.mxu1 %v6047_v33 }
 0x86c   :  { %v1745_v35 = vpop.f32.mrb[14].mxu0  ;;  %v1816_v42 = vpop.f32.mrb[22].mxu1 }
 0x86d   :  { %v6553_v44 = vadd.f32 %v1745_v35, %v7334_v61  ;;  %v1747_v47 = vpop.f32.mrb[15].mxu0  ;;  %v5100_v53 = vpop.f32.mrb[23].mxu1  ;;  %v1834_v21 = vadd.f32 %v6805_v16, %v1816_v42  ;;  %v6027_v35 = vpack.c.bf16 %v1883_v48, %v1880_v43  ;;  %v6059_v42 = vpack.c.bf16 %v1884_v24, %v1881_v18  ;;  %v2458_v43 = vld [vmem:[#allocation14] sm:$0xff]  ;;  %v2461_v48 = vld [vmem:[#allocation14 + $0x18] sm:$0xff]  ;;  %v2468_v18 = vld [vmem:[#allocation14 + $0x50] sm:$0xff] }
 0x86e   :  { %v6554_v58 = vadd.f32 %v1747_v47, %v7339_v4  ;;  %v1889_v47 = vld [vmem:[#allocation11 + $0xe0] sm:$0xff]  ;;  %v2460_v24 = vld [vmem:[#allocation14 + $0x10] sm:$0xff] }
 0x86f   :  { %v4443_v55 = vmul.f32 -1.442695, %v6553_v44  ;;  %v1886_v44 = vld [vmem:[#allocation11 + $0xc8] sm:$0xff] }
 0x870   :  { %v4444_v63 = vmul.f32 -1.442695, %v6554_v58  ;;  %v1890_v58 = vld [vmem:[#allocation11 + $0xe8] sm:$0xff] }
 0x871   :  { %6711 = vpow2.f32 %v4443_v55  ;;  %v1887_v55 = vld [vmem:[#allocation11 + $0xd0] sm:$0xff] }
 0x872   :  { %6713 = vpow2.f32 %v4444_v63  ;;  %v1885_v63 = vld [vmem:[#allocation11 + $0xc0] sm:$0xff]  ;;  %v6063_v16 = vpack.c.bf16 %v1890_v58, %v1887_v55 }
 0x873   :  { %v2474_v55 = vld [vmem:[#allocation14 + $0x80] sm:$0xff] }
 0x874   :  { %v2466_v58 = vld [vmem:[#allocation14 + $0x40] sm:$0xff] }
 0x87b   :  { %v6712_v2 = vpop.eup %6711 }
 0x87c   :  { %v1824_v5 = vadd.f32 1.0, %v6712_v2  ;;  %v6714_v10 = vpop.eup %6713  ;;  %v1888_v2 = vld [vmem:[#allocation11 + $0xd8] sm:$0xff] }
 0x87d   :  { %v1831_v12 = vadd.f32 1.0, %v6714_v10  ;;  %v1892_v10 = vld [vmem:[#allocation11 + $0xf8] sm:$0xff] }
 0x87e   :  { %6715 = vrcp.f32 %v1824_v5  ;;  %v6031_v5 = vpack.c.bf16 %v1889_v47, %v1886_v44  ;;  %v2471_v47 = vld [vmem:[#allocation14 + $0x68] sm:$0xff] }
 0x87f   :  { %6717 = vrcp.f32 %v1831_v12  ;;  %v1895_v12 = vld [vmem:[#allocation11 + $0x110] sm:$0xff] }
 0x888   :  { %v6716_v23 = vpop.eup %6715 }
 0x889   :  { %v1835_v61 = vmul.f32 %v6716_v23, %v1834_v21  ;;  %v6718_v4 = vpop.eup %6717  ;;  %v1893_v21 = vld [vmem:[#allocation11 + $0x100] sm:$0xff]  ;;  %v1896_v23 = vld [vmem:[#allocation11 + $0x118] sm:$0xff] }
 0x88a   :  { %v1838_v36 = vsub.f32 1.0, %v6718_v4  ;;  %v1840_v62 = vmul.f32 %v6718_v4, %v7615_v31  ;;  %v1891_v4 = vld [vmem:[#allocation11 + $0xf0] sm:$0xff]  ;;  %v6067_v59 = vpack.c.bf16 %v1896_v23, %v1893_v21 }
 0x88b   :  { %v1836_v28 = vadd.f32 %v1835_v61, %v7341_v6  ;;  %v6051_v6 = vpack.c.bf16 %v1872_v46, %v1869_v41  ;;  %v6033_v61 = vpack.c.bf16 %v1888_v2, %v1885_v63  ;;  %v1900_v41 = vld [vmem:[#allocation11 + $0x138] sm:$0xff]  ;;  %v2480_v21 = vld [vmem:[#allocation14 + $0xb0] sm:$0xff] }
 0x88c   :  { %v2469_v63 = vld [vmem:[#allocation14 + $0x58] sm:$0xff]  ;;  %v2472_v23 = vld [vmem:[#allocation14 + $0x70] sm:$0xff] }
 0x88d   :  { %6719 = vtanh.f32 %v1836_v28  ;;  %v6035_v28 = vpack.c.bf16 %v1895_v12, %v1892_v10  ;;  %v2473_v10 = vld [vmem:[#allocation14 + $0x78] sm:$0xff]  ;;  %v7672_v12 = vpack.c.bf16 %v2474_v55, %v2471_v47  ;;  %v2500_v55 = vld [vmem:[#allocation14 + $0x150] sm:$0xff] }
 0x897   :  { %v6720_v56 = vpop.eup %6719 }
 0x898   :  { %v1839_v11 = vmul.f32 %v6720_v56, %v1838_v36  ;;  %v1894_v36 = vld [vmem:[#allocation11 + $0x108] sm:$0xff]  ;;  %v1901_v56 = vld [vmem:[#allocation11 + $0x140] sm:$0xff] }
 0x899   :  { %v6037_v49 = vpack.c.bf16 %v1894_v36, %v1891_v4  ;;  %v6039_v52 = vpack.c.bf16 %v1901_v56, %v1898_v30  ;;  %v2476_v4 = vld [vmem:[#allocation14 + $0x90] sm:$0xff]  ;;  %v2479_v36 = vld [vmem:[#allocation14 + $0xa8] sm:$0xff]  ;;  %v2486_v30 = vld [vmem:[#allocation14 + $0xe0] sm:$0xff] }
 0x89a   :  { %v7627_v9 = vadd.f32 %v1840_v62, %v1839_v11  ;;  %v1899_v11 = vld [vmem:[#allocation11 + $0x130] sm:$0xff]  ;;  %v1902_v62 = vld [vmem:[#allocation11 + $0x148] sm:$0xff] }
 0x89b   :  { %v6071_v46 = vpack.c.bf16 %v1902_v62, %v1899_v11  ;;  %v2478_v11 = vld [vmem:[#allocation14 + $0xa0] sm:$0xff]  ;;  %v2481_v62 = vld [vmem:[#allocation14 + $0xb8] sm:$0xff] }
 0x89c   :  { %2022 = vmatmul.mubr.f32.vlgmr.msra.gmra.mrb[16].mxu0 %v7627_v9  ;;  %5133 = vmatprep.mubr.f32.mxu1 %v7627_v9  ;;  %v7703_v13 = vpack.c.bf16 %v2481_v62, %v2478_v11 }
 0x89d   :  { %5134 = vmatmul.mubr.f32.vlgmr.msra.gmra.mrb[24].mxu1 %v7615_v31  ;;  %6018 = vmatpush1.bf16.msra.mxu0 %v6017_v45  ;;  %v1897_v45 = vld [vmem:[#allocation11 + $0x120] sm:$0xff] }
 0x89e   :  { %6050 = vmatpush3.bf16.msra.mxu1 %v6047_v33  ;;  %5136 = vmatprep.mubr.f32.mxu1 %v7573_v51  ;;  %v1882_v33 = vld [vmem:[#allocation11 + $0xa8] sm:$0xff]  ;;  %v6041_v20 = vpack.c.bf16 %v1900_v41, %v1897_v45  ;;  %v2482_v45 = vld [vmem:[#allocation14 + $0xc0] sm:$0xff]  ;;  %v2485_v41 = vld [vmem:[#allocation14 + $0xd8] sm:$0xff] }
 0x89f   :  { %2027 = vmatprep.mubr.f32.mxu0 %v6953_v1  ;;  %6020 = vmatprep.subr.bf16.mxu0 %v6019_v19  ;;  %v6029_v53 = vpack.c.bf16 %v1882_v33, %v1879_v25  ;;  %v1905_v19 = vld [vmem:[#allocation11 + $0x160] sm:$0xff]  ;;  %v2463_v25 = vld [vmem:[#allocation14 + $0x28] sm:$0xff]  ;;  %v7656_v33 = vpack.c.bf16 %v2461_v48, %v2458_v43 }
 0x8a0   :  { %2028 = vmatmul.mubr.f32.gmra.mrb[18].mxu0 %v7615_v31  ;;  %6052 = vmatprep.subr.bf16.mxu1 %v6051_v6  ;;  %v2494_v48 = vld [vmem:[#allocation14 + $0x120] sm:$0xff] }
 0x8a1   :  { %5137 = vmatmul.mubr.f32.gmra.mrb[26].mxu1 %v7529_v60  ;;  %6022 = vmatpush1.bf16.msra.mxu0 %v6021_v14  ;;  %v1903_v14 = vld [vmem:[#allocation11 + $0x150] sm:$0xff] }
 0x8a2   :  { %6054 = vmatpush3.bf16.msra.mxu1 %v6051_v6  ;;  %5139 = vmatprep.mubr.f32.mxu1 %v7485_v0  ;;  %v1908_v6 = vld [vmem:[#allocation11 + $0x178] sm:$0xff] }
 0x8a3   :  { %2033 = vmatprep.mubr.f32.mxu0 %v6953_v1  ;;  %6024 = vmatprep.subr.bf16.mxu0 %v6023_v34  ;;  %v6075_v27 = vpack.c.bf16 %v1908_v6, %v1905_v19  ;;  %v6045_v34 = vpack.c.bf16 %v1906_v26, %v1903_v14  ;;  %v2487_v19 = vld [vmem:[#allocation14 + $0xe8] sm:$0xff]  ;;  %v7709_v6 = vpack.c.bf16 %v2485_v41, %v2482_v45 }
 0x8a4   :  { %2034 = vmatmul.mubr.f32.gmra.mrb[20].mxu0 %v7573_v51  ;;  %6056 = vmatprep.subr.bf16.mxu1 %v6055_v40  ;;  %v2491_v14 = vld [vmem:[#allocation14 + $0x108] sm:$0xff] }
 0x8a5   :  { %5140 = vmatmul.mubr.f32.gmra.mrb[28].mxu1 %v7441_v3  ;;  %6026 = vmatpush1.bf16.msra.mxu0 %v6025_v17  ;;  %v2465_v17 = vld [vmem:[#allocation14 + $0x38] sm:$0xff]  ;;  %v2495_v26 = vld [vmem:[#allocation14 + $0x128] sm:$0xff] }
 0x8a6   :  { %6058 = vmatpush3.bf16.msra.mxu1 %v6055_v40  ;;  %5142 = vmatprep.mubr.f32.mxu1 %v7397_v7  ;;  %v7652_v40 = vpack.c.bf16 %v2462_v32, %v2459_v29  ;;  %v7659_v44 = vpack.c.bf16 %v2468_v18, %v2465_v17  ;;  %v2490_v29 = vld [vmem:[#allocation14 + $0x100] sm:$0xff]  ;;  %v2493_v32 = vld [vmem:[#allocation14 + $0x118] sm:$0xff] }
 0x8a7   :  { %2039 = vmatprep.mubr.f32.mxu0 %v6953_v1  ;;  %6028 = vmatprep.subr.bf16.mxu0 %v6027_v35  ;;  %v2464_v35 = vld [vmem:[#allocation14 + $0x30] sm:$0xff]  ;;  %v2497_v17 = vld [vmem:[#allocation14 + $0x138] sm:$0xff] }
 0x8a8   :  { %2040 = vmatmul.mubr.f32.gmra.mrb[22].mxu0 %v7529_v60  ;;  %6060 = vmatprep.subr.bf16.mxu1 %v6059_v42  ;;  %v2501_v18 = vld [vmem:[#allocation14 + $0x158] sm:$0xff] }
 0x8a9   :  { %5143 = vmatmul.mubr.f32.gmra.mrb[30].mxu1 %v7353_v8  ;;  %6030 = vmatpush1.bf16.msra.mxu0 %v6029_v53  ;;  %v7662_v53 = vpack.c.bf16 %v2463_v25, %v2460_v24  ;;  %v2504_v24 = vld [vmem:[#allocation14 + $0x170] sm:$0xff] }
 0x8aa   :  { %6062 = vmatpush3.bf16.msra.mxu1 %v6059_v42  ;;  %5177 = vmatprep.mubr.f32.mxu1 %v7353_v8  ;;  %v2467_v42 = vld [vmem:[#allocation14 + $0x48] sm:$0xff]  ;;  %v2496_v25 = vld [vmem:[#allocation14 + $0x130] sm:$0xff]  ;;  %v7739_v47 = vpack.c.bf16 %v2504_v24, %v2501_v18 }
 0x8ab   :  { %2045 = vmatprep.mubr.f32.mxu0 %v6953_v1  ;;  %6032 = vmatprep.subr.bf16.mxu0 %v6031_v5  ;;  %v7667_v2 = vpack.c.bf16 %v2467_v42, %v2464_v35  ;;  %v2470_v5 = vld [vmem:[#allocation14 + $0x60] sm:$0xff]  ;;  %v2499_v35 = vld [vmem:[#allocation14 + $0x148] sm:$0xff]  ;;  %v7736_v42 = vpack.c.bf16 %v2497_v17, %v2494_v48 }
 0x8ac   :  { %2046 = vmatmul.mubr.f32.gmra.mrb[24].mxu0 %v7485_v0  ;;  %6064 = vmatprep.subr.bf16.mxu1 %v6063_v16 }
 0x8ad   :  { %6034 = vmatpush1.bf16.msra.mxu0 %v6033_v61  ;;  %2051 = vmatprep.mubr.f32.mxu0 %v6953_v1  ;;  %v2475_v61 = vld [vmem:[#allocation14 + $0x88] sm:$0xff] }
 0x8ae   :  { %6066 = vmatpush3.bf16.msra.mxu1 %v6063_v16  ;;  %6036 = vmatprep.subr.bf16.mxu0 %v6035_v28  ;;  %v7675_v16 = vpack.c.bf16 %v2469_v63, %v2466_v58  ;;  %v7681_v28 = vpack.c.bf16 %v2473_v10, %v2470_v5  ;;  %v7689_v56 = vpack.c.bf16 %v2475_v61, %v2472_v23  ;;  %v2503_v58 = vld [vmem:[#allocation14 + $0x168] sm:$0xff]  ;;  %v2505_v5 = vld [vmem:[#allocation14 + $0x178] sm:$0xff] }
 0x8af   :  { %6068 = vmatprep.subr.bf16.mxu1 %v6067_v59  ;;  %v7742_v63 = vpack.c.bf16 %v2499_v35, %v2496_v25  ;;  %v7748_v10 = vpack.c.bf16 %v2503_v58, %v2500_v55  ;;  %v7827_v58 = vld [vmem:[%s8250_s9] ss:$0 sm:$0xff]  ;;  %s6957_s9 = smov 32  }
 0x8b0   :  { %2052 = vmatmul.mubr.f32.gmra.mrb[26].mxu0 %v7441_v3 }
 0x8b1   :  { %6038 = vmatpush1.bf16.msra.mxu0 %v6037_v49  ;;  %2057 = vmatprep.mubr.f32.mxu0 %v6953_v1  ;;  %v7695_v49 = vpack.c.bf16 %v2479_v36, %v2476_v4 }
 0x8b2   :  { %6070 = vmatpush3.bf16.msra.mxu1 %v6067_v59  ;;  %6040 = vmatprep.subr.bf16.mxu0 %v6039_v52  ;;  %v2483_v59 = vld [vmem:[#allocation14 + $0xc8] sm:$0xff] }
 0x8b3   :  { %6072 = vmatprep.subr.bf16.mxu1 %v6071_v46  ;;  %v7699_v52 = vpack.c.bf16 %v2486_v30, %v2483_v59 }
 0x8b4   :  { %2058 = vmatmul.mubr.f32.gmra.mrb[28].mxu0 %v7397_v7 }
 0x8b5   :  { %6042 = vmatpush1.bf16.msra.mxu0 %v6041_v20  ;;  %2063 = vmatprep.mubr.f32.mxu0 %v6953_v1 }
 0x8b6   :  { %6074 = vmatpush3.bf16.msra.mxu1 %v6071_v46  ;;  %6044 = vmatprep.subr.bf16.mxu0 %v6043_v22  ;;  %v2492_v46 = vld [vmem:[#allocation14 + $0x110] sm:$0xff] }
 0x8b7   :  { %6076 = vmatprep.subr.bf16.mxu1 %v6075_v27  ;;  %v2488_v22 = vld [vmem:[#allocation14 + $0xf0] sm:$0xff] }
 0x8b8   :  { %2064 = vmatmul.mubr.f32.gmra.mrb[30].mxu0 %v7353_v8 }
 0x8b9   :  { %6046 = vmatpush1.bf16.msra.mxu0 %v6045_v34  ;;  %2239 = vmatprep.mubr.f32.mxu0 %v6953_v1  ;;  %v7724_v34 = vpack.c.bf16 %v2491_v14, %v2488_v22 }
 0x8ba   :  { %6078 = vmatpush3.bf16.msra.mxu1 %v6075_v27  ;;  %6080 = vmatprep.subr.bf16.mxu0 %v7652_v40  ;;  %v7716_v27 = vpack.c.bf16 %v2487_v19, %v2484_v15 }
 0x8bb   :  { %6111 = vmatprep.subr.bf16.mxu1 %v6955_v50 }
 0x8bc   :  { %2240 = vmatmul.mubr.f32.vlgmr.msra.gmra.mrb[16].mxu0 %v7353_v8  ;;  %v2477_v8 = vld [vmem:[#allocation14 + $0x98] sm:$0xff] }
 0x8bd   :  { %5178 = vmatmul.mubr.f32.vlgmr.msra.gmra.mrb[24].mxu1 %v7397_v7  ;;  %6082 = vmatpush1.bf16.msra.mxu0 %v7656_v33 }
 0x8be   :  { %5180 = vmatprep.mubr.f32.mxu1 %v7441_v3  ;;  %2245 = vmatprep.mubr.f32.mxu0 %v6953_v1 }
 0x8bf   :  { %6084 = vmatprep.subr.bf16.mxu0 %v7659_v44  ;;  %6113 = vmatpush3.bf16.msra.mxu1 %v7662_v53 }
 0x8c0   :  { %2246 = vmatmul.mubr.f32.gmra.mrb[18].mxu0 %v7397_v7  ;;  %6114 = vmatprep.subr.bf16.mxu1 %v6955_v50  ;;  %v7686_v7 = vpack.c.bf16 %v2480_v21, %v2477_v8 }
 0x8c1   :  { %5181 = vmatmul.mubr.f32.gmra.mrb[26].mxu1 %v7485_v0  ;;  %6086 = vmatpush1.bf16.msra.mxu0 %v7667_v2 }
 0x8c2   :  { %5183 = vmatprep.mubr.f32.mxu1 %v7529_v60  ;;  %2251 = vmatprep.mubr.f32.mxu0 %v6953_v1 }
 0x8c3   :  { %6088 = vmatprep.subr.bf16.mxu0 %v7672_v12  ;;  %6116 = vmatpush3.bf16.msra.mxu1 %v7675_v16 }
 0x8c4   :  { %2252 = vmatmul.mubr.f32.gmra.mrb[20].mxu0 %v7441_v3  ;;  %6117 = vmatprep.subr.bf16.mxu1 %v6955_v50  ;;  %v2489_v3 = vld [vmem:[#allocation14 + $0xf8] sm:$0xff] }
 0x8c5   :  { %5184 = vmatmul.mubr.f32.gmra.mrb[28].mxu1 %v7573_v51  ;;  %6090 = vmatpush1.bf16.msra.mxu0 %v7681_v28  ;;  %v7713_v20 = vpack.c.bf16 %v2492_v46, %v2489_v3 }
 0x8c6   :  { %5186 = vmatprep.mubr.f32.mxu1 %v7615_v31  ;;  %2257 = vmatprep.mubr.f32.mxu0 %v6953_v1 }
 0x8c7   :  { %6092 = vmatprep.subr.bf16.mxu0 %v7686_v7  ;;  %6119 = vmatpush3.bf16.msra.mxu1 %v7689_v56 }
 0x8c8   :  { %2258 = vmatmul.mubr.f32.gmra.mrb[22].mxu0 %v7485_v0  ;;  %6120 = vmatprep.subr.bf16.mxu1 %v6955_v50  ;;  %v2498_v0 = vld [vmem:[#allocation14 + $0x140] sm:$0xff] }
 0x8c9   :  { %5187 = vmatmul.mubr.f32.gmra.mrb[30].mxu1 %v7627_v9  ;;  %6094 = vmatpush1.bf16.msra.mxu0 %v7695_v49  ;;  %v7727_v43 = vpack.c.bf16 %v2498_v0, %v2495_v26 }
 0x8ca   :  { %2263 = vmatprep.mubr.f32.mxu0 %v6953_v1  ;;  %6096 = vmatprep.subr.bf16.mxu0 %v7699_v52 }
 0x8cb   :  { %6122 = vmatpush3.bf16.msra.mxu1 %v7703_v13  ;;  %5221 = vmatprep.mubr.msk.f32.mxu1 %vm6956_vm4, %v6953_v1 }
 0x8cc   :  { %2264 = vmatmul.mubr.f32.gmra.mrb[24].mxu0 %v7529_v60  ;;  %6123 = vmatprep.subr.bf16.mxu1 %v6955_v50  ;;  %v7730_v60 = vpack.c.bf16 %v2493_v32, %v2490_v29 }
 0x8cd   :  { %6098 = vmatpush1.bf16.msra.mxu0 %v7709_v6  ;;  %2269 = vmatprep.mubr.f32.mxu0 %v6953_v1 }
 0x8ce   :  { %6100 = vmatprep.subr.bf16.mxu0 %v7713_v20 }
 0x8cf   :  { %6125 = vmatpush3.bf16.msra.mxu1 %v7716_v27 }
 0x8d0   :  { %2270 = vmatmul.mubr.f32.gmra.mrb[26].mxu0 %v7573_v51  ;;  %6126 = vmatprep.subr.bf16.mxu1 %v6955_v50  ;;  %v2502_v51 = vld [vmem:[#allocation14 + $0x160] sm:$0xff] }
 0x8d1   :  { %6102 = vmatpush1.bf16.msra.mxu0 %v7724_v34  ;;  %2275 = vmatprep.mubr.f32.mxu0 %v6953_v1  ;;  %v7752_v8 = vpack.c.bf16 %v2505_v5, %v2502_v51 }
 0x8d2   :  { %6104 = vmatprep.subr.bf16.mxu0 %v7727_v43 }
 0x8d3   :  { %6128 = vmatpush3.bf16.msra.mxu1 %v7730_v60 }
 0x8d4   :  { %2276 = vmatmul.mubr.f32.gmra.mrb[28].mxu0 %v7615_v31  ;;  %6129 = vmatprep.subr.bf16.mxu1 %v6955_v50  ;;  %v2393_v31 = vld [vmem:[%s8249_s8] sm:$0x7] }
 0x8d5   :  { %6106 = vmatpush1.bf16.msra.mxu0 %v7736_v42  ;;  %2281 = vmatprep.mubr.f32.mxu0 %v6953_v1  ;;  %v7817_v22 = vrot.slane %v2393_v31, %v7326_v54  ;;  %v7820_v26 = vrot.slane %v2393_v31, %v7329_v57 }
 0x8d6   :  { %6108 = vmatprep.subr.bf16.mxu0 %v7739_v47 }
 0x8d7   :  { %6131 = vmatpush3.bf16.msra.mxu1 %v7742_v63 }
 0x8d8   :  { %2282 = vmatmul.mubr.f32.gmra.mrb[30].mxu0 %v7627_v9  ;;  %6132 = vmatprep.subr.bf16.mxu1 %v6955_v50  ;;  %v2406_v9 = vrot.slane %v2393_v31, %v7313_v39 }
 0x8d9   :  { %6110 = vmatpush1.bf16.msra.mxu0 %v7748_v10  ;;  %2574 = vmatprep.mubr.f32.mxu0 %v6953_v1 }
 0x8da   :  { %6136 = vmatprep.subr.bf16.mxu0 %v7652_v40 }
 0x8db   :  { %6134 = vmatpush3.bf16.msra.mxu1 %v7752_v8 }
 0x8dc   :  { %2575 = vmatmul.mubr.f32.vlgmr.msra.gmra.mrb[16].mxu0 %v6953_v1  ;;  %6167 = vmatprep.subr.bf16.mxu1 %v6955_v50 }
 0x8dd   :  { %6138 = vmatpush1.bf16.msra.mxu0 %v7656_v33  ;;  %2748 = vmatprep.mubr.f32.mxu0 %v6953_v1 }
 0x8de   :  { %5222 = vmatmul.mubr.f32.vlgmr.msra.gmra.mrb[32].mxu1 %v6953_v1  ;;  %6140 = vmatprep.subr.bf16.mxu0 %v7659_v44 }
 0x8df   :  { %6169 = vmatpush3.bf16.msra.mxu1 %v7662_v53  ;;  %5256 = vmatprep.mubr.msk.f32.mxu1 %vm6956_vm4, %v6953_v1 }
 0x8e0   :  { %6170 = vmatprep.subr.bf16.mxu1 %v6955_v50 }
 0x8e1   :  { %6142 = vmatpush1.bf16.msra.mxu0 %v7667_v2 }
 0x8e2   :  { %6144 = vmatprep.subr.bf16.mxu0 %v7672_v12 }
 0x8e3   :  { %6172 = vmatpush3.bf16.msra.mxu1 %v7675_v16 }
 0x8e4   :  { %6173 = vmatprep.subr.bf16.mxu1 %v6955_v50 }
 0x8e5   :  { %6146 = vmatpush1.bf16.msra.mxu0 %v7681_v28 }
 0x8e6   :  { %6148 = vmatprep.subr.bf16.mxu0 %v7686_v7 }
 0x8e7   :  { %6175 = vmatpush3.bf16.msra.mxu1 %v7689_v56 }
 0x8e8   :  { %6176 = vmatprep.subr.bf16.mxu1 %v6955_v50 }
 0x8e9   :  { %6150 = vmatpush1.bf16.msra.mxu0 %v7695_v49 }
 0x8ea   :  { %6152 = vmatprep.subr.bf16.mxu0 %v7699_v52 }
 0x8eb   :  { %6178 = vmatpush3.bf16.msra.mxu1 %v7703_v13 }
 0x8ec   :  { %6179 = vmatprep.subr.bf16.mxu1 %v6955_v50 }
 0x8ed   :  { %6154 = vmatpush1.bf16.msra.mxu0 %v7709_v6 }
 0x8ee   :  { %6156 = vmatprep.subr.bf16.mxu0 %v7713_v20 }
 0x8ef   :  { %6181 = vmatpush3.bf16.msra.mxu1 %v7716_v27 }
 0x8f0   :  { %6182 = vmatprep.subr.bf16.mxu1 %v6955_v50 }
 0x8f1   :  { %6158 = vmatpush1.bf16.msra.mxu0 %v7724_v34 }
 0x8f2   :  { %6160 = vmatprep.subr.bf16.mxu0 %v7727_v43 }
 0x8f3   :  { %6184 = vmatpush3.bf16.msra.mxu1 %v7730_v60 }
 0x8f4   :  { %6185 = vmatprep.subr.bf16.mxu1 %v6955_v50 }
 0x8f5   :  { %6162 = vmatpush1.bf16.msra.mxu0 %v7736_v42 }
 0x8f6   :  { %6164 = vmatprep.subr.bf16.mxu0 %v7739_v47 }
 0x8f7   :  { %6187 = vmatpush3.bf16.msra.mxu1 %v7742_v63 }
 0x8f8   :  { %6188 = vmatprep.subr.bf16.mxu1 %v6955_v50 }
 0x8f9   :  { %6166 = vmatpush1.bf16.msra.mxu0 %v7748_v10 }
 0x8fa   :  { %6192 = vmatprep.subr.bf16.mxu0 %v7652_v40 }
 0x8fb   :  { %6190 = vmatpush3.bf16.msra.mxu1 %v7752_v8 }
 0x8fc   :  { %6223 = vmatprep.subr.bf16.mxu1 %v6955_v50 }
 0x990   :  { %v5179_v21 = vpop.f32.mrb[24].mxu1 }
 0x991   :  { %v7802_v23 = vadd.f32 %v5179_v21, %v2406_v9  ;;  %v2354_v61 = vpop.f32.mrb[25].mxu1 }
 0x992   :  { %v2412_v21 = vadd.f32 %v2406_v9, %v2354_v61 }
 0x994   :  { %v5182_v4 = vpop.f32.mrb[26].mxu1 }
 0x995   :  { %v7804_v36 = vadd.f32 %v5182_v4, %v2406_v9  ;;  %v2364_v59 = vpop.f32.mrb[27].mxu1 }
 0x996   :  { %v7806_v30 = vadd.f32 %v2406_v9, %v2364_v59 }
 0x998   :  { %v5185_v11 = vpop.f32.mrb[28].mxu1 }
 0x999   :  { %v7808_v62 = vadd.f32 %v5185_v11, %v2406_v9  ;;  %v2374_v45 = vpop.f32.mrb[29].mxu1 }
 0x99a   :  { %v7810_v41 = vadd.f32 %v2406_v9, %v2374_v45 }
 0x99c   :  { %v5188_v3 = vpop.f32.mrb[30].mxu1 }
 0x99d   :  { %v7812_v46 = vadd.f32 %v5188_v3, %v2406_v9  ;;  %v2384_v15 = vpop.f32.mrb[31].mxu1 }
 0x99e   :  { %v7814_v19 = vadd.f32 %v2406_v9, %v2384_v15 }
 0x9af   :  { %v2576_v14 = vpop.f32.mrb[16].mxu0 }
 0x9b0   :  { %v6555_v0 = vadd.f32 %v2576_v14, %v7817_v22  ;;  %v2578_v29 = vpop.f32.mrb[17].mxu0 }
 0x9b1   :  { %v2647_v32 = vpop.f32.mrb[32].mxu1  ;;  %v6556_v18 = vadd.f32 %v2578_v29, %v7820_v26 }
 0x9b2   :  { %v4445_v48 = vmul.f32 -1.442695, %v6555_v0  ;;  %v5223_v17 = vpop.f32.mrb[33].mxu1  ;;  %v2671_v5 = vadd.f32 %v7827_v58, %v2647_v32 }
 0x9b3   :  { %v4446_v24 = vmul.f32 -1.442695, %v6556_v18 }
 0x9b4   :  { %6721 = vpow2.f32 %v4445_v48 }
 0x9b5   :  { %6723 = vpow2.f32 %v4446_v24 }
 0x9be   :  { %v6722_v25 = vpop.eup %6721 }
 0x9bf   :  { %v2655_v35 = vadd.f32 1.0, %v6722_v25  ;;  %v6724_v55 = vpop.eup %6723 }
 0x9c0   :  { %v2662_v51 = vadd.f32 1.0, %v6724_v55 }
 0x9c1   :  { %6725 = vrcp.f32 %v2655_v35 }
 0x9c2   :  { %6727 = vrcp.f32 %v2662_v51 }
 0x9cb   :  { %v6726_v31 = vpop.eup %6725 }
 0x9cc   :  { %v2672_v4 = vmul.f32 %v6726_v31, %v2671_v5  ;;  %v6728_v11 = vpop.eup %6727 }
 0x9cd   :  { %v2675_v45 = vsub.f32 1.0, %v6728_v11  ;;  %v2677_v15 = vmul.f32 0.0, %v6728_v11 }
 0x9ce   :  { %v2673_v59 = vadd.f32 %v2672_v4, %v2412_v21 }
 0x9d0   :  { %6729 = vtanh.f32 %v2673_v59 }
 0x9da   :  { %v6730_v3 = vpop.eup %6729 }
 0x9db   :  { %v2676_v14 = vmul.f32 %v6730_v3, %v2675_v45 }
 0x9dd   :  { %v7830_v0 = vadd.f32 %v2677_v15, %v2676_v14 }
 0x9df   :  { %2749 = vmatmul.mubr.f32.vlgmr.msra.gmra.mrb[18].mxu0 %v7830_v0  ;;  %5257 = vmatmul.mubr.f32.vlgmr.msra.gmra.mrb[34].mxu1 %v7830_v0 }
 0x9e0   :  { %6194 = vmatpush1.bf16.msra.mxu0 %v7656_v33  ;;  %6225 = vmatpush3.bf16.msra.mxu1 %v7662_v53 }
 0x9e1   :  { %6196 = vmatprep.subr.bf16.mxu0 %v7659_v44  ;;  %6226 = vmatprep.subr.bf16.mxu1 %v6955_v50 }
 0x9e2   :  { %2916 = vmatprep.mubr.f32.mxu0 %v6953_v1  ;;  %5291 = vmatprep.mubr.msk.f32.mxu1 %vm6956_vm4, %v6953_v1 }
 0x9e4   :  { %6198 = vmatpush1.bf16.msra.mxu0 %v7667_v2  ;;  %6228 = vmatpush3.bf16.msra.mxu1 %v7675_v16 }
 0x9e5   :  { %6200 = vmatprep.subr.bf16.mxu0 %v7672_v12  ;;  %6229 = vmatprep.subr.bf16.mxu1 %v6955_v50 }
 0x9e8   :  { %6202 = vmatpush1.bf16.msra.mxu0 %v7681_v28  ;;  %6231 = vmatpush3.bf16.msra.mxu1 %v7689_v56 }
 0x9e9   :  { %6204 = vmatprep.subr.bf16.mxu0 %v7686_v7  ;;  %6232 = vmatprep.subr.bf16.mxu1 %v6955_v50 }
 0x9ec   :  { %6206 = vmatpush1.bf16.msra.mxu0 %v7695_v49  ;;  %6234 = vmatpush3.bf16.msra.mxu1 %v7703_v13 }
 0x9ed   :  { %6208 = vmatprep.subr.bf16.mxu0 %v7699_v52  ;;  %6235 = vmatprep.subr.bf16.mxu1 %v6955_v50 }
 0x9f0   :  { %6210 = vmatpush1.bf16.msra.mxu0 %v7709_v6  ;;  %6237 = vmatpush3.bf16.msra.mxu1 %v7716_v27 }
 0x9f1   :  { %6212 = vmatprep.subr.bf16.mxu0 %v7713_v20  ;;  %6238 = vmatprep.subr.bf16.mxu1 %v6955_v50 }
 0x9f4   :  { %6214 = vmatpush1.bf16.msra.mxu0 %v7724_v34  ;;  %6240 = vmatpush3.bf16.msra.mxu1 %v7730_v60 }
 0x9f5   :  { %6216 = vmatprep.subr.bf16.mxu0 %v7727_v43  ;;  %6241 = vmatprep.subr.bf16.mxu1 %v6955_v50 }
 0x9f8   :  { %6218 = vmatpush1.bf16.msra.mxu0 %v7736_v42  ;;  %6243 = vmatpush3.bf16.msra.mxu1 %v7742_v63 }
 0x9f9   :  { %6220 = vmatprep.subr.bf16.mxu0 %v7739_v47  ;;  %6244 = vmatprep.subr.bf16.mxu1 %v6955_v50 }
 0x9fc   :  { %6222 = vmatpush1.bf16.msra.mxu0 %v7748_v10  ;;  %6246 = vmatpush3.bf16.msra.mxu1 %v7752_v8 }
 0x9fd   :  { %6248 = vmatprep.subr.bf16.mxu0 %v7652_v40  ;;  %6279 = vmatprep.subr.bf16.mxu1 %v6955_v50 }
 0xab2   :  { %v2750_v9 = vpop.f32.mrb[18].mxu0  ;;  %v2821_v61 = vpop.f32.mrb[34].mxu1 }
 0xab3   :  { %v6557_v29 = vadd.f32 %v2750_v9, %v7817_v22  ;;  %v2752_v32 = vpop.f32.mrb[19].mxu0  ;;  %v5258_v48 = vpop.f32.mrb[35].mxu1  ;;  %v2839_v5 = vadd.f32 %v7827_v58, %v2821_v61 }
 0xab4   :  { %v6558_v18 = vadd.f32 %v2752_v32, %v7820_v26 }
 0xab5   :  { %v4448_v17 = vmul.f32 -1.442695, %v6557_v29 }
 0xab6   :  { %v4449_v24 = vmul.f32 -1.442695, %v6558_v18 }
 0xab7   :  { %6731 = vpow2.f32 %v4448_v17 }
 0xab8   :  { %6733 = vpow2.f32 %v4449_v24 }
 0xac1   :  { %v6732_v25 = vpop.eup %6731 }
 0xac2   :  { %v2829_v35 = vadd.f32 1.0, %v6732_v25  ;;  %v6734_v55 = vpop.eup %6733 }
 0xac3   :  { %v2836_v51 = vadd.f32 1.0, %v6734_v55 }
 0xac4   :  { %6735 = vrcp.f32 %v2829_v35 }
 0xac5   :  { %6737 = vrcp.f32 %v2836_v51 }
 0xace   :  { %v6736_v31 = vpop.eup %6735 }
 0xacf   :  { %v2840_v21 = vmul.f32 %v6736_v31, %v2839_v5  ;;  %v6738_v59 = vpop.eup %6737 }
 0xad0   :  { %v2843_v11 = vsub.f32 1.0, %v6738_v59  ;;  %v2845_v15 = vmul.f32 %v6738_v59, %v7830_v0 }
 0xad1   :  { %v2841_v4 = vadd.f32 %v2840_v21, %v7802_v23 }
 0xad3   :  { %6739 = vtanh.f32 %v2841_v4 }
 0xadd   :  { %v6740_v45 = vpop.eup %6739 }
 0xade   :  { %v2844_v3 = vmul.f32 %v6740_v45, %v2843_v11 }
 0xae0   :  { %v7874_v14 = vadd.f32 %v2845_v15, %v2844_v3 }
 0xae2   :  { %2917 = vmatmul.mubr.f32.vlgmr.msra.gmra.mrb[20].mxu0 %v7874_v14  ;;  %5292 = vmatmul.mubr.f32.vlgmr.msra.gmra.mrb[36].mxu1 %v7874_v14 }
 0xae3   :  { %6250 = vmatpush1.bf16.msra.mxu0 %v7656_v33  ;;  %6281 = vmatpush3.bf16.msra.mxu1 %v7662_v53 }
 0xae4   :  { %6252 = vmatprep.subr.bf16.mxu0 %v7659_v44  ;;  %6282 = vmatprep.subr.bf16.mxu1 %v6955_v50 }
 0xae5   :  { %3084 = vmatprep.mubr.f32.mxu0 %v6953_v1  ;;  %5326 = vmatprep.mubr.msk.f32.mxu1 %vm6956_vm4, %v6953_v1 }
 0xae7   :  { %6254 = vmatpush1.bf16.msra.mxu0 %v7667_v2  ;;  %6284 = vmatpush3.bf16.msra.mxu1 %v7675_v16 }
 0xae8   :  { %6256 = vmatprep.subr.bf16.mxu0 %v7672_v12  ;;  %6285 = vmatprep.subr.bf16.mxu1 %v6955_v50 }
 0xaeb   :  { %6258 = vmatpush1.bf16.msra.mxu0 %v7681_v28  ;;  %6287 = vmatpush3.bf16.msra.mxu1 %v7689_v56 }
 0xaec   :  { %6260 = vmatprep.subr.bf16.mxu0 %v7686_v7  ;;  %6288 = vmatprep.subr.bf16.mxu1 %v6955_v50 }
 0xaef   :  { %6262 = vmatpush1.bf16.msra.mxu0 %v7695_v49  ;;  %6290 = vmatpush3.bf16.msra.mxu1 %v7703_v13 }
 0xaf0   :  { %6264 = vmatprep.subr.bf16.mxu0 %v7699_v52  ;;  %6291 = vmatprep.subr.bf16.mxu1 %v6955_v50 }
 0xaf3   :  { %6266 = vmatpush1.bf16.msra.mxu0 %v7709_v6  ;;  %6293 = vmatpush3.bf16.msra.mxu1 %v7716_v27 }
 0xaf4   :  { %6268 = vmatprep.subr.bf16.mxu0 %v7713_v20  ;;  %6294 = vmatprep.subr.bf16.mxu1 %v6955_v50 }
 0xaf7   :  { %6270 = vmatpush1.bf16.msra.mxu0 %v7724_v34  ;;  %6296 = vmatpush3.bf16.msra.mxu1 %v7730_v60 }
 0xaf8   :  { %6272 = vmatprep.subr.bf16.mxu0 %v7727_v43  ;;  %6297 = vmatprep.subr.bf16.mxu1 %v6955_v50 }
 0xafb   :  { %6274 = vmatpush1.bf16.msra.mxu0 %v7736_v42  ;;  %6299 = vmatpush3.bf16.msra.mxu1 %v7742_v63 }
 0xafc   :  { %6276 = vmatprep.subr.bf16.mxu0 %v7739_v47  ;;  %6300 = vmatprep.subr.bf16.mxu1 %v6955_v50 }
 0xaff   :  { %6278 = vmatpush1.bf16.msra.mxu0 %v7748_v10  ;;  %6302 = vmatpush3.bf16.msra.mxu1 %v7752_v8 }
 0xb00   :  { %6304 = vmatprep.subr.bf16.mxu0 %v7652_v40  ;;  %6335 = vmatprep.subr.bf16.mxu1 %v6955_v50 }
 0xbb5   :  { %v2918_v23 = vpop.f32.mrb[20].mxu0  ;;  %v2989_v9 = vpop.f32.mrb[36].mxu1 }
 0xbb6   :  { %v6559_v61 = vadd.f32 %v2918_v23, %v7817_v22  ;;  %v2920_v29 = vpop.f32.mrb[21].mxu0  ;;  %v5293_v32 = vpop.f32.mrb[37].mxu1  ;;  %v3007_v51 = vadd.f32 %v7827_v58, %v2989_v9 }
 0xbb7   :  { %v6560_v17 = vadd.f32 %v2920_v29, %v7820_v26 }
 0xbb8   :  { %v4450_v48 = vmul.f32 -1.442695, %v6559_v61 }
 0xbb9   :  { %v4451_v18 = vmul.f32 -1.442695, %v6560_v17 }
 0xbba   :  { %6741 = vpow2.f32 %v4450_v48 }
 0xbbb   :  { %6743 = vpow2.f32 %v4451_v18 }
 0xbc4   :  { %v6742_v24 = vpop.eup %6741 }
 0xbc5   :  { %v2997_v25 = vadd.f32 1.0, %v6742_v24  ;;  %v6744_v35 = vpop.eup %6743 }
 0xbc6   :  { %v3004_v55 = vadd.f32 1.0, %v6744_v35 }
 0xbc7   :  { %6745 = vrcp.f32 %v2997_v25 }
 0xbc8   :  { %6747 = vrcp.f32 %v3004_v55 }
 0xbd1   :  { %v6746_v5 = vpop.eup %6745 }
 0xbd2   :  { %v3008_v31 = vmul.f32 %v6746_v5, %v3007_v51  ;;  %v6748_v4 = vpop.eup %6747 }
 0xbd3   :  { %v3011_v59 = vsub.f32 1.0, %v6748_v4  ;;  %v3013_v3 = vmul.f32 %v6748_v4, %v7874_v14 }
 0xbd4   :  { %v3009_v21 = vadd.f32 %v3008_v31, %v7806_v30 }
 0xbd6   :  { %6749 = vtanh.f32 %v3009_v21 }
 0xbe0   :  { %v6750_v11 = vpop.eup %6749 }
 0xbe1   :  { %v3012_v45 = vmul.f32 %v6750_v11, %v3011_v59 }
 0xbe3   :  { %v7918_v15 = vadd.f32 %v3013_v3, %v3012_v45 }
 0xbe5   :  { %3085 = vmatmul.mubr.f32.vlgmr.msra.gmra.mrb[22].mxu0 %v7918_v15  ;;  %5327 = vmatmul.mubr.f32.vlgmr.msra.gmra.mrb[38].mxu1 %v7918_v15 }
 0xbe6   :  { %6306 = vmatpush1.bf16.msra.mxu0 %v7656_v33  ;;  %6337 = vmatpush3.bf16.msra.mxu1 %v7662_v53 }
 0xbe7   :  { %6308 = vmatprep.subr.bf16.mxu0 %v7659_v44  ;;  %6338 = vmatprep.subr.bf16.mxu1 %v6955_v50 }
 0xbe8   :  { %3252 = vmatprep.mubr.f32.mxu0 %v6953_v1  ;;  %5361 = vmatprep.mubr.msk.f32.mxu1 %vm6956_vm4, %v6953_v1 }
 0xbea   :  { %6310 = vmatpush1.bf16.msra.mxu0 %v7667_v2  ;;  %6340 = vmatpush3.bf16.msra.mxu1 %v7675_v16 }
 0xbeb   :  { %6312 = vmatprep.subr.bf16.mxu0 %v7672_v12  ;;  %6341 = vmatprep.subr.bf16.mxu1 %v6955_v50 }
 0xbee   :  { %6314 = vmatpush1.bf16.msra.mxu0 %v7681_v28  ;;  %6343 = vmatpush3.bf16.msra.mxu1 %v7689_v56 }
 0xbef   :  { %6316 = vmatprep.subr.bf16.mxu0 %v7686_v7  ;;  %6344 = vmatprep.subr.bf16.mxu1 %v6955_v50 }
 0xbf2   :  { %6318 = vmatpush1.bf16.msra.mxu0 %v7695_v49  ;;  %6346 = vmatpush3.bf16.msra.mxu1 %v7703_v13 }
 0xbf3   :  { %6320 = vmatprep.subr.bf16.mxu0 %v7699_v52  ;;  %6347 = vmatprep.subr.bf16.mxu1 %v6955_v50 }
 0xbf6   :  { %6322 = vmatpush1.bf16.msra.mxu0 %v7709_v6  ;;  %6349 = vmatpush3.bf16.msra.mxu1 %v7716_v27 }
 0xbf7   :  { %6324 = vmatprep.subr.bf16.mxu0 %v7713_v20  ;;  %6350 = vmatprep.subr.bf16.mxu1 %v6955_v50 }
 0xbfa   :  { %6326 = vmatpush1.bf16.msra.mxu0 %v7724_v34  ;;  %6352 = vmatpush3.bf16.msra.mxu1 %v7730_v60 }
 0xbfb   :  { %6328 = vmatprep.subr.bf16.mxu0 %v7727_v43  ;;  %6353 = vmatprep.subr.bf16.mxu1 %v6955_v50 }
 0xbfe   :  { %6330 = vmatpush1.bf16.msra.mxu0 %v7736_v42  ;;  %6355 = vmatpush3.bf16.msra.mxu1 %v7742_v63 }
 0xbff   :  { %6332 = vmatprep.subr.bf16.mxu0 %v7739_v47  ;;  %6356 = vmatprep.subr.bf16.mxu1 %v6955_v50 }
 0xc02   :  { %6334 = vmatpush1.bf16.msra.mxu0 %v7748_v10  ;;  %6358 = vmatpush3.bf16.msra.mxu1 %v7752_v8 }
 0xc03   :  { %6360 = vmatprep.subr.bf16.mxu0 %v7652_v40  ;;  %6391 = vmatprep.subr.bf16.mxu1 %v6955_v50 }
 0xcb8   :  { %v3086_v30 = vpop.f32.mrb[22].mxu0  ;;  %v3157_v23 = vpop.f32.mrb[38].mxu1 }
 0xcb9   :  { %v6561_v9 = vadd.f32 %v3086_v30, %v7817_v22  ;;  %v3088_v61 = vpop.f32.mrb[23].mxu0  ;;  %v5328_v29 = vpop.f32.mrb[39].mxu1  ;;  %v3175_v55 = vadd.f32 %v7827_v58, %v3157_v23 }
 0xcba   :  { %v6562_v48 = vadd.f32 %v3088_v61, %v7820_v26 }
 0xcbb   :  { %v4452_v32 = vmul.f32 -1.442695, %v6561_v9 }
 0xcbc   :  { %v4453_v17 = vmul.f32 -1.442695, %v6562_v48 }
 0xcbd   :  { %6751 = vpow2.f32 %v4452_v32 }
 0xcbe   :  { %6753 = vpow2.f32 %v4453_v17 }
 0xcc7   :  { %v6752_v18 = vpop.eup %6751 }
 0xcc8   :  { %v3165_v24 = vadd.f32 1.0, %v6752_v18  ;;  %v6754_v25 = vpop.eup %6753 }
 0xcc9   :  { %v3172_v35 = vadd.f32 1.0, %v6754_v25 }
 0xcca   :  { %6755 = vrcp.f32 %v3165_v24 }
 0xccb   :  { %6757 = vrcp.f32 %v3172_v35 }
 0xcd4   :  { %v6756_v51 = vpop.eup %6755 }
 0xcd5   :  { %v3176_v5 = vmul.f32 %v6756_v51, %v3175_v55  ;;  %v6758_v21 = vpop.eup %6757 }
 0xcd6   :  { %v3179_v4 = vsub.f32 1.0, %v6758_v21  ;;  %v3181_v45 = vmul.f32 %v6758_v21, %v7918_v15 }
 0xcd7   :  { %v3177_v31 = vadd.f32 %v3176_v5, %v7804_v36 }
 0xcd9   :  { %6759 = vtanh.f32 %v3177_v31 }
 0xce3   :  { %v6760_v59 = vpop.eup %6759 }
 0xce4   :  { %v3180_v11 = vmul.f32 %v6760_v59, %v3179_v4 }
 0xce6   :  { %v7962_v3 = vadd.f32 %v3181_v45, %v3180_v11 }
 0xce8   :  { %3253 = vmatmul.mubr.f32.vlgmr.msra.gmra.mrb[24].mxu0 %v7962_v3  ;;  %5362 = vmatmul.mubr.f32.vlgmr.msra.gmra.mrb[40].mxu1 %v7962_v3 }
 0xce9   :  { %6362 = vmatpush1.bf16.msra.mxu0 %v7656_v33  ;;  %6393 = vmatpush3.bf16.msra.mxu1 %v7662_v53 }
 0xcea   :  { %6364 = vmatprep.subr.bf16.mxu0 %v7659_v44  ;;  %6394 = vmatprep.subr.bf16.mxu1 %v6955_v50 }
 0xceb   :  { %3420 = vmatprep.mubr.f32.mxu0 %v6953_v1  ;;  %5396 = vmatprep.mubr.msk.f32.mxu1 %vm6956_vm4, %v6953_v1 }
 0xced   :  { %6366 = vmatpush1.bf16.msra.mxu0 %v7667_v2  ;;  %6396 = vmatpush3.bf16.msra.mxu1 %v7675_v16 }
 0xcee   :  { %6368 = vmatprep.subr.bf16.mxu0 %v7672_v12  ;;  %6397 = vmatprep.subr.bf16.mxu1 %v6955_v50 }
 0xcf1   :  { %6370 = vmatpush1.bf16.msra.mxu0 %v7681_v28  ;;  %6399 = vmatpush3.bf16.msra.mxu1 %v7689_v56 }
 0xcf2   :  { %6372 = vmatprep.subr.bf16.mxu0 %v7686_v7  ;;  %6400 = vmatprep.subr.bf16.mxu1 %v6955_v50 }
 0xcf5   :  { %6374 = vmatpush1.bf16.msra.mxu0 %v7695_v49  ;;  %6402 = vmatpush3.bf16.msra.mxu1 %v7703_v13 }
 0xcf6   :  { %6376 = vmatprep.subr.bf16.mxu0 %v7699_v52  ;;  %6403 = vmatprep.subr.bf16.mxu1 %v6955_v50 }
 0xcf9   :  { %6378 = vmatpush1.bf16.msra.mxu0 %v7709_v6  ;;  %6405 = vmatpush3.bf16.msra.mxu1 %v7716_v27 }
 0xcfa   :  { %6380 = vmatprep.subr.bf16.mxu0 %v7713_v20  ;;  %6406 = vmatprep.subr.bf16.mxu1 %v6955_v50 }
 0xcfd   :  { %6382 = vmatpush1.bf16.msra.mxu0 %v7724_v34  ;;  %6408 = vmatpush3.bf16.msra.mxu1 %v7730_v60 }
 0xcfe   :  { %6384 = vmatprep.subr.bf16.mxu0 %v7727_v43  ;;  %6409 = vmatprep.subr.bf16.mxu1 %v6955_v50 }
 0xd01   :  { %6386 = vmatpush1.bf16.msra.mxu0 %v7736_v42  ;;  %6411 = vmatpush3.bf16.msra.mxu1 %v7742_v63 }
 0xd02   :  { %6388 = vmatprep.subr.bf16.mxu0 %v7739_v47  ;;  %6412 = vmatprep.subr.bf16.mxu1 %v6955_v50 }
 0xd05   :  { %6390 = vmatpush1.bf16.msra.mxu0 %v7748_v10  ;;  %6414 = vmatpush3.bf16.msra.mxu1 %v7752_v8 }
 0xd06   :  { %6416 = vmatprep.subr.bf16.mxu0 %v7652_v40  ;;  %6447 = vmatprep.subr.bf16.mxu1 %v6955_v50 }
 0xdbb   :  { %v3254_v36 = vpop.f32.mrb[24].mxu0  ;;  %v3325_v30 = vpop.f32.mrb[40].mxu1 }
 0xdbc   :  { %v6563_v23 = vadd.f32 %v3254_v36, %v7817_v22  ;;  %v3256_v9 = vpop.f32.mrb[25].mxu0  ;;  %v5363_v61 = vpop.f32.mrb[41].mxu1  ;;  %v3343_v35 = vadd.f32 %v7827_v58, %v3325_v30 }
 0xdbd   :  { %v6564_v32 = vadd.f32 %v3256_v9, %v7820_v26 }
 0xdbe   :  { %v4454_v29 = vmul.f32 -1.442695, %v6563_v23 }
 0xdbf   :  { %v4455_v48 = vmul.f32 -1.442695, %v6564_v32 }
 0xdc0   :  { %6761 = vpow2.f32 %v4454_v29 }
 0xdc1   :  { %6763 = vpow2.f32 %v4455_v48 }
 0xdca   :  { %v6762_v17 = vpop.eup %6761 }
 0xdcb   :  { %v3333_v18 = vadd.f32 1.0, %v6762_v17  ;;  %v6764_v24 = vpop.eup %6763 }
 0xdcc   :  { %v3340_v25 = vadd.f32 1.0, %v6764_v24 }
 0xdcd   :  { %6765 = vrcp.f32 %v3333_v18 }
 0xdce   :  { %6767 = vrcp.f32 %v3340_v25 }
 0xdd7   :  { %v6766_v55 = vpop.eup %6765 }
 0xdd8   :  { %v3344_v51 = vmul.f32 %v6766_v55, %v3343_v35  ;;  %v6768_v31 = vpop.eup %6767 }
 0xdd9   :  { %v3347_v21 = vsub.f32 1.0, %v6768_v31  ;;  %v3349_v11 = vmul.f32 %v6768_v31, %v7962_v3 }
 0xdda   :  { %v3345_v5 = vadd.f32 %v3344_v51, %v7810_v41 }
 0xddc   :  { %6769 = vtanh.f32 %v3345_v5 }
 0xde6   :  { %v6770_v4 = vpop.eup %6769 }
 0xde7   :  { %v3348_v59 = vmul.f32 %v6770_v4, %v3347_v21 }
 0xde9   :  { %v8006_v45 = vadd.f32 %v3349_v11, %v3348_v59 }
 0xdeb   :  { %3421 = vmatmul.mubr.f32.vlgmr.msra.gmra.mrb[26].mxu0 %v8006_v45  ;;  %5397 = vmatmul.mubr.f32.vlgmr.msra.gmra.mrb[42].mxu1 %v8006_v45 }
 0xdec   :  { %6418 = vmatpush1.bf16.msra.mxu0 %v7656_v33  ;;  %6449 = vmatpush3.bf16.msra.mxu1 %v7662_v53 }
 0xded   :  { %6420 = vmatprep.subr.bf16.mxu0 %v7659_v44  ;;  %6450 = vmatprep.subr.bf16.mxu1 %v6955_v50 }
 0xdee   :  { %3588 = vmatprep.mubr.f32.mxu0 %v6953_v1  ;;  %5431 = vmatprep.mubr.msk.f32.mxu1 %vm6956_vm4, %v6953_v1 }
 0xdf0   :  { %6422 = vmatpush1.bf16.msra.mxu0 %v7667_v2  ;;  %6452 = vmatpush3.bf16.msra.mxu1 %v7675_v16 }
 0xdf1   :  { %6424 = vmatprep.subr.bf16.mxu0 %v7672_v12  ;;  %6453 = vmatprep.subr.bf16.mxu1 %v6955_v50 }
 0xdf4   :  { %6426 = vmatpush1.bf16.msra.mxu0 %v7681_v28  ;;  %6455 = vmatpush3.bf16.msra.mxu1 %v7689_v56 }
 0xdf5   :  { %6428 = vmatprep.subr.bf16.mxu0 %v7686_v7  ;;  %6456 = vmatprep.subr.bf16.mxu1 %v6955_v50 }
 0xdf8   :  { %6430 = vmatpush1.bf16.msra.mxu0 %v7695_v49  ;;  %6458 = vmatpush3.bf16.msra.mxu1 %v7703_v13 }
 0xdf9   :  { %6432 = vmatprep.subr.bf16.mxu0 %v7699_v52  ;;  %6459 = vmatprep.subr.bf16.mxu1 %v6955_v50 }
 0xdfc   :  { %6434 = vmatpush1.bf16.msra.mxu0 %v7709_v6  ;;  %6461 = vmatpush3.bf16.msra.mxu1 %v7716_v27 }
 0xdfd   :  { %6436 = vmatprep.subr.bf16.mxu0 %v7713_v20  ;;  %6462 = vmatprep.subr.bf16.mxu1 %v6955_v50 }
 0xe00   :  { %6438 = vmatpush1.bf16.msra.mxu0 %v7724_v34  ;;  %6464 = vmatpush3.bf16.msra.mxu1 %v7730_v60 }
 0xe01   :  { %6440 = vmatprep.subr.bf16.mxu0 %v7727_v43  ;;  %6465 = vmatprep.subr.bf16.mxu1 %v6955_v50 }
 0xe04   :  { %6442 = vmatpush1.bf16.msra.mxu0 %v7736_v42  ;;  %6467 = vmatpush3.bf16.msra.mxu1 %v7742_v63 }
 0xe05   :  { %6444 = vmatprep.subr.bf16.mxu0 %v7739_v47  ;;  %6468 = vmatprep.subr.bf16.mxu1 %v6955_v50 }
 0xe08   :  { %6446 = vmatpush1.bf16.msra.mxu0 %v7748_v10  ;;  %6470 = vmatpush3.bf16.msra.mxu1 %v7752_v8 }
 0xe09   :  { %6472 = vmatprep.subr.bf16.mxu0 %v7652_v40  ;;  %6503 = vmatprep.subr.bf16.mxu1 %v6955_v50 }
 0xebe   :  { %v3422_v41 = vpop.f32.mrb[26].mxu0  ;;  %v3493_v36 = vpop.f32.mrb[42].mxu1 }
 0xebf   :  { %v6565_v30 = vadd.f32 %v3422_v41, %v7817_v22  ;;  %v3424_v23 = vpop.f32.mrb[27].mxu0  ;;  %v5398_v9 = vpop.f32.mrb[43].mxu1  ;;  %v3511_v40 = vadd.f32 %v7827_v58, %v3493_v36 }
 0xec0   :  { %v6566_v29 = vadd.f32 %v3424_v23, %v7820_v26 }
 0xec1   :  { %v4456_v61 = vmul.f32 -1.442695, %v6565_v30 }
 0xec2   :  { %v4457_v32 = vmul.f32 -1.442695, %v6566_v29 }
 0xec3   :  { %6771 = vpow2.f32 %v4456_v61 }
 0xec4   :  { %6773 = vpow2.f32 %v4457_v32 }
 0xecd   :  { %v6772_v48 = vpop.eup %6771 }
 0xece   :  { %v3501_v17 = vadd.f32 1.0, %v6772_v48  ;;  %v6774_v18 = vpop.eup %6773 }
 0xecf   :  { %v3508_v24 = vadd.f32 1.0, %v6774_v18 }
 0xed0   :  { %6775 = vrcp.f32 %v3501_v17 }
 0xed1   :  { %6777 = vrcp.f32 %v3508_v24 }
 0xeda   :  { %v6776_v25 = vpop.eup %6775 }
 0xedb   :  { %v3512_v35 = vmul.f32 %v6776_v25, %v3511_v40  ;;  %v6778_v51 = vpop.eup %6777 }
 0xedc   :  { %v3515_v5 = vsub.f32 1.0, %v6778_v51  ;;  %v3517_v4 = vmul.f32 %v6778_v51, %v8006_v45 }
 0xedd   :  { %v3513_v55 = vadd.f32 %v3512_v35, %v7808_v62 }
 0xedf   :  { %6779 = vtanh.f32 %v3513_v55 }
 0xee9   :  { %v6780_v31 = vpop.eup %6779 }
 0xeea   :  { %v3516_v21 = vmul.f32 %v6780_v31, %v3515_v5 }
 0xeec   :  { %v8050_v59 = vadd.f32 %v3517_v4, %v3516_v21 }
 0xeee   :  { %3589 = vmatmul.mubr.f32.vlgmr.msra.gmra.mrb[28].mxu0 %v8050_v59  ;;  %5432 = vmatmul.mubr.f32.vlgmr.msra.gmra.mrb[44].mxu1 %v8050_v59 }
 0xeef   :  { %6474 = vmatpush1.bf16.msra.mxu0 %v7656_v33  ;;  %6505 = vmatpush3.bf16.msra.mxu1 %v7662_v53 }
 0xef0   :  { %6476 = vmatprep.subr.bf16.mxu0 %v7659_v44  ;;  %6506 = vmatprep.subr.bf16.mxu1 %v6955_v50 }
 0xef1   :  { %3756 = vmatprep.mubr.f32.mxu0 %v6953_v1  ;;  %5466 = vmatprep.mubr.msk.f32.mxu1 %vm6956_vm4, %v6953_v1 }
 0xef3   :  { %6478 = vmatpush1.bf16.msra.mxu0 %v7667_v2  ;;  %6508 = vmatpush3.bf16.msra.mxu1 %v7675_v16 }
 0xef4   :  { %6480 = vmatprep.subr.bf16.mxu0 %v7672_v12  ;;  %6509 = vmatprep.subr.bf16.mxu1 %v6955_v50 }
 0xef7   :  { %6482 = vmatpush1.bf16.msra.mxu0 %v7681_v28  ;;  %6511 = vmatpush3.bf16.msra.mxu1 %v7689_v56 }
 0xef8   :  { %6484 = vmatprep.subr.bf16.mxu0 %v7686_v7  ;;  %6512 = vmatprep.subr.bf16.mxu1 %v6955_v50 }
 0xefb   :  { %6486 = vmatpush1.bf16.msra.mxu0 %v7695_v49  ;;  %6514 = vmatpush3.bf16.msra.mxu1 %v7703_v13 }
 0xefc   :  { %6488 = vmatprep.subr.bf16.mxu0 %v7699_v52  ;;  %6515 = vmatprep.subr.bf16.mxu1 %v6955_v50 }
 0xeff   :  { %6490 = vmatpush1.bf16.msra.mxu0 %v7709_v6  ;;  %6517 = vmatpush3.bf16.msra.mxu1 %v7716_v27 }
 0xf00   :  { %6492 = vmatprep.subr.bf16.mxu0 %v7713_v20  ;;  %6518 = vmatprep.subr.bf16.mxu1 %v6955_v50 }
 0xf03   :  { %6494 = vmatpush1.bf16.msra.mxu0 %v7724_v34  ;;  %6520 = vmatpush3.bf16.msra.mxu1 %v7730_v60 }
 0xf04   :  { %6496 = vmatprep.subr.bf16.mxu0 %v7727_v43  ;;  %6521 = vmatprep.subr.bf16.mxu1 %v6955_v50 }
 0xf07   :  { %6498 = vmatpush1.bf16.msra.mxu0 %v7736_v42  ;;  %6523 = vmatpush3.bf16.msra.mxu1 %v7742_v63 }
 0xf08   :  { %6500 = vmatprep.subr.bf16.mxu0 %v7739_v47  ;;  %6524 = vmatprep.subr.bf16.mxu1 %v6955_v50 }
 0xf0b   :  { %6502 = vmatpush1.bf16.msra.mxu0 %v7748_v10  ;;  %6526 = vmatpush3.bf16.msra.mxu1 %v7752_v8 }
 0xf0c   :  { %6533 = vmatprep.subr.bf16.mxu1 %v6955_v50  ;;  %6527 = vmatprep.subr.bf16.mxu0 %v6955_v50 }
 0xfc1   :  { %v3590_v33 = vpop.f32.mrb[28].mxu0  ;;  %v3661_v44 = vpop.f32.mrb[44].mxu1 }
 0xfc2   :  { %v6567_v53 = vadd.f32 %v3590_v33, %v7817_v22  ;;  %v3592_v2 = vpop.f32.mrb[29].mxu0  ;;  %v5433_v12 = vpop.f32.mrb[45].mxu1  ;;  %v3679_v6 = vadd.f32 %v7827_v58, %v3661_v44 }
 0xfc3   :  { %v6568_v28 = vadd.f32 %v3592_v2, %v7820_v26 }
 0xfc4   :  { %v4458_v16 = vmul.f32 -1.442695, %v6567_v53 }
 0xfc5   :  { %v4459_v7 = vmul.f32 -1.442695, %v6568_v28 }
 0xfc6   :  { %6781 = vpow2.f32 %v4458_v16 }
 0xfc7   :  { %6783 = vpow2.f32 %v4459_v7 }
 0xfd0   :  { %v6782_v56 = vpop.eup %6781 }
 0xfd1   :  { %v3669_v49 = vadd.f32 1.0, %v6782_v56  ;;  %v6784_v52 = vpop.eup %6783 }
 0xfd2   :  { %v3676_v13 = vadd.f32 1.0, %v6784_v52 }
 0xfd3   :  { %6785 = vrcp.f32 %v3669_v49 }
 0xfd4   :  { %6787 = vrcp.f32 %v3676_v13 }
 0xfdd   :  { %v6786_v20 = vpop.eup %6785 }
 0xfde   :  { %v3680_v27 = vmul.f32 %v6786_v20, %v3679_v6  ;;  %v6788_v43 = vpop.eup %6787 }
 0xfdf   :  { %v3683_v60 = vsub.f32 1.0, %v6788_v43  ;;  %v3685_v63 = vmul.f32 %v6788_v43, %v8050_v59 }
 0xfe0   :  { %v3681_v34 = vadd.f32 %v3680_v27, %v7814_v19 }
 0xfe2   :  { %6789 = vtanh.f32 %v3681_v34 }
 0xfec   :  { %v6790_v42 = vpop.eup %6789 }
 0xfed   :  { %v3684_v47 = vmul.f32 %v6790_v42, %v3683_v60 }
 0xfef   :  { %v8094_v10 = vadd.f32 %v3685_v63, %v3684_v47 }
 0xff1   :  { %3757 = vmatmul.mubr.f32.vlgmr.msra.gmra.mrb[30].mxu0 %v8094_v10  ;;  %5467 = vmatmul.mubr.f32.vlgmr.msra.gmra.mrb[46].mxu1 %v8094_v10 }
 0xff2   :  { %5488 = vmatprep.mubr.msk.f32.mxu1 %vm6956_vm4, %v6953_v1  ;;  %5477 = vmatprep.mubr.msk.f32.mxu0 %vm6956_vm4, %v6953_v1 }
0x10c4   :  { %v3758_v8 = vpop.f32.mrb[30].mxu0  ;;  %v3829_v62 = vpop.f32.mrb[46].mxu1 }
0x10c5   :  { %v6569_v19 = vadd.f32 %v3758_v8, %v7817_v22  ;;  %v3760_v11 = vpop.f32.mrb[31].mxu0  ;;  %v5468_v41 = vpop.f32.mrb[47].mxu1  ;;  %v3847_v48 = vadd.f32 %v7827_v58, %v3829_v62 }
0x10c6   :  { %v6570_v30 = vadd.f32 %v3760_v11, %v7820_v26 }
0x10c7   :  { %v4460_v36 = vmul.f32 -1.442695, %v6569_v19 }
0x10c8   :  { %v4461_v23 = vmul.f32 -1.442695, %v6570_v30 }
0x10c9   :  { %6791 = vpow2.f32 %v4460_v36 }
0x10ca   :  { %6793 = vpow2.f32 %v4461_v23 }
0x10d3   :  { %v6792_v9 = vpop.eup %6791 }
0x10d4   :  { %v3837_v61 = vadd.f32 1.0, %v6792_v9  ;;  %v6794_v29 = vpop.eup %6793 }
0x10d5   :  { %v3844_v32 = vadd.f32 1.0, %v6794_v29 }
0x10d6   :  { %6795 = vrcp.f32 %v3837_v61 }
0x10d7   :  { %6797 = vrcp.f32 %v3844_v32 }
0x10e0   :  { %v6796_v1 = vpop.eup %6795 }
0x10e1   :  { %v3848_v17 = vmul.f32 %v6796_v1, %v3847_v48  ;;  %v6798_v18 = vpop.eup %6797 }
0x10e2   :  { %v3851_v24 = vsub.f32 1.0, %v6798_v18  ;;  %v3853_v25 = vmul.f32 %v6798_v18, %v8094_v10 }
0x10e3   :  { %v3849_v22 = vadd.f32 %v3848_v17, %v7812_v46 }
0x10e5   :  { %6799 = vtanh.f32 %v3849_v22 }
0x10ef   :  { %v6800_v40 = vpop.eup %6799 }
0x10f0   :  { %v3852_v26 = vmul.f32 %v6800_v40, %v3851_v24 }
0x10f2   :  { %v8107_v35 = vadd.f32 %v3853_v25, %v3852_v26 }
0x10f4   :  { %3910 = vrot.lane.b32.xlu0 %v8107_v35, %s6957_s9 }
0x10f8   :  { %3874 = vrot.lane.b32.xlu0 %v8107_v35, %s6958_s7 }
0x1166   :  { %v3911_v58 = vpop.permute.xlu0 %3910 }
0x1167   :  { %v3915_v55 = vmul.f32 %v3911_v58, %v8050_v59  ;;  %v3913_v46 = vmul.f32 %v3911_v58, %v8107_v35  ;;  %v3917_v51 = vmul.f32 %v3911_v58, %v7962_v3  ;;  %v3914_v5 = vmul.f32 %v3911_v58, %v8094_v10 }
0x1168   :  { %v3919_v31 = vmul.f32 %v3911_v58, %v7874_v14  ;;  %v3916_v21 = vmul.f32 %v3911_v58, %v8006_v45  ;;  %v3918_v4 = vmul.f32 %v3911_v58, %v7918_v15  ;;  %v3920_v33 = vmul.f32 %v3911_v58, %v7830_v0 }
0x1169   :  { %3933 = vrot.lane.b32.xlu0 %v3915_v55, %s6958_s7  ;;  %3929 = vrot.lane.b32.xlu1 %v3913_v46, %s6958_s7 }
0x116a   :  { %v3875_v44 = vpop.permute.xlu0 %3874 }
0x116b   :  { %v3877_v53 = vmul.f32 %v3875_v44, %v7830_v0  ;;  %v3878_v12 = vmul.f32 %v3875_v44, %v7874_v14  ;;  %v3879_v28 = vmul.f32 %v3875_v44, %v7918_v15  ;;  %v3880_v56 = vmul.f32 %v3875_v44, %v7962_v3 }
0x116c   :  { %v3881_v52 = vmul.f32 %v3875_v44, %v8006_v45  ;;  %v3882_v6 = vmul.f32 %v3875_v44, %v8050_v59  ;;  %v3883_v27 = vmul.f32 %v3875_v44, %v8094_v10  ;;  %v3884_v43 = vmul.f32 %v3875_v44, %v8107_v35 }
0x116d   :  { %3937 = vrot.lane.b32.xlu0 %v3917_v51, %s6958_s7  ;;  %3931 = vrot.lane.b32.xlu1 %v3914_v5, %s6958_s7  ;;  %v3886_v2 = vsel %vm3885_vm5, %v3877_v53, 0.0  ;;  %v3889_v16 = vsel %vm3885_vm5, %v3878_v12, 0.0  ;;  %v3892_v7 = vsel %vm3885_vm5, %v3879_v28, 0.0  ;;  %v3895_v49 = vsel %vm3885_vm5, %v3880_v56, 0.0 }
0x116e   :  { %v3898_v13 = vsel %vm3885_vm5, %v3881_v52, 0.0  ;;  %v3901_v20 = vsel %vm3885_vm5, %v3882_v6, 0.0  ;;  %v3904_v34 = vsel %vm3885_vm5, %v3883_v27, 0.0  ;;  %v3907_v60 = vsel %vm3885_vm5, %v3884_v43, 0.0 }
0x116f   :  { %v3994_v51 = vand.u32 127, %v133_v37 }
0x1171   :  { %3941 = vrot.lane.b32.xlu0 %v3919_v31, %s6958_s7  ;;  %3935 = vrot.lane.b32.xlu1 %v3916_v21, %s6958_s7 }
0x1175   :  { %3939 = vrot.lane.b32.xlu1 %v3918_v4, %s6958_s7  ;;  %v3997_v4 = vsub.s32 %v3994_v51, %v7310_v38 }
0x1179   :  { %3943 = vrot.lane.b32.xlu1 %v3920_v33, %s6958_s7 }
0x1190   :  { %3887 = vadd.xlane.f32.xlu0 %v3886_v2 }
0x119d   :  { %3890 = vadd.xlane.f32.xlu1 %v3889_v16 }
0x11a1   :  { %3893 = vadd.xlane.f32.xlu1 %v3892_v7 }
0x11a5   :  { %3896 = vadd.xlane.f32.xlu1 %v3895_v49 }
0x11a9   :  { %3899 = vadd.xlane.f32.xlu1 %v3898_v13 }
0x11ad   :  { %3902 = vadd.xlane.f32.xlu1 %v3901_v20 }
0x11b1   :  { %3905 = vadd.xlane.f32.xlu1 %v3904_v34 }
0x11b5   :  { %3908 = vadd.xlane.f32.xlu1 %v3907_v60 }
0x11db   :  { %v3930_v42 = vpop.permute.xlu1 %3929  ;;  %v3934_v62 = vpop.permute.xlu0 %3933 }
0x11dc   :  { %v3953_v47 = vsel %vm3885_vm5, %v3930_v42, 0.0  ;;  %v3959_v19 = vsel %vm3885_vm5, %v3934_v62, 0.0 }
0x11dd   :  { %3954 = vadd.xlane.f32.xlu0 %v3953_v47 }
0x11df   :  { %v3932_v63 = vpop.permute.xlu1 %3931  ;;  %v3938_v36 = vpop.permute.xlu0 %3937 }
0x11e0   :  { %v3956_v8 = vsel %vm3885_vm5, %v3932_v63, 0.0  ;;  %v3965_v30 = vsel %vm3885_vm5, %v3938_v36, 0.0 }
0x11e1   :  { %3957 = vadd.xlane.f32.xlu0 %v3956_v8 }
0x11e3   :  { %v3936_v11 = vpop.permute.xlu1 %3935  ;;  %v3942_v61 = vpop.permute.xlu0 %3941 }
0x11e4   :  { %v3962_v41 = vsel %vm3885_vm5, %v3936_v11, 0.0  ;;  %v3971_v29 = vsel %vm3885_vm5, %v3942_v61, 0.0 }
0x11e5   :  { %3960 = vadd.xlane.f32.xlu0 %v3959_v19 }
0x11e7   :  { %v3940_v23 = vpop.permute.xlu1 %3939 }
0x11e8   :  { %v3968_v9 = vsel %vm3885_vm5, %v3940_v23, 0.0 }
0x11e9   :  { %3963 = vadd.xlane.f32.xlu0 %v3962_v41 }
0x11eb   :  { %v3944_v32 = vpop.permute.xlu1 %3943 }
0x11ec   :  { %v3974_v48 = vsel %vm3885_vm5, %v3944_v32, 0.0 }
0x11ed   :  { %3966 = vadd.xlane.f32.xlu0 %v3965_v30 }
0x11f1   :  { %3969 = vadd.xlane.f32.xlu0 %v3968_v9 }
0x11f5   :  { %3972 = vadd.xlane.f32.xlu0 %v3971_v29 }
0x11f9   :  { %3975 = vadd.xlane.f32.xlu0 %v3974_v48 }
0x121d   :  { %v3888_v17 = vpop.xlane.xlu0 %3887 }
0x122a   :  { %v3891_v1 = vpop.xlane.xlu1 %3890 }
0x122e   :  { %v3894_v22 = vpop.xlane.xlu1 %3893 }
0x1232   :  { %v3897_v24 = vpop.xlane.xlu1 %3896 }
0x1236   :  { %v3900_v25 = vpop.xlane.xlu1 %3899 }
0x123a   :  { %v3903_v55 = vpop.xlane.xlu1 %3902 }
0x123e   :  { %v3906_v53 = vpop.xlane.xlu1 %3905 }
0x1242   :  { %v3909_v20 = vpop.xlane.xlu1 %3908 }
0x126a   :  { %v3955_v18 = vpop.xlane.xlu0 %3954 }
0x126b   :  { %v3977_v33 = vadd.f32 %v3955_v18, %v3888_v17  ;;  %v4163_v18 = vsub.s32 6, %v7310_v38 }
0x126d   :  { %v3998_v56 = vrot.slane %v3977_v33, %v3997_v4  ;;  %v4228_v33 = vld [vmem:[%s8252_s11 + $0x10] sm:$0xff] }
0x126e   :  { %v3958_v40 = vpop.xlane.xlu0 %3957 }
0x126f   :  { %v3978_v5 = vadd.f32 %v3958_v40, %v3891_v1 }
0x1271   :  { %v4002_v12 = vrot.slane %v3978_v5, %v3997_v4 }
0x1272   :  { %v3961_v26 = vpop.xlane.xlu0 %3960 }
0x1273   :  { %v3979_v31 = vadd.f32 %v3961_v26, %v3894_v22  ;;  %v4028_v13 = vsel %vm4027_vm6, %v4002_v12, %v3998_v56  ;;  %v4142_v26 = vsub.s32 3, %v7310_v38  ;;  %v4170_v12 = vsub.s32 7, %v7310_v38 }
0x1275   :  { %v4006_v28 = vrot.slane %v3979_v31, %v3997_v4  ;;  %v4156_v31 = vsub.s32 5, %v7310_v38 }
0x1276   :  { %v3964_v58 = vpop.xlane.xlu0 %3963 }
0x1277   :  { %v3980_v44 = vadd.f32 %v3964_v58, %v3897_v24  ;;  %v4030_v27 = vsel %vm4029_vm7, %v4006_v28, %v4028_v13  ;;  %v4223_v58 = vld [vmem:[%s8251_s10 + $0x8] sm:$0xff] }
0x1279   :  { %v4010_v49 = vrot.slane %v3980_v44, %v3997_v4 }
0x127a   :  { %v3967_v46 = vpop.xlane.xlu0 %3966 }
0x127b   :  { %v3981_v2 = vadd.f32 %v3967_v46, %v3900_v25  ;;  %v4032_v60 = vsel %vm4031_vm8, %v4010_v49, %v4030_v27  ;;  %v4222_v25 = vld [vmem:[%s8251_s10] sm:$0xff]  ;;  %v4225_v46 = vld [vmem:[%s8251_s10 + $0x18] sm:$0xff] }
0x127d   :  { %v4014_v37 = vrot.slane %v3981_v2, %v3997_v4 }
0x127e   :  { %v3970_v21 = vpop.xlane.xlu0 %3969 }
0x127f   :  { %v3982_v16 = vadd.f32 %v3970_v21, %v3903_v55  ;;  %v4034_v47 = vsel %vm4033_vm9, %v4014_v37, %v4032_v60  ;;  %v4149_v55 = vsub.s32 4, %v7310_v38  ;;  %v4226_v21 = vld [vmem:[%s8252_s11] sm:$0xff] }
0x1281   :  { %v4018_v6 = vrot.slane %v3982_v16, %v3997_v4 }
0x1282   :  { %v3973_v7 = vpop.xlane.xlu0 %3972 }
0x1283   :  { %v3983_v52 = vadd.f32 %v3973_v7, %v3906_v53  ;;  %v4036_v8 = vsel %vm4035_vm10, %v4018_v6, %v4034_v47  ;;  %v4229_v53 = vld [vmem:[%s8252_s11 + $0x18] sm:$0xff] }
0x1284   :  { %v6531_v16 = vpack.c.bf16 %v4229_v53, %v4228_v33 }
0x1285   :  { %v4022_v34 = vrot.slane %v3983_v52, %v3997_v4 }
0x1286   :  { %v3976_v43 = vpop.xlane.xlu0 %3975 }
0x1287   :  { %v3984_v42 = vadd.f32 %v3976_v43, %v3909_v20  ;;  %v4038_v62 = vsel %vm4037_vm11, %v4022_v34, %v4036_v8 }
0x1289   :  { %v4026_v63 = vrot.slane %v3984_v42, %v3997_v4  ;;  %v4227_v4 = vld [vmem:[%s8252_s11 + $0x8] sm:$0xff]  ;;  %s6959_s11 = smov [#allocation15]  }
0x128a   :  { %v6528_v44 = vpack.c.bf16 %v4227_v4, %v4226_v21  ;;  %s4394_s0 = sshll.u32 %s6959_s11, 4  ;;  %s4395_s0 = int_to_ptr.vmem [resolvable:$true] %s4394_s0 }
0x128b   :  { %v4040_v19 = vsel %vm4039_vm12, %v4026_v63, %v4038_v62  ;;  %s6916_s22 = scalar_lea.vmem %s4395_s0, 128  ;;  %p6921_p13 = scmp.lt.s32.totalorder %s4395_s0, %s4395_s0 }
0x128c   :  { %4042 = vxpose.xlu1.b32.start.end [1/1] (short) (narrow) %v4040_v19, 8  ;;  %6529 = vmatpush3.bf16.msra.mxu0 %v6528_v44  ;;  %p6917_p12 = scmp.ne.s32.totalorder %s4395_s0, %s6916_s22  ;;  %p6922_p0 = scmp.lt.s32.totalorder %s6916_s22, %s6916_s22 }
0x128d   :  { %6530 = vmatprep.subr.bf16.mxu0 %v6955_v50 }
0x128e   :  { %p6923_p1 = por %p6922_p0, %p6921_p13 }
0x1290   :  { %6532 = vmatpush3.bf16.msra.mxu0 %v6531_v16  ;;  %p6924_p2 = pnand %p6923_p1, %p6917_p12 }
0x130c   :  { %v4058_v11 = vpop.trf.xlu1 }
0x130d   :  { %v4075_v41 = vsel %vm4074_vm13, %v4058_v11, -inf }
0x130e   :  { %4076 = vmax.xlane.f32.xlu0 %v4075_v41 }
0x139b   :  { %v4077_v36 = vpop.xlane.xlu0 %4076 }
0x139c   :  { %v4078_v30 = vsub.f32 %v4058_v11, %v4077_v36 }
0x139e   :  { %v4079_v23 = vmul.f32 1.442695, %v4078_v30 }
0x13a0   :  { %6801 = vpow2.f32 %v4079_v23 }
0x13aa   :  { %v6802_v9 = vpop.eup %6801 }
0x13ab   :  { %v4081_v61 = vsel %vm4074_vm13, %v6802_v9, 0.0 }
0x13ac   :  { %4082 = vadd.xlane.f32.xlu0 %v4081_v61 }
0x1439   :  { %v4083_v29 = vpop.xlane.xlu0 %4082 }
0x143a   :  { %6803 = vrcp.f32 %v4083_v29 }
0x1444   :  { %v6804_v32 = vpop.eup %6803 }
0x1445   :  { %v4085_v48 = vmul.f32 %v6804_v32, %v6802_v9 }
0x1447   :  { %4087 = vxpose.xlu0.b32.start.end [1/1] (short) (narrow) %v4085_v48, 8  ;;  %4086 = vst.msk [vmem:[#allocation15] sm:$0xff] %vm4074_vm13, %v4085_v48 }
0x14c7   :  { %v4103_v1 = vpop.trf.xlu0 }
0x14c8   :  { %v4129_v17 = vrot.slane %v4103_v1, %v7329_v57  ;;  %v4122_v22 = vrot.slane %v4103_v1, %v7326_v54  ;;  %v4164_v24 = vrot.slane %v4103_v1, %v4163_v18  ;;  %v4136_v40 = vrot.slane %v4103_v1, %v7313_v39  ;;  %v4224_v39 = vld [vmem:[%s8251_s10 + $0x10] sm:$0xff] }
0x14c9   :  { %v6534_v54 = vpack.c.bf16 %v4223_v58, %v4222_v25  ;;  %v4143_v57 = vrot.slane %v4103_v1, %v4142_v26  ;;  %v6537_v51 = vpack.c.bf16 %v4225_v46, %v4224_v39  ;;  %v4150_v5 = vrot.slane %v4103_v1, %v4149_v55 }
0x14ca   :  { %4131 = vbcast.lane.b32.xlu0 %v4129_v17, 256  ;;  %4124 = vbcast.lane.b32.xlu1 %v4122_v22, 256  ;;  %v4157_v2 = vrot.slane %v4103_v1, %v4156_v31  ;;  %v4171_v28 = vrot.slane %v4103_v1, %v4170_v12 }
0x14cb   :  { %6535 = vmatpush3.bf16.msra.mxu1 %v6534_v54 }
0x14cc   :  { %6536 = vmatprep.subr.bf16.mxu1 %v6955_v50 }
0x14ce   :  { %4166 = vbcast.lane.b32.xlu0 %v4164_v24, 256  ;;  %4138 = vbcast.lane.b32.xlu1 %v4136_v40, 256 }
0x14cf   :  { %6538 = vmatpush3.bf16.msra.mxu1 %v6537_v51 }
0x14d2   :  { %4145 = vbcast.lane.b32.xlu1 %v4143_v57, 256 }
0x14d6   :  { %4152 = vbcast.lane.b32.xlu1 %v4150_v5, 256 }
0x14da   :  { %4159 = vbcast.lane.b32.xlu1 %v4157_v2, 256 }
0x14de   :  { %4173 = vbcast.lane.b32.xlu1 %v4171_v28, 256 }
0x153c   :  { %v4125_v7 = vpop.permute.xlu1 %4124  ;;  %v4132_v56 = vpop.permute.xlu0 %4131 }
0x153d   :  { %v4176_v49 = vmul.f32 %v4132_v56, %v7874_v14  ;;  %v4199_v52 = vmul.f32 %v4132_v56, %v8094_v10  ;;  %v4175_v13 = vmul.f32 %v4125_v7, %v7830_v0  ;;  %v4198_v38 = vmul.f32 %v4125_v7, %v8107_v35 }
0x153f   :  { %v4184_v50 = vsel %vm3885_vm5, %v4176_v49, 0.0  ;;  %v4208_v27 = vsel %vm4206_vm14, %v4199_v52, 0.0  ;;  %v4183_v43 = vsel %vm3885_vm5, %v4175_v13, 0.0  ;;  %v4207_v60 = vsel %vm4206_vm14, %v4198_v38, 0.0 }
0x1540   :  { %v4139_v37 = vpop.permute.xlu1 %4138  ;;  %v4185_v62 = vadd.f32 %v4184_v50, %v4183_v43  ;;  %v4209_v19 = vadd.f32 %v4208_v27, %v4207_v60  ;;  %v4167_v9 = vpop.permute.xlu0 %4166 }
0x1541   :  { %v4177_v6 = vmul.f32 %v4139_v37, %v7918_v15  ;;  %v4200_v20 = vmul.f32 %v4139_v37, %v8050_v59  ;;  %v4181_v18 = vmul.f32 %v4167_v9, %v8094_v10  ;;  %v4204_v24 = vmul.f32 %v4167_v9, %v7874_v14 }
0x1543   :  { %v4186_v63 = vsel %vm3885_vm5, %v4177_v6, 0.0  ;;  %v4210_v8 = vsel %vm4206_vm14, %v4200_v20, 0.0  ;;  %v4194_v39 = vsel %vm3885_vm5, %v4181_v18, 0.0  ;;  %v4218_v46 = vsel %vm4206_vm14, %v4204_v24, 0.0 }
0x1544   :  { %v4146_v34 = vpop.permute.xlu1 %4145  ;;  %v4187_v61 = vadd.f32 %v4186_v63, %v4185_v62  ;;  %v4211_v29 = vadd.f32 %v4210_v8, %v4209_v19 }
0x1545   :  { %v4178_v42 = vmul.f32 %v4146_v34, %v7962_v3  ;;  %v4201_v47 = vmul.f32 %v4146_v34, %v8006_v45 }
0x1547   :  { %v4188_v41 = vsel %vm3885_vm5, %v4178_v42, 0.0  ;;  %v4212_v36 = vsel %vm4206_vm14, %v4201_v47, 0.0 }
0x1548   :  { %v4153_v11 = vpop.permute.xlu1 %4152  ;;  %v4189_v1 = vadd.f32 %v4188_v41, %v4187_v61  ;;  %v4213_v17 = vadd.f32 %v4212_v36, %v4211_v29 }
0x1549   :  { %v4179_v30 = vmul.f32 %v4153_v11, %v8006_v45  ;;  %v4202_v23 = vmul.f32 %v4153_v11, %v7962_v3 }
0x154b   :  { %v4190_v32 = vsel %vm3885_vm5, %v4179_v30, 0.0  ;;  %v4214_v48 = vsel %vm4206_vm14, %v4202_v23, 0.0 }
0x154c   :  { %v4160_v22 = vpop.permute.xlu1 %4159  ;;  %v4191_v26 = vadd.f32 %v4190_v32, %v4189_v1  ;;  %v4215_v3 = vadd.f32 %v4214_v48, %v4213_v17 }
0x154d   :  { %v4180_v40 = vmul.f32 %v4160_v22, %v8050_v59  ;;  %v4203_v45 = vmul.f32 %v4160_v22, %v7918_v15 }
0x154f   :  { %v4192_v25 = vsel %vm3885_vm5, %v4180_v40, 0.0  ;;  %v4216_v58 = vsel %vm4206_vm14, %v4203_v45, 0.0 }
0x1550   :  { %v4193_v54 = vadd.f32 %v4192_v25, %v4191_v26  ;;  %v4217_v57 = vadd.f32 %v4216_v58, %v4215_v3  ;;  %v4174_v55 = vpop.permute.xlu1 %4173 }
0x1551   :  { %v4182_v10 = vmul.f32 %v4174_v55, %v8107_v35  ;;  %v4205_v14 = vmul.f32 %v4174_v55, %v7830_v0 }
0x1552   :  { %v4195_v59 = vadd.f32 %v4194_v39, %v4193_v54  ;;  %v4219_v51 = vadd.f32 %v4218_v46, %v4217_v57 }
0x1553   :  { %v4196_v15 = vsel %vm3885_vm5, %v4182_v10, 0.0  ;;  %v4220_v5 = vsel %vm4206_vm14, %v4205_v14, 0.0 }
0x1554   :  { %v4197_v31 = vadd.f32 %v4196_v15, %v4195_v59  ;;  %v4221_v21 = vadd.f32 %v4220_v5, %v4219_v51 }
0x1556   :  { %4231 = vrot.lane.b32.xlu0 %v4221_v21, %s6958_s7  ;;  %5489 = vmatmul.mubr.msk.f32.vlgmr.msra.gmra.mrb[48].mxu1 %vm3885_vm5, %v4197_v31 }
0x15c8   :  { %v4232_v4 = vpop.permute.xlu0 %4231 }
0x15c9   :  { %5478 = vmatmul.mubr.msk.f32.vlgmr.msra.gmra.mrb[32].mxu0 %vm3885_vm5, %v4232_v4 }
0x15ca   :  { %6927 = shalt.err (!%p6924_p2)
}
0x15cb   :  { %s6928_s2 = scalar_lea.hbm %s8254_s13, 128 }
0x15cc   :  { %p6929_p3 = scmp.ne.s32.totalorder %s8254_s13, %s6928_s2  ;;  %p6932_p4 = scmp.lt.u32.totalorder %s6928_s2, %s8254_s13 }
0x15ce   :  { %p6934_p5 = pnand %p6932_p4, %p6929_p3 }
0x15d0   :  { %6937 = shalt.err (!%p6934_p5)
}
0x15d1   :  { %4397 = dma.vmem_to_hbm [thread:$0]  %s4395_s0, 128, %s8254_s13, [#allocation8]   ;;  %v4464_v44 = vld [vmem:[#allocation5] ss:$0 sm:$0xff]  ;;  %vm4386_vm15 = vcmask 7168  }
0x1629   :  { %v4374_v0 = vpop.f32.mrb[48].mxu1 }
0x162a   :  { %v5490_v35 = vpop.f32.mrb[49].mxu1 }
0x169c   :  { %v4301_v33 = vpop.f32.mrb[32].mxu0 }
0x169d   :  { %v4375_v53 = vadd.f32 %v4374_v0, %v4301_v33  ;;  %v5479_v2 = vpop.f32.mrb[33].mxu0 }
0x169f   :  { %v4385_v12 = vadd.f32 %v4464_v44, %v4375_v53 }
0x16a1   :  { %4387 = vst.msk [vmem:[%s8255_s14] sm:$0xff] %vm4386_vm15, %v4385_v12 }
0x16a2   :  { %6944 = dma.done.wait [#allocation8], 128  }
0x16a3   :  { %6945 = vsyncadd [#allocation8], 4294967168 }
0x16a4   :  { %4405 = vsyncpa [#allocation7], 1 }
0x16a5   :  { %4406 = vsyncpa [#allocation10], 1 }
0x16a6   :  { %4407 = vsyncpa [#allocation13], 1 }
0x16a7   :  { %4408 = vsyncpa [#allocation8], 1 }

</bundles_post_ra>
